<compile_context>
chip_gen: v5e
topology: v5e:2x2
jax: 0.10.0
libtpu: 0.0.40
codegen_flags: <defaults>
</compile_context>

<pallas_src>
import functools

import jax
import jax.numpy as jnp
from jax.experimental import pallas as pl
from jax.experimental.pallas import tpu as pltpu


def deepset_kernel(x_ref, w1_ref, b1_ref, w2_ref, b2_ref,
                   w3_ref, b3_ref, w4_ref, b4_ref, out_ref, *, set_size):
    # x_ref: (TB * S, D) rows of the current batch tile (already flattened and
    # cast to the compute dtype in the wrapper).
    xf = x_ref[...]

    # phi network, applied per set element.  MXU matmuls, f32 accumulation;
    # bias add + ReLU run on the f32 accumulator outputs (VPU).
    w1 = w1_ref[...]
    h1 = jnp.dot(xf, w1, preferred_element_type=jnp.float32) + b1_ref[...]
    h1 = jnp.maximum(h1, 0.0)                                    # (TB*S, H1) f32

    w2 = w2_ref[...]
    ph = jnp.dot(h1.astype(w2.dtype), w2,
                 preferred_element_type=jnp.float32) + b2_ref[...]
    ph = jnp.maximum(ph, 0.0)                                    # (TB*S, P) f32

    # Permutation-invariant bottleneck: sum over the set dimension.  Splitting
    # the row axis by S (== 8 == f32 sublane count) is tiling-aligned, so this
    # is a cheap sublane reduction, not a relayout.
    rows, p_dim = ph.shape
    agg = jnp.sum(ph.reshape(rows // set_size, set_size, p_dim), axis=1)  # (TB, P)

    # rho network.
    w3 = w3_ref[...]
    r1 = jnp.dot(agg.astype(w3.dtype), w3,
                 preferred_element_type=jnp.float32) + b3_ref[...]
    r1 = jnp.maximum(r1, 0.0)                                    # (TB, R) f32

    # Final Linear(R, 1) as a VPU multiply + lane reduce (w4 kept f32 as a
    # (1, R) row).  The (TB,1)->(1,TB) transpose rides the XLU slot, which has
    # slack here; the store is lane-dense (1, TB).
    out_col = jnp.sum(r1 * w4_ref[...], axis=-1, keepdims=True) + b4_ref[...]  # (TB, 1)
    out_ref[...] = out_col.T.astype(out_ref.dtype)               # (1, TB)


def deepset_forward(x, params, *, batch_tile=512, compute_dtype=jnp.bfloat16):
    """x: (B, S, D) float32 -> (B, 1) float32.

    batch_tile: rows of the batch processed per grid step (multiple of 128).
      512 is a good default on all generations; it is clamped down for small
      batches.  compute_dtype controls the MXU input precision (bf16 default,
      float32 for exact parity with the PyTorch module); accumulation is
      always float32.
    """
    (w1, b1, w2, b2, w3, b3, w4, b4) = params
    B, S, D = x.shape
    H1, P, R = w1.shape[1], w2.shape[1], w3.shape[1]

    assert batch_tile % 128 == 0 and batch_tile >= 128, \
        "batch_tile must be a lane-aligned multiple of 128"
    # Clamp the tile to the (128-aligned) batch so tiny batches stay cheap.
    TB = min(batch_tile, pl.cdiv(B, 128) * 128)

    n_tiles = pl.cdiv(B, TB)
    B_pad = n_tiles * TB
    if B_pad != B:
        # Padded rows run through phi/rho (wasted work on the last tile only)
        # and are discarded by the final slice.
        x = jnp.pad(x, ((0, B_pad - B), (0, 0), (0, 0)))

    # Hoist the flatten + cast out of the kernel: layout plumbing, not compute.
    xf = x.reshape(B_pad * S, D).astype(compute_dtype)
    # Matmul weights in the compute dtype; biases and the tiny VPU tail in f32.
    w1c = w1.astype(compute_dtype)
    w2c = w2.astype(compute_dtype)
    w3c = w3.astype(compute_dtype)

    def resident(shape):
        # Constant block index -> weight/bias stays resident in VMEM.
        return pl.BlockSpec(shape, lambda i: (0, 0))

    itemsize = jnp.dtype(compute_dtype).itemsize
    weight_bytes = (w1c.size + w2c.size + w3c.size) * itemsize \
        + (b1.size + b2.size + b3.size + w4.size + b4.size) * 4
    x_tile_bytes = TB * S * D * itemsize
    inter_bytes = TB * S * (H1 + P) * 4 + TB * (P + R) * 4
    # x tile double-buffered + out double-buffered + resident weights
    # + intermediate vregs/spill headroom.
    est_vmem = 2 * x_tile_bytes + 2 * TB * 4 + weight_bytes + inter_bytes

    compiler_kwargs = dict(
        dimension_semantics=("parallel",),          # shard tiles over TCs (v7x)
    )
    if est_vmem > 12 * 1024 * 1024:
        # Only needed for very large batch tiles (v5e scoped default is 16 MiB);
        # cap below the v7x 64 MiB physical VMEM.
        compiler_kwargs["vmem_limit_bytes"] = int(min(2 * est_vmem, 60 * 1024 * 1024))

    cost = pl.CostEstimate(
        flops=2 * B_pad * S * (D * H1 + H1 * P) + 2 * B_pad * (P * R + R),
        transcendentals=0,
        bytes_accessed=int(xf.size) * itemsize + B_pad * 4 + int(weight_bytes),
    )

    out_row = pl.pallas_call(
        functools.partial(deepset_kernel, set_size=S),
        out_shape=jax.ShapeDtypeStruct((1, B_pad), jnp.float32),
        grid_spec=pltpu.PrefetchScalarGridSpec(
            num_scalar_prefetch=0,
            grid=(n_tiles,),
            in_specs=[
                pl.BlockSpec((TB * S, D), lambda i: (i, 0)),     # streamed x tile
                resident(w1c.shape), resident(b1.shape),
                resident(w2c.shape), resident(b2.shape),
                resident(w3c.shape), resident(b3.shape),
                resident(w4.shape), resident(b4.shape),
            ],
            out_specs=pl.BlockSpec((1, TB), lambda i: (0, i)),   # lane-dense out
        ),
        compiler_params=pltpu.CompilerParams(**compiler_kwargs),
        cost_estimate=cost,
    )(xf, w1c, b1, w2c, b2, w3c, b3, w4, b4)

    return out_row[0, :B, None]                                  # (B, 1)


def kaiming_uniform(key, fan_in, shape):
    # torch.nn.init.kaiming_uniform_(nonlinearity='relu'):
    #   gain = sqrt(2); bound = gain * sqrt(3 / fan_in)
    bound = jnp.sqrt(2.0) * jnp.sqrt(3.0 / fan_in)
    return jax.random.uniform(key, shape, jnp.float32, -bound, bound)


def make_params(key, input_dim, phi_hidden_dim, phi_output_dim, rho_hidden_dim):
    k1, k2, k3, k4 = jax.random.split(key, 4)
    # Linear weights stored as (in_features, out_features) so the kernel does x @ W.
    w1 = kaiming_uniform(k1, input_dim, (input_dim, phi_hidden_dim))
    b1 = jnp.zeros((1, phi_hidden_dim), jnp.float32)
    w2 = kaiming_uniform(k2, phi_hidden_dim, (phi_hidden_dim, phi_output_dim))
    b2 = jnp.zeros((1, phi_output_dim), jnp.float32)
    w3 = kaiming_uniform(k3, phi_output_dim, (phi_output_dim, rho_hidden_dim))
    b3 = jnp.zeros((1, rho_hidden_dim), jnp.float32)
    # Final layer stored as a (1, rho_hidden_dim) row -> in-kernel VPU reduce.
    w4 = kaiming_uniform(k4, rho_hidden_dim, (1, rho_hidden_dim))
    b4 = jnp.zeros((1, 1), jnp.float32)
    return (w1, b1, w2, b2, w3, b3, w4, b4)


def deepset_reference(x, params, compute_dtype=jnp.float32):
    """Pure-JAX reference.  With compute_dtype=bf16 it mirrors the kernel's
    mixed precision (bf16 matmul inputs, f32 accumulation)."""
    (w1, b1, w2, b2, w3, b3, w4, b4) = params
    cd = compute_dtype
    h = jnp.maximum(
        jnp.dot(x.astype(cd), w1.astype(cd), preferred_element_type=jnp.float32) + b1, 0.0)
    p = jnp.maximum(
        jnp.dot(h.astype(cd), w2.astype(cd), preferred_element_type=jnp.float32) + b2, 0.0)
    agg = jnp.sum(p, axis=1)
    r = jnp.maximum(
        jnp.dot(agg.astype(cd), w3.astype(cd), preferred_element_type=jnp.float32) + b3, 0.0)
    return r @ w4.T + b4


if __name__ == "__main__":
    # Shapes consistent with the module's forward: x (batch, set_size, input_dim).
    B, S, D = 2, 8, 32
    PHI_HIDDEN, PHI_OUT, RHO_HIDDEN = 64, 32, 64
    # TODO(synk): use_embedding=True path (nn.Embedding lookup) not implemented;
    # it is a gather outside the dense hot path and defaults to False.

    key = jax.random.PRNGKey(0)
    kx, kp, kx2, kx3 = jax.random.split(key, 4)
    params = make_params(kp, D, PHI_HIDDEN, PHI_OUT, RHO_HIDDEN)

    # 1) Small batch, f32 end-to-end: exact parity with the PyTorch semantics.
    x = jax.random.normal(kx, (B, S, D), jnp.float32)
    out = jax.block_until_ready(deepset_forward(x, params, compute_dtype=jnp.float32))
    ref = deepset_reference(x, params)
    assert out.shape == (B, 1)
    assert jnp.allclose(out, ref, atol=1e-4, rtol=1e-4), (out, ref)

    # 2) Non-multiple batch: exercises padding + tile clamping, still f32.
    B2 = 200
    x2 = jax.random.normal(kx2, (B2, S, D), jnp.float32)
    out2 = jax.block_until_ready(deepset_forward(x2, params, compute_dtype=jnp.float32))
    ref2 = deepset_reference(x2, params)
    assert out2.shape == (B2, 1)
    assert jnp.allclose(out2, ref2, atol=1e-4, rtol=1e-4)

    # 3) Multi-tile default path: bf16 inputs/weights, f32 accumulation,
    #    batch_tile=512 -> 4 pipelined grid steps.  Compared against a
    #    mixed-precision reference that mirrors the kernel arithmetic.
    B3 = 2048
    x3 = jax.random.normal(kx3, (B3, S, D), jnp.float32)
    out3 = jax.block_until_ready(deepset_forward(x3, params))
    ref3 = deepset_reference(x3, params, compute_dtype=jnp.bfloat16)
    assert out3.shape == (B3, 1)
    assert jnp.allclose(out3, ref3, atol=2e-2, rtol=2e-2)

    print("KERNEL_OK")
</pallas_src>

<mosaic_0001>
module attributes {stable_mosaic.version = 11 : i64} {
  func.func @deepset_kernel(%arg0: i32, %arg1: memref<1024x32xf32, #tpu.memory_space<vmem>>, %arg2: memref<32x64xf32, #tpu.memory_space<vmem>>, %arg3: memref<1x64xf32, #tpu.memory_space<vmem>>, %arg4: memref<64x32xf32, #tpu.memory_space<vmem>>, %arg5: memref<1x32xf32, #tpu.memory_space<vmem>>, %arg6: memref<32x64xf32, #tpu.memory_space<vmem>>, %arg7: memref<1x64xf32, #tpu.memory_space<vmem>>, %arg8: memref<1x64xf32, #tpu.memory_space<vmem>>, %arg9: memref<1x1xf32, #tpu.memory_space<vmem>>, %arg10: memref<1x128xf32, #tpu.memory_space<vmem>>) attributes {dimension_semantics = [#tpu.dimension_semantics<parallel>], iteration_bounds = array<i64: 1>, scalar_prefetch = 0 : i64, scratch_operands = 0 : i64, tpu.core_type = #tpu.core_type<tc>, window_params = [{transform_indices = @transform_0, window_bounds = array<i64: 1024, 32>}, {pipeline_mode = #tpu.pipeline_mode<synchronous>, transform_indices = @transform_1, window_bounds = array<i64: 32, 64>}, {pipeline_mode = #tpu.pipeline_mode<synchronous>, transform_indices = @transform_2, window_bounds = array<i64: 1, 64>}, {pipeline_mode = #tpu.pipeline_mode<synchronous>, transform_indices = @transform_3, window_bounds = array<i64: 64, 32>}, {pipeline_mode = #tpu.pipeline_mode<synchronous>, transform_indices = @transform_4, window_bounds = array<i64: 1, 32>}, {pipeline_mode = #tpu.pipeline_mode<synchronous>, transform_indices = @transform_5, window_bounds = array<i64: 32, 64>}, {pipeline_mode = #tpu.pipeline_mode<synchronous>, transform_indices = @transform_6, window_bounds = array<i64: 1, 64>}, {pipeline_mode = #tpu.pipeline_mode<synchronous>, transform_indices = @transform_7, window_bounds = array<i64: 1, 64>}, {pipeline_mode = #tpu.pipeline_mode<synchronous>, transform_indices = @transform_8, window_bounds = array<i64: 1, 1>}, {transform_indices = @transform_9, window_bounds = array<i64: 1, 128>}]} {
    %c0 = arith.constant 0 : index
    %c0_0 = arith.constant 0 : index
    %0 = vector.load %arg1[%c0, %c0_0] : memref<1024x32xf32, #tpu.memory_space<vmem>>, vector<1024x32xf32>
    %c0_1 = arith.constant 0 : index
    %c0_2 = arith.constant 0 : index
    %1 = vector.load %arg2[%c0_1, %c0_2] : memref<32x64xf32, #tpu.memory_space<vmem>>, vector<32x64xf32>
    %cst = arith.constant dense<0.000000e+00> : vector<1024x64xf32>
    %2 = tpu.matmul %0, %1, %cst {dimension_numbers = #tpu.dot_dimension_numbers<[1], [0], [0], [1], [0, 0, 1, 1], [], []>} : vector<1024x32xf32>, vector<32x64xf32>, vector<1024x64xf32> -> vector<1024x64xf32>
    %c0_3 = arith.constant 0 : index
    %c0_4 = arith.constant 0 : index
    %3 = vector.load %arg3[%c0_3, %c0_4] : memref<1x64xf32, #tpu.memory_space<vmem>>, vector<1x64xf32>
    %4 = vector.broadcast %3 : vector<1x64xf32> to vector<1024x64xf32>
    %5 = arith.addf %2, %4 : vector<1024x64xf32>
    %cst_5 = arith.constant 0.000000e+00 : f32
    %6 = vector.broadcast %cst_5 : f32 to vector<1024x64xf32>
    %7 = arith.maximumf %5, %6 : vector<1024x64xf32>
    %c0_6 = arith.constant 0 : index
    %c0_7 = arith.constant 0 : index
    %8 = vector.load %arg4[%c0_6, %c0_7] : memref<64x32xf32, #tpu.memory_space<vmem>>, vector<64x32xf32>
    %cst_8 = arith.constant dense<0.000000e+00> : vector<1024x32xf32>
    %9 = tpu.matmul %7, %8, %cst_8 {dimension_numbers = #tpu.dot_dimension_numbers<[1], [0], [0], [1], [0, 0, 1, 1], [], []>} : vector<1024x64xf32>, vector<64x32xf32>, vector<1024x32xf32> -> vector<1024x32xf32>
    %c0_9 = arith.constant 0 : index
    %c0_10 = arith.constant 0 : index
    %10 = vector.load %arg5[%c0_9, %c0_10] : memref<1x32xf32, #tpu.memory_space<vmem>>, vector<1x32xf32>
    %11 = vector.broadcast %10 : vector<1x32xf32> to vector<1024x32xf32>
    %12 = arith.addf %9, %11 : vector<1024x32xf32>
    %cst_11 = arith.constant 0.000000e+00 : f32
    %13 = vector.broadcast %cst_11 : f32 to vector<1024x32xf32>
    %14 = arith.maximumf %12, %13 : vector<1024x32xf32>
    %15 = vector.shape_cast %14 : vector<1024x32xf32> to vector<128x8x32xf32>
    %cst_12 = arith.constant dense<0.000000e+00> : vector<128x32xf32>
    %16 = vector.multi_reduction <add>, %15, %cst_12 [1] : vector<128x8x32xf32> to vector<128x32xf32>
    %c0_13 = arith.constant 0 : index
    %c0_14 = arith.constant 0 : index
    %17 = vector.load %arg6[%c0_13, %c0_14] : memref<32x64xf32, #tpu.memory_space<vmem>>, vector<32x64xf32>
    %cst_15 = arith.constant dense<0.000000e+00> : vector<128x64xf32>
    %18 = tpu.matmul %16, %17, %cst_15 {dimension_numbers = #tpu.dot_dimension_numbers<[1], [0], [0], [1], [0, 0, 1, 1], [], []>} : vector<128x32xf32>, vector<32x64xf32>, vector<128x64xf32> -> vector<128x64xf32>
    %c0_16 = arith.constant 0 : index
    %c0_17 = arith.constant 0 : index
    %19 = vector.load %arg7[%c0_16, %c0_17] : memref<1x64xf32, #tpu.memory_space<vmem>>, vector<1x64xf32>
    %20 = vector.broadcast %19 : vector<1x64xf32> to vector<128x64xf32>
    %21 = arith.addf %18, %20 : vector<128x64xf32>
    %cst_18 = arith.constant 0.000000e+00 : f32
    %22 = vector.broadcast %cst_18 : f32 to vector<128x64xf32>
    %23 = arith.maximumf %21, %22 : vector<128x64xf32>
    %c0_19 = arith.constant 0 : index
    %c0_20 = arith.constant 0 : index
    %24 = vector.load %arg8[%c0_19, %c0_20] : memref<1x64xf32, #tpu.memory_space<vmem>>, vector<1x64xf32>
    %25 = vector.broadcast %24 : vector<1x64xf32> to vector<128x64xf32>
    %26 = arith.mulf %23, %25 : vector<128x64xf32>
    %cst_21 = arith.constant dense<0.000000e+00> : vector<128xf32>
    %27 = vector.multi_reduction <add>, %26, %cst_21 [1] : vector<128x64xf32> to vector<128xf32>
    %28 = vector.shape_cast %27 : vector<128xf32> to vector<128x1xf32>
    %c0_22 = arith.constant 0 : index
    %c0_23 = arith.constant 0 : index
    %29 = vector.load %arg9[%c0_22, %c0_23] : memref<1x1xf32, #tpu.memory_space<vmem>>, vector<1x1xf32>
    %30 = vector.broadcast %29 : vector<1x1xf32> to vector<128x1xf32>
    %31 = arith.addf %28, %30 : vector<128x1xf32>
    %32 = tpu.transpose %31, [1, 0] : vector<128x1xf32> -> vector<1x128xf32>
    %c0_24 = arith.constant 0 : index
    %c0_25 = arith.constant 0 : index
    %33 = vector.load %arg10[%c0_24, %c0_25] : memref<1x128xf32, #tpu.memory_space<vmem>>, vector<1x128xf32>
    tpu.vector_store %arg10[%c0_24, %c0_25], %32 {strides = array<i32>} : memref<1x128xf32, #tpu.memory_space<vmem>>, vector<1x128xf32>,
    return
  }
  func.func @transform_0(%arg0: i32) -> (i32, i32) {
    %c0_i32 = arith.constant 0 : i32
    %c0_i32_0 = arith.constant 0 : i32
    return %arg0, %c0_i32 : i32, i32
  }
  func.func @transform_1(%arg0: i32) -> (i32, i32) {
    %c0_i32 = arith.constant 0 : i32
    %c0_i32_0 = arith.constant 0 : i32
    %c0_i32_1 = arith.constant 0 : i32
    return %c0_i32, %c0_i32_0 : i32, i32
  }
  func.func @transform_2(%arg0: i32) -> (i32, i32) {
    %c0_i32 = arith.constant 0 : i32
    %c0_i32_0 = arith.constant 0 : i32
    %c0_i32_1 = arith.constant 0 : i32
    return %c0_i32, %c0_i32_0 : i32, i32
  }
  func.func @transform_3(%arg0: i32) -> (i32, i32) {
    %c0_i32 = arith.constant 0 : i32
    %c0_i32_0 = arith.constant 0 : i32
    %c0_i32_1 = arith.constant 0 : i32
    return %c0_i32, %c0_i32_0 : i32, i32
  }
  func.func @transform_4(%arg0: i32) -> (i32, i32) {
    %c0_i32 = arith.constant 0 : i32
    %c0_i32_0 = arith.constant 0 : i32
    %c0_i32_1 = arith.constant 0 : i32
    return %c0_i32, %c0_i32_0 : i32, i32
  }
  func.func @transform_5(%arg0: i32) -> (i32, i32) {
    %c0_i32 = arith.constant 0 : i32
    %c0_i32_0 = arith.constant 0 : i32
    %c0_i32_1 = arith.constant 0 : i32
    return %c0_i32, %c0_i32_0 : i32, i32
  }
  func.func @transform_6(%arg0: i32) -> (i32, i32) {
    %c0_i32 = arith.constant 0 : i32
    %c0_i32_0 = arith.constant 0 : i32
    %c0_i32_1 = arith.constant 0 : i32
    return %c0_i32, %c0_i32_0 : i32, i32
  }
  func.func @transform_7(%arg0: i32) -> (i32, i32) {
    %c0_i32 = arith.constant 0 : i32
    %c0_i32_0 = arith.constant 0 : i32
    %c0_i32_1 = arith.constant 0 : i32
    return %c0_i32, %c0_i32_0 : i32, i32
  }
  func.func @transform_8(%arg0: i32) -> (i32, i32) {
    %c0_i32 = arith.constant 0 : i32
    %c0_i32_0 = arith.constant 0 : i32
    %c0_i32_1 = arith.constant 0 : i32
    return %c0_i32, %c0_i32_0 : i32, i32
  }
  func.func @transform_9(%arg0: i32) -> (i32, i32) {
    %c0_i32 = arith.constant 0 : i32
    %c0_i32_0 = arith.constant 0 : i32
    return %c0_i32, %arg0 : i32, i32
  }
}

</mosaic_0001>

<bundles_post_ra>
// kernel: tpu_custom_call.1
= control target key start
LH: loop header
LB: loop body
LE: loop exit
PB: predicated region body
PF: predicated region fallthrough
CT: control target
= control target key end

     0   :  { %s5351_s0 = inlined_call_operand.vmem [shape: f32[1024,32], index: 0, kind: input, shape index: {}]   ;;  %s5352_s1 = inlined_call_operand.vmem [shape: f32[32,64], index: 1, kind: input, shape index: {}]   ;;  %s5353_s2 = inlined_call_operand.vmem [shape: f32[1,64], index: 2, kind: input, shape index: {}]   ;;  %s5354_s3 = inlined_call_operand.vmem [shape: f32[64,32], index: 3, kind: input, shape index: {}]   ;;  %s5355_s4 = inlined_call_operand.vmem [shape: f32[1,32], index: 4, kind: input, shape index: {}]   ;;  %s5356_s5 = inlined_call_operand.vmem [shape: f32[32,64], index: 5, kind: input, shape index: {}]   ;;  %s5357_s6 = inlined_call_operand.vmem [shape: f32[1,64], index: 6, kind: input, shape index: {}]   ;;  %s5358_s7 = inlined_call_operand.vmem [shape: f32[1,64], index: 7, kind: input, shape index: {}]   ;;  %s5359_s8 = inlined_call_operand.<no memory space> [shape: f32[1,1], index: 8, kind: input, shape index: {}]   ;;  %s5360_s9 = inlined_call_operand.hbm [shape: f32[1,128], index: 9, kind: output, shape index: {}]  }
   0x1   :  { %v14_v0 = vstv %s5359_s8 }
   0x2   :  { %15 = vst [vmem:[#allocation2] sm:$0x1] %v14_v0 }
   0x3   :  { %v166_v1 = vld [vmem:[%s5352_s1 + $0x18] sm:$0xff]  ;;  %v165_v2 = vld [vmem:[%s5352_s1 + $0x10] sm:$0xff]  ;;  %v164_v3 = vld [vmem:[%s5352_s1 + $0x8] sm:$0xff]  ;;  %vm171_vm0 = vcmask 261120  }
   0x4   :  { %568 = vmatpush.msra.mxu0 %v166_v1  ;;  %3684 = vmatpush.msra.mxu2 %v166_v1  ;;  %v163_v4 = vld [vmem:[%s5352_s1] sm:$0xff]  ;;  %v104_v6 = vld [vmem:[%s5351_s0 + $0x228] sm:$0xff] }
   0x5   :  { %3685 = vmatpush.msra.mxu3 %v166_v1  ;;  %v35_v5 = vld [vmem:[%s5351_s0] sm:$0xff] }
   0x6   :  { %569 = vmatpush.msra.mxu0 %v165_v2  ;;  %3686 = vmatpush.msra.mxu2 %v165_v2 }
   0x7   :  { %3687 = vmatpush.msra.mxu3 %v165_v2 }
   0x8   :  { %570 = vmatpush.msra.mxu0 %v164_v3  ;;  %3688 = vmatpush.msra.mxu2 %v164_v3 }
   0x9   :  { %3689 = vmatpush.msra.mxu3 %v164_v3 }
   0xa   :  { %16 = vsyncpa [#allocation4], 0  ;;  %571 = vmatpush.msra.mxu0 %v163_v4  ;;  %3690 = vmatpush.msra.mxu2 %v163_v4  ;;  %v36_v7 = vld [vmem:[%s5351_s0 + $0x8] sm:$0xff]  ;;  %v105_v8 = vld [vmem:[%s5351_s0 + $0x230] sm:$0xff]  ;;  %vm1097_vm1 = vcmask 523264   ;;  %vm3043_vm2 = vcmask 1041409  }
   0xb   :  { %3412 = vmatmul.msk.f32.vlgmr.msra.gmra.mxu0 %vm171_vm0, %v35_v5  ;;  %3481 = vmatmul.msk.f32.vlgmr.msra.gmra.mxu2 %vm171_vm0, %v104_v6  ;;  %v37_v9 = vld [vmem:[%s5351_s0 + $0x10] sm:$0xff]  ;;  %v106_v10 = vld [vmem:[%s5351_s0 + $0x238] sm:$0xff]  ;;  %v107_v12 = vld [vmem:[%s5351_s0 + $0x240] sm:$0xff]  ;;  %vm3045_vm3 = vcmask 1042434   ;;  %vm3047_vm4 = vcmask 1043459   ;;  %vm3049_vm5 = vcmask 1044484  }
   0xc   :  { %3691 = vmatpush.msra.mxu3 %v163_v4  ;;  %v38_v11 = vld [vmem:[%s5351_s0 + $0x18] sm:$0xff]  ;;  %v39_v13 = vld [vmem:[%s5351_s0 + $0x20] sm:$0xff]  ;;  %v108_v14 = vld [vmem:[%s5351_s0 + $0x248] sm:$0xff]  ;;  %vm3051_vm6 = vcmask 1045509   ;;  %vm3053_vm7 = vcmask 1046534   ;;  %vm3055_vm8 = vcmask 1047559  }
   0xd   :  { %v40_v15 = vld [vmem:[%s5351_s0 + $0x28] sm:$0xff]  ;;  %v109_v16 = vld [vmem:[%s5351_s0 + $0x250] sm:$0xff]  ;;  %v110_v18 = vld [vmem:[%s5351_s0 + $0x258] sm:$0xff]  ;;  %s3403_s13 = sshll.u32 %s5360_s9, 4  ;;  %s3404_s13 = int_to_ptr.hbm [resolvable:$true] %s3403_s13 }
   0xe   :  { %v41_v17 = vld [vmem:[%s5351_s0 + $0x30] sm:$0xff]  ;;  %v42_v19 = vld [vmem:[%s5351_s0 + $0x38] sm:$0xff]  ;;  %v111_v20 = vld [vmem:[%s5351_s0 + $0x260] sm:$0xff] }
   0xf   :  { %v43_v21 = vld [vmem:[%s5351_s0 + $0x40] sm:$0xff]  ;;  %v112_v22 = vld [vmem:[%s5351_s0 + $0x268] sm:$0xff]  ;;  %v113_v24 = vld [vmem:[%s5351_s0 + $0x270] sm:$0xff] }
  0x10   :  { %v44_v23 = vld [vmem:[%s5351_s0 + $0x48] sm:$0xff]  ;;  %v45_v25 = vld [vmem:[%s5351_s0 + $0x50] sm:$0xff]  ;;  %v114_v26 = vld [vmem:[%s5351_s0 + $0x278] sm:$0xff] }
  0x11   :  { %v1092_v27 = vld [vmem:[%s5354_s3 + $0x38] sm:$0xff]  ;;  %v1091_v28 = vld [vmem:[%s5354_s3 + $0x30] sm:$0xff]  ;;  %v1090_v29 = vld [vmem:[%s5354_s3 + $0x28] sm:$0xff] }
  0x12   :  { %1490 = vmatpush.msra.mxu1 %v1092_v27  ;;  %3692 = vmatpush.msrb.mxu3 %v1092_v27  ;;  %v46_v30 = vld [vmem:[%s5351_s0 + $0x58] sm:$0xff]  ;;  %v115_v31 = vld [vmem:[%s5351_s0 + $0x280] sm:$0xff]  ;;  %v1087_v34 = vld [vmem:[%s5354_s3 + $0x10] sm:$0xff] }
  0x13   :  { %3413 = vmatmul.msk.f32.gmra.mxu0 %vm171_vm0, %v36_v7  ;;  %3482 = vmatmul.msk.f32.gmra.mxu2 %vm171_vm0, %v105_v8  ;;  %v1089_v32 = vld [vmem:[%s5354_s3 + $0x20] sm:$0xff]  ;;  %v1088_v33 = vld [vmem:[%s5354_s3 + $0x18] sm:$0xff]  ;;  %v116_v36 = vld [vmem:[%s5351_s0 + $0x288] sm:$0xff] }
  0x14   :  { %1491 = vmatpush.msra.mxu1 %v1091_v28  ;;  %3693 = vmatpush.msrb.mxu3 %v1091_v28  ;;  %v47_v35 = vld [vmem:[%s5351_s0 + $0x60] sm:$0xff]  ;;  %v1086_v37 = vld [vmem:[%s5354_s3 + $0x8] sm:$0xff]  ;;  %v117_v40 = vld [vmem:[%s5351_s0 + $0x290] sm:$0xff] }
  0x15   :  { %v1085_v38 = vld [vmem:[%s5354_s3] sm:$0xff]  ;;  %v48_v39 = vld [vmem:[%s5351_s0 + $0x68] sm:$0xff]  ;;  %v49_v41 = vld [vmem:[%s5351_s0 + $0x70] sm:$0xff] }
  0x16   :  { %1492 = vmatpush.msra.mxu1 %v1090_v29  ;;  %3694 = vmatpush.msrb.mxu3 %v1090_v29  ;;  %v118_v42 = vld [vmem:[%s5351_s0 + $0x298] sm:$0xff]  ;;  %v119_v44 = vld [vmem:[%s5351_s0 + $0x2a0] sm:$0xff]  ;;  %v120_v48 = vld [vmem:[%s5351_s0 + $0x2a8] sm:$0xff] }
  0x17   :  { %v50_v43 = vld [vmem:[%s5351_s0 + $0x78] sm:$0xff]  ;;  %v3963_v45 = vld [vmem:[%s5353_s2] ss:$0 sm:$0xff]  ;;  %v52_v53 = vld [vmem:[%s5351_s0 + $0x88] sm:$0xff] }
  0x18   :  { %1493 = vmatpush.msra.mxu1 %v1089_v32  ;;  %3695 = vmatpush.msrb.mxu3 %v1089_v32  ;;  %v51_v47 = vld [vmem:[%s5351_s0 + $0x80] sm:$0xff]  ;;  %v121_v54 = vld [vmem:[%s5351_s0 + $0x2b0] sm:$0xff]  ;;  %v122_v60 = vld [vmem:[%s5351_s0 + $0x2b8] sm:$0xff] }
  0x19   :  { %v53_v59 = vld [vmem:[%s5351_s0 + $0x90] sm:$0xff]  ;;  %v54_v1 = vld [vmem:[%s5351_s0 + $0x98] sm:$0xff]  ;;  %v123_v2 = vld [vmem:[%s5351_s0 + $0x2c0] sm:$0xff] }
  0x1a   :  { %1494 = vmatpush.msra.mxu1 %v1088_v33  ;;  %3696 = vmatpush.msrb.mxu3 %v1088_v33  ;;  %v55_v7 = vld [vmem:[%s5351_s0 + $0xa0] sm:$0xff]  ;;  %v124_v8 = vld [vmem:[%s5351_s0 + $0x2c8] sm:$0xff] }
  0x1b   :  { %3414 = vmatmul.msk.f32.gmra.mxu0 %vm171_vm0, %v37_v9  ;;  %3483 = vmatmul.msk.f32.gmra.mxu2 %vm171_vm0, %v106_v10  ;;  %v128_v32 = vld [vmem:[%s5351_s0 + $0x2e8] sm:$0xff] }
  0x1c   :  { %1495 = vmatpush.msra.mxu1 %v1087_v34  ;;  %3697 = vmatpush.msrb.mxu3 %v1087_v34 }
  0x1e   :  { %1496 = vmatpush.msra.mxu1 %v1086_v37  ;;  %3698 = vmatpush.msrb.mxu3 %v1086_v37  ;;  %v60_v37 = vld [vmem:[%s5351_s0 + $0xc8] sm:$0xff] }
  0x20   :  { %1497 = vmatpush.msra.mxu1 %v1085_v38  ;;  %3699 = vmatpush.msrb.mxu3 %v1085_v38  ;;  %v129_v38 = vld [vmem:[%s5351_s0 + $0x2f0] sm:$0xff] }
  0x23   :  { %3415 = vmatmul.msk.f32.gmra.mxu0 %vm171_vm0, %v38_v11  ;;  %3484 = vmatmul.msk.f32.gmra.mxu2 %vm171_vm0, %v107_v12 }
  0x2b   :  { %3416 = vmatmul.msk.f32.gmra.mxu0 %vm171_vm0, %v39_v13  ;;  %3485 = vmatmul.msk.f32.gmra.mxu2 %vm171_vm0, %v108_v14  ;;  %v56_v13 = vld [vmem:[%s5351_s0 + $0xa8] sm:$0xff]  ;;  %v125_v14 = vld [vmem:[%s5351_s0 + $0x2d0] sm:$0xff] }
  0x33   :  { %3417 = vmatmul.msk.f32.gmra.mxu0 %vm171_vm0, %v40_v15  ;;  %3486 = vmatmul.msk.f32.gmra.mxu2 %vm171_vm0, %v109_v16 }
  0x3b   :  { %3418 = vmatmul.msk.f32.gmra.mxu0 %vm171_vm0, %v41_v17  ;;  %3487 = vmatmul.msk.f32.gmra.mxu2 %vm171_vm0, %v110_v18 }
  0x43   :  { %3419 = vmatmul.msk.f32.gmra.mxu0 %vm171_vm0, %v42_v19  ;;  %3488 = vmatmul.msk.f32.gmra.mxu2 %vm171_vm0, %v111_v20  ;;  %v57_v19 = vld [vmem:[%s5351_s0 + $0xb0] sm:$0xff]  ;;  %v126_v20 = vld [vmem:[%s5351_s0 + $0x2d8] sm:$0xff] }
  0x4b   :  { %3420 = vmatmul.msk.f32.gmra.mxu0 %vm171_vm0, %v43_v21  ;;  %3489 = vmatmul.msk.f32.gmra.mxu2 %vm171_vm0, %v112_v22 }
  0x53   :  { %3421 = vmatmul.msk.f32.gmra.mxu0 %vm171_vm0, %v44_v23  ;;  %3490 = vmatmul.msk.f32.gmra.mxu2 %vm171_vm0, %v113_v24 }
  0x5b   :  { %3422 = vmatmul.msk.f32.gmra.mxu0 %vm171_vm0, %v45_v25  ;;  %3491 = vmatmul.msk.f32.gmra.mxu2 %vm171_vm0, %v114_v26  ;;  %v58_v25 = vld [vmem:[%s5351_s0 + $0xb8] sm:$0xff]  ;;  %v127_v26 = vld [vmem:[%s5351_s0 + $0x2e0] sm:$0xff] }
  0x63   :  { %3423 = vmatmul.msk.f32.gmra.mxu0 %vm171_vm0, %v46_v30  ;;  %3492 = vmatmul.msk.f32.gmra.mxu2 %vm171_vm0, %v115_v31  ;;  %v59_v31 = vld [vmem:[%s5351_s0 + $0xc0] sm:$0xff] }
  0x6b   :  { %3424 = vmatmul.msk.f32.gmra.mxu0 %vm171_vm0, %v47_v35  ;;  %3493 = vmatmul.msk.f32.gmra.mxu2 %vm171_vm0, %v116_v36 }
  0x73   :  { %3425 = vmatmul.msk.f32.gmra.mxu0 %vm171_vm0, %v48_v39  ;;  %3494 = vmatmul.msk.f32.gmra.mxu2 %vm171_vm0, %v117_v40 }
  0x7b   :  { %3426 = vmatmul.msk.f32.gmra.mxu0 %vm171_vm0, %v49_v41  ;;  %3495 = vmatmul.msk.f32.gmra.mxu2 %vm171_vm0, %v118_v42 }
  0x83   :  { %3427 = vmatmul.msk.f32.gmra.mxu0 %vm171_vm0, %v50_v43  ;;  %3496 = vmatmul.msk.f32.gmra.mxu2 %vm171_vm0, %v119_v44  ;;  %v61_v43 = vld [vmem:[%s5351_s0 + $0xd0] sm:$0xff]  ;;  %v130_v44 = vld [vmem:[%s5351_s0 + $0x2f8] sm:$0xff] }
  0x88   :  { %v573_v46 = vpop.f32.mrf.mxu0 }
  0x89   :  { %v574_v49 = vadd.f32 %v3963_v45, %v573_v46 }
  0x8b   :  { %v957_v50 = vmax.f32 %v574_v49, 0.0  ;;  %3428 = vmatmul.msk.f32.gmra.mxu0 %vm171_vm0, %v51_v47  ;;  %3497 = vmatmul.msk.f32.gmra.mxu2 %vm171_vm0, %v120_v48 }
  0x8d   :  { %3540 = vmatmul.msk.f32.vlgmr.msra.gmra.mxu1 %vm1097_vm1, %v957_v50  ;;  %v62_v50 = vld [vmem:[%s5351_s0 + $0xd8] sm:$0xff] }
  0x8e   :  { %v3975_v51 = vpop.f32.mrf.mxu2 }
  0x90   :  { %v576_v52 = vpop.f32.mrf.mxu0 }
  0x91   :  { %v577_v55 = vadd.f32 %v3963_v45, %v576_v52  ;;  %v131_v52 = vld [vmem:[%s5351_s0 + $0x300] sm:$0xff] }
  0x93   :  { %v958_v56 = vmax.f32 %v577_v55, 0.0  ;;  %3429 = vmatmul.msk.f32.gmra.mxu0 %vm171_vm0, %v52_v53  ;;  %3498 = vmatmul.msk.f32.gmra.mxu2 %vm171_vm0, %v121_v54 }
  0x95   :  { %3541 = vmatmul.msk.f32.gmra.mxu1 %vm1097_vm1, %v958_v56 }
  0x96   :  { %v3987_v57 = vpop.f32.mrf.mxu2 }
  0x98   :  { %v579_v58 = vpop.f32.mrf.mxu0 }
  0x99   :  { %v580_v61 = vadd.f32 %v3963_v45, %v579_v58  ;;  %v63_v58 = vld [vmem:[%s5351_s0 + $0xe0] sm:$0xff] }
  0x9b   :  { %v959_v62 = vmax.f32 %v580_v61, 0.0  ;;  %3430 = vmatmul.msk.f32.gmra.mxu0 %vm171_vm0, %v53_v59  ;;  %3499 = vmatmul.msk.f32.gmra.mxu2 %vm171_vm0, %v122_v60  ;;  %v132_v59 = vld [vmem:[%s5351_s0 + $0x308] sm:$0xff] }
  0x9d   :  { %3542 = vmatmul.msk.f32.gmra.mxu1 %vm1097_vm1, %v959_v62 }
  0x9e   :  { %v3999_v63 = vpop.f32.mrf.mxu2 }
  0xa0   :  { %v582_v0 = vpop.f32.mrf.mxu0 }
  0xa1   :  { %v583_v3 = vadd.f32 %v3963_v45, %v582_v0 }
  0xa3   :  { %v960_v4 = vmax.f32 %v583_v3, 0.0  ;;  %3431 = vmatmul.msk.f32.gmra.mxu0 %vm171_vm0, %v54_v1  ;;  %3500 = vmatmul.msk.f32.gmra.mxu2 %vm171_vm0, %v123_v2  ;;  %v64_v1 = vld [vmem:[%s5351_s0 + $0xe8] sm:$0xff]  ;;  %v133_v2 = vld [vmem:[%s5351_s0 + $0x310] sm:$0xff] }
  0xa5   :  { %3543 = vmatmul.msk.f32.gmra.mxu1 %vm1097_vm1, %v960_v4 }
  0xa6   :  { %v4011_v5 = vpop.f32.mrf.mxu2 }
  0xa8   :  { %v585_v6 = vpop.f32.mrf.mxu0 }
  0xa9   :  { %v586_v9 = vadd.f32 %v3963_v45, %v585_v6 }
  0xab   :  { %v961_v10 = vmax.f32 %v586_v9, 0.0  ;;  %3432 = vmatmul.msk.f32.gmra.mxu0 %vm171_vm0, %v55_v7  ;;  %3501 = vmatmul.msk.f32.gmra.mxu2 %vm171_vm0, %v124_v8  ;;  %v65_v8 = vld [vmem:[%s5351_s0 + $0xf0] sm:$0xff]  ;;  %v134_v9 = vld [vmem:[%s5351_s0 + $0x318] sm:$0xff] }
  0xad   :  { %3544 = vmatmul.msk.f32.gmra.mxu1 %vm1097_vm1, %v961_v10 }
  0xae   :  { %v4023_v11 = vpop.f32.mrf.mxu2 }
  0xb0   :  { %v588_v12 = vpop.f32.mrf.mxu0 }
  0xb1   :  { %v589_v15 = vadd.f32 %v3963_v45, %v588_v12 }
  0xb3   :  { %v962_v16 = vmax.f32 %v589_v15, 0.0  ;;  %3433 = vmatmul.msk.f32.gmra.mxu0 %vm171_vm0, %v56_v13  ;;  %3502 = vmatmul.msk.f32.gmra.mxu2 %vm171_vm0, %v125_v14  ;;  %v66_v15 = vld [vmem:[%s5351_s0 + $0xf8] sm:$0xff] }
  0xb5   :  { %3545 = vmatmul.msk.f32.gmra.mxu1 %vm1097_vm1, %v962_v16  ;;  %v135_v16 = vld [vmem:[%s5351_s0 + $0x320] sm:$0xff] }
  0xb6   :  { %v4035_v17 = vpop.f32.mrf.mxu2 }
  0xb8   :  { %v591_v18 = vpop.f32.mrf.mxu0 }
  0xb9   :  { %v592_v21 = vadd.f32 %v3963_v45, %v591_v18 }
  0xbb   :  { %v963_v22 = vmax.f32 %v592_v21, 0.0  ;;  %3434 = vmatmul.msk.f32.gmra.mxu0 %vm171_vm0, %v57_v19  ;;  %3503 = vmatmul.msk.f32.gmra.mxu2 %vm171_vm0, %v126_v20 }
  0xbd   :  { %3546 = vmatmul.msk.f32.gmra.mxu1 %vm1097_vm1, %v963_v22  ;;  %v67_v22 = vld [vmem:[%s5351_s0 + $0x100] sm:$0xff] }
  0xbe   :  { %v4047_v23 = vpop.f32.mrf.mxu2 }
  0xc0   :  { %v594_v24 = vpop.f32.mrf.mxu0 }
  0xc1   :  { %v595_v27 = vadd.f32 %v3963_v45, %v594_v24  ;;  %v136_v24 = vld [vmem:[%s5351_s0 + $0x328] sm:$0xff] }
  0xc3   :  { %v964_v28 = vmax.f32 %v595_v27, 0.0  ;;  %3435 = vmatmul.msk.f32.gmra.mxu0 %vm171_vm0, %v58_v25  ;;  %3504 = vmatmul.msk.f32.gmra.mxu2 %vm171_vm0, %v127_v26 }
  0xc5   :  { %3547 = vmatmul.msk.f32.gmra.mxu1 %vm1097_vm1, %v964_v28 }
  0xc6   :  { %v4059_v29 = vpop.f32.mrf.mxu2 }
  0xc8   :  { %v597_v30 = vpop.f32.mrf.mxu0 }
  0xc9   :  { %v598_v33 = vadd.f32 %v3963_v45, %v597_v30 }
  0xcb   :  { %v965_v34 = vmax.f32 %v598_v33, 0.0  ;;  %3436 = vmatmul.msk.f32.gmra.mxu0 %vm171_vm0, %v59_v31  ;;  %3505 = vmatmul.msk.f32.gmra.mxu2 %vm171_vm0, %v128_v32  ;;  %v68_v31 = vld [vmem:[%s5351_s0 + $0x108] sm:$0xff]  ;;  %v137_v32 = vld [vmem:[%s5351_s0 + $0x330] sm:$0xff] }
  0xcd   :  { %3548 = vmatmul.msk.f32.gmra.mxu1 %vm1097_vm1, %v965_v34 }
  0xce   :  { %v4071_v35 = vpop.f32.mrf.mxu2 }
  0xd0   :  { %v600_v36 = vpop.f32.mrf.mxu0 }
  0xd1   :  { %v601_v39 = vadd.f32 %v3963_v45, %v600_v36 }
  0xd3   :  { %v966_v40 = vmax.f32 %v601_v39, 0.0  ;;  %3437 = vmatmul.msk.f32.gmra.mxu0 %vm171_vm0, %v60_v37  ;;  %3506 = vmatmul.msk.f32.gmra.mxu2 %vm171_vm0, %v129_v38  ;;  %v69_v39 = vld [vmem:[%s5351_s0 + $0x110] sm:$0xff] }
  0xd5   :  { %3549 = vmatmul.msk.f32.gmra.mxu1 %vm1097_vm1, %v966_v40  ;;  %v138_v40 = vld [vmem:[%s5351_s0 + $0x338] sm:$0xff] }
  0xd6   :  { %v4083_v41 = vpop.f32.mrf.mxu2 }
  0xd8   :  { %v603_v42 = vpop.f32.mrf.mxu0 }
  0xd9   :  { %v604_v46 = vadd.f32 %v3963_v45, %v603_v42 }
  0xdb   :  { %v967_v47 = vmax.f32 %v604_v46, 0.0  ;;  %3438 = vmatmul.msk.f32.gmra.mxu0 %vm171_vm0, %v61_v43  ;;  %3507 = vmatmul.msk.f32.gmra.mxu2 %vm171_vm0, %v130_v44 }
  0xdd   :  { %3550 = vmatmul.msk.f32.gmra.mxu1 %vm1097_vm1, %v967_v47 }
  0xde   :  { %v4095_v48 = vpop.f32.mrf.mxu2 }
  0xe0   :  { %v606_v49 = vpop.f32.mrf.mxu0 }
  0xe1   :  { %v607_v53 = vadd.f32 %v3963_v45, %v606_v49  ;;  %v70_v49 = vld [vmem:[%s5351_s0 + $0x118] sm:$0xff] }
  0xe3   :  { %v968_v54 = vmax.f32 %v607_v53, 0.0  ;;  %3439 = vmatmul.msk.f32.gmra.mxu0 %vm171_vm0, %v62_v50  ;;  %3508 = vmatmul.msk.f32.gmra.mxu2 %vm171_vm0, %v131_v52  ;;  %v139_v50 = vld [vmem:[%s5351_s0 + $0x340] sm:$0xff] }
  0xe5   :  { %3551 = vmatmul.msk.f32.gmra.mxu1 %vm1097_vm1, %v968_v54 }
  0xe6   :  { %v4107_v55 = vpop.f32.mrf.mxu2 }
  0xe8   :  { %v609_v56 = vpop.f32.mrf.mxu0 }
  0xe9   :  { %v610_v60 = vadd.f32 %v3963_v45, %v609_v56 }
  0xeb   :  { %v969_v61 = vmax.f32 %v610_v60, 0.0  ;;  %3440 = vmatmul.msk.f32.gmra.mxu0 %vm171_vm0, %v63_v58  ;;  %3509 = vmatmul.msk.f32.gmra.mxu2 %vm171_vm0, %v132_v59  ;;  %v71_v59 = vld [vmem:[%s5351_s0 + $0x120] sm:$0xff]  ;;  %v140_v60 = vld [vmem:[%s5351_s0 + $0x348] sm:$0xff] }
  0xed   :  { %3552 = vmatmul.msk.f32.gmra.mxu1 %vm1097_vm1, %v969_v61 }
  0xee   :  { %v4119_v62 = vpop.f32.mrf.mxu2 }
  0xf0   :  { %v612_v0 = vpop.f32.mrf.mxu0 }
  0xf1   :  { %v613_v3 = vadd.f32 %v3963_v45, %v612_v0 }
  0xf3   :  { %v970_v4 = vmax.f32 %v613_v3, 0.0  ;;  %3441 = vmatmul.msk.f32.gmra.mxu0 %vm171_vm0, %v64_v1  ;;  %3510 = vmatmul.msk.f32.gmra.mxu2 %vm171_vm0, %v133_v2 }
  0xf5   :  { %3553 = vmatmul.msk.f32.gmra.mxu1 %vm1097_vm1, %v970_v4  ;;  %v72_v4 = vld [vmem:[%s5351_s0 + $0x128] sm:$0xff] }
  0xf6   :  { %v4131_v6 = vpop.f32.mrf.mxu2 }
  0xf8   :  { %v615_v7 = vpop.f32.mrf.mxu0 }
  0xf9   :  { %v616_v10 = vadd.f32 %v3963_v45, %v615_v7  ;;  %v141_v7 = vld [vmem:[%s5351_s0 + $0x350] sm:$0xff] }
  0xfb   :  { %v971_v12 = vmax.f32 %v616_v10, 0.0  ;;  %3442 = vmatmul.msk.f32.gmra.mxu0 %vm171_vm0, %v65_v8  ;;  %3511 = vmatmul.msk.f32.gmra.mxu2 %vm171_vm0, %v134_v9 }
  0xfd   :  { %3554 = vmatmul.msk.f32.gmra.mxu1 %vm1097_vm1, %v971_v12 }
  0xfe   :  { %v4143_v13 = vpop.f32.mrf.mxu2 }
 0x100   :  { %v618_v14 = vpop.f32.mrf.mxu0 }
 0x101   :  { %v619_v18 = vadd.f32 %v3963_v45, %v618_v14 }
 0x103   :  { %v972_v19 = vmax.f32 %v619_v18, 0.0  ;;  %3443 = vmatmul.msk.f32.gmra.mxu0 %vm171_vm0, %v66_v15  ;;  %3512 = vmatmul.msk.f32.gmra.mxu2 %vm171_vm0, %v135_v16  ;;  %v73_v15 = vld [vmem:[%s5351_s0 + $0x130] sm:$0xff]  ;;  %v142_v16 = vld [vmem:[%s5351_s0 + $0x358] sm:$0xff] }
 0x105   :  { %3555 = vmatmul.msk.f32.gmra.mxu1 %vm1097_vm1, %v972_v19 }
 0x106   :  { %v4155_v20 = vpop.f32.mrf.mxu2 }
 0x108   :  { %v621_v21 = vpop.f32.mrf.mxu0 }
 0x109   :  { %v622_v25 = vadd.f32 %v3963_v45, %v621_v21 }
 0x10a   :  { %v4164_v26 = vpop.f32.mrf.mxu1 }
 0x10b   :  { %v973_v27 = vmax.f32 %v622_v25, 0.0  ;;  %3444 = vmatmul.msk.f32.gmra.mxu0 %vm171_vm0, %v67_v22  ;;  %3513 = vmatmul.msk.f32.gmra.mxu2 %vm171_vm0, %v136_v24  ;;  %v74_v25 = vld [vmem:[%s5351_s0 + $0x138] sm:$0xff] }
 0x10d   :  { %3556 = vmatmul.msk.f32.gmra.mxu1 %vm1097_vm1, %v973_v27  ;;  %v143_v27 = vld [vmem:[%s5351_s0 + $0x360] sm:$0xff] }
 0x10e   :  { %v4169_v28 = vpop.f32.mrf.mxu2 }
 0x110   :  { %v624_v30 = vpop.f32.mrf.mxu0 }
 0x111   :  { %v625_v33 = vadd.f32 %v3963_v45, %v624_v30 }
 0x112   :  { %v4178_v34 = vpop.f32.mrf.mxu1 }
 0x113   :  { %v974_v36 = vmax.f32 %v625_v33, 0.0  ;;  %3445 = vmatmul.msk.f32.gmra.mxu0 %vm171_vm0, %v68_v31  ;;  %3514 = vmatmul.msk.f32.gmra.mxu2 %vm171_vm0, %v137_v32 }
 0x115   :  { %3557 = vmatmul.msk.f32.gmra.mxu1 %vm1097_vm1, %v974_v36 }
 0x116   :  { %v4183_v37 = vpop.f32.mrf.mxu2 }
 0x117   :  { %5361 = vst [vmem:[#allocation6_spill] sm:$0xff] %v4183_v37 }
 0x118   :  { %v627_v38 = vpop.f32.mrf.mxu0 }
 0x119   :  { %v628_v42 = vadd.f32 %v3963_v45, %v627_v38  ;;  %v75_v38 = vld [vmem:[%s5351_s0 + $0x140] sm:$0xff] }
 0x11a   :  { %v4192_v43 = vpop.f32.mrf.mxu1 }
 0x11b   :  { %v975_v44 = vmax.f32 %v628_v42, 0.0  ;;  %3446 = vmatmul.msk.f32.gmra.mxu0 %vm171_vm0, %v69_v39  ;;  %3515 = vmatmul.msk.f32.gmra.mxu2 %vm171_vm0, %v138_v40  ;;  %v144_v39 = vld [vmem:[%s5351_s0 + $0x368] sm:$0xff] }
 0x11d   :  { %3558 = vmatmul.msk.f32.gmra.mxu1 %vm1097_vm1, %v975_v44 }
 0x11e   :  { %v4197_v46 = vpop.f32.mrf.mxu2 }
 0x11f   :  { %5362 = vst [vmem:[#allocation7_spill] sm:$0xff] %v4197_v46 }
 0x120   :  { %v630_v47 = vpop.f32.mrf.mxu0 }
 0x121   :  { %v631_v52 = vadd.f32 %v3963_v45, %v630_v47 }
 0x122   :  { %v4206_v53 = vpop.f32.mrf.mxu1 }
 0x123   :  { %v976_v54 = vmax.f32 %v631_v52, 0.0  ;;  %3447 = vmatmul.msk.f32.gmra.mxu0 %vm171_vm0, %v70_v49  ;;  %3516 = vmatmul.msk.f32.gmra.mxu2 %vm171_vm0, %v139_v50  ;;  %v76_v50 = vld [vmem:[%s5351_s0 + $0x148] sm:$0xff]  ;;  %v145_v52 = vld [vmem:[%s5351_s0 + $0x370] sm:$0xff] }
 0x125   :  { %3559 = vmatmul.msk.f32.gmra.mxu1 %vm1097_vm1, %v976_v54 }
 0x126   :  { %v4211_v56 = vpop.f32.mrf.mxu2 }
 0x127   :  { %5363 = vst [vmem:[#allocation8_spill] sm:$0xff] %v4211_v56 }
 0x128   :  { %v633_v58 = vpop.f32.mrf.mxu0 }
 0x129   :  { %v634_v61 = vadd.f32 %v3963_v45, %v633_v58 }
 0x12a   :  { %v4220_v0 = vpop.f32.mrf.mxu1 }
 0x12b   :  { %v977_v1 = vmax.f32 %v634_v61, 0.0  ;;  %3448 = vmatmul.msk.f32.gmra.mxu0 %vm171_vm0, %v71_v59  ;;  %3517 = vmatmul.msk.f32.gmra.mxu2 %vm171_vm0, %v140_v60 }
 0x12d   :  { %3560 = vmatmul.msk.f32.gmra.mxu1 %vm1097_vm1, %v977_v1  ;;  %v77_v1 = vld [vmem:[%s5351_s0 + $0x150] sm:$0xff] }
 0x12e   :  { %v4225_v2 = vpop.f32.mrf.mxu2 }
 0x12f   :  { %5364 = vst [vmem:[#allocation9_spill] sm:$0xff] %v4225_v2 }
 0x130   :  { %v636_v3 = vpop.f32.mrf.mxu0 }
 0x131   :  { %v637_v8 = vadd.f32 %v3963_v45, %v636_v3  ;;  %v146_v3 = vld [vmem:[%s5351_s0 + $0x378] sm:$0xff] }
 0x132   :  { %v4234_v9 = vpop.f32.mrf.mxu1 }
 0x133   :  { %v978_v10 = vmax.f32 %v637_v8, 0.0  ;;  %3449 = vmatmul.msk.f32.gmra.mxu0 %vm171_vm0, %v72_v4  ;;  %3518 = vmatmul.msk.f32.gmra.mxu2 %vm171_vm0, %v141_v7 }
 0x135   :  { %3561 = vmatmul.msk.f32.gmra.mxu1 %vm1097_vm1, %v978_v10 }
 0x136   :  { %v4239_v12 = vpop.f32.mrf.mxu2 }
 0x137   :  { %5365 = vst [vmem:[#allocation10_spill] sm:$0xff] %v4239_v12 }
 0x138   :  { %v639_v14 = vpop.f32.mrf.mxu0 }
 0x139   :  { %v640_v18 = vadd.f32 %v3963_v45, %v639_v14 }
 0x13a   :  { %v4248_v19 = vpop.f32.mrf.mxu1 }
 0x13b   :  { %v979_v21 = vmax.f32 %v640_v18, 0.0  ;;  %3450 = vmatmul.msk.f32.gmra.mxu0 %vm171_vm0, %v73_v15  ;;  %3519 = vmatmul.msk.f32.gmra.mxu2 %vm171_vm0, %v142_v16  ;;  %v78_v15 = vld [vmem:[%s5351_s0 + $0x158] sm:$0xff]  ;;  %v147_v16 = vld [vmem:[%s5351_s0 + $0x380] sm:$0xff] }
 0x13d   :  { %3562 = vmatmul.msk.f32.gmra.mxu1 %vm1097_vm1, %v979_v21 }
 0x13e   :  { %v4253_v22 = vpop.f32.mrf.mxu2 }
 0x13f   :  { %5366 = vst [vmem:[#allocation11_spill] sm:$0xff] %v4253_v22 }
 0x140   :  { %v642_v24 = vpop.f32.mrf.mxu0 }
 0x141   :  { %v643_v30 = vadd.f32 %v3963_v45, %v642_v24 }
 0x142   :  { %v4262_v31 = vpop.f32.mrf.mxu1 }
 0x143   :  { %v980_v32 = vmax.f32 %v643_v30, 0.0  ;;  %3451 = vmatmul.msk.f32.gmra.mxu0 %vm171_vm0, %v74_v25  ;;  %3520 = vmatmul.msk.f32.gmra.mxu2 %vm171_vm0, %v143_v27  ;;  %v79_v30 = vld [vmem:[%s5351_s0 + $0x160] sm:$0xff] }
 0x145   :  { %3563 = vmatmul.msk.f32.gmra.mxu1 %vm1097_vm1, %v980_v32  ;;  %v148_v32 = vld [vmem:[%s5351_s0 + $0x388] sm:$0xff] }
 0x146   :  { %v4267_v33 = vpop.f32.mrf.mxu2 }
 0x147   :  { %5367 = vst [vmem:[#allocation12_spill] sm:$0xff] %v4267_v33 }
 0x148   :  { %v645_v36 = vpop.f32.mrf.mxu0 }
 0x149   :  { %v646_v40 = vadd.f32 %v3963_v45, %v645_v36 }
 0x14a   :  { %v4276_v42 = vpop.f32.mrf.mxu1 }
 0x14b   :  { %v981_v44 = vmax.f32 %v646_v40, 0.0  ;;  %3452 = vmatmul.msk.f32.gmra.mxu0 %vm171_vm0, %v75_v38  ;;  %3521 = vmatmul.msk.f32.gmra.mxu2 %vm171_vm0, %v144_v39 }
 0x14d   :  { %3564 = vmatmul.msk.f32.gmra.mxu1 %vm1097_vm1, %v981_v44 }
 0x14e   :  { %v4281_v47 = vpop.f32.mrf.mxu2 }
 0x14f   :  { %5368 = vst [vmem:[#allocation13_spill] sm:$0xff] %v4281_v47 }
 0x150   :  { %v648_v49 = vpop.f32.mrf.mxu0 }
 0x151   :  { %v649_v54 = vadd.f32 %v3963_v45, %v648_v49  ;;  %v80_v49 = vld [vmem:[%s5351_s0 + $0x168] sm:$0xff] }
 0x152   :  { %v4290_v58 = vpop.f32.mrf.mxu1 }
 0x153   :  { %v982_v59 = vmax.f32 %v649_v54, 0.0  ;;  %3453 = vmatmul.msk.f32.gmra.mxu0 %vm171_vm0, %v76_v50  ;;  %3522 = vmatmul.msk.f32.gmra.mxu2 %vm171_vm0, %v145_v52  ;;  %v149_v50 = vld [vmem:[%s5351_s0 + $0x390] sm:$0xff]  ;;  %v4348_v52 = vld [vmem:[%s5355_s4] ss:$0 sm:$0xff] }
 0x155   :  { %3565 = vmatmul.msk.f32.gmra.mxu1 %vm1097_vm1, %v982_v59 }
 0x156   :  { %v4295_v60 = vpop.f32.mrf.mxu2 }
 0x157   :  { %5369 = vst [vmem:[#allocation14_spill] sm:$0xff] %v4295_v60 }
 0x158   :  { %v651_v61 = vpop.f32.mrf.mxu0 }
 0x159   :  { %v652_v4 = vadd.f32 %v3963_v45, %v651_v61 }
 0x15a   :  { %v4304_v7 = vpop.f32.mrf.mxu1 }
 0x15b   :  { %v983_v8 = vmax.f32 %v652_v4, 0.0  ;;  %3454 = vmatmul.msk.f32.gmra.mxu0 %vm171_vm0, %v77_v1  ;;  %3523 = vmatmul.msk.f32.gmra.mxu2 %vm171_vm0, %v146_v3  ;;  %v1500_v1 = vadd.f32 %v4348_v52, %v4164_v26  ;;  %v1503_v4 = vadd.f32 %v4348_v52, %v4178_v34 }
 0x15d   :  { %3566 = vmatmul.msk.f32.gmra.mxu1 %vm1097_vm1, %v983_v8 }
 0x15e   :  { %v4309_v10 = vpop.f32.mrf.mxu2 }
 0x15f   :  { %5370 = vst [vmem:[#allocation15_spill] sm:$0xff] %v4309_v10 }
 0x160   :  { %v654_v14 = vpop.f32.mrf.mxu0 }
 0x161   :  { %v655_v18 = vadd.f32 %v3963_v45, %v654_v14  ;;  %v81_v14 = vld [vmem:[%s5351_s0 + $0x170] sm:$0xff] }
 0x162   :  { %v4318_v21 = vpop.f32.mrf.mxu1 }
 0x163   :  { %v984_v24 = vmax.f32 %v655_v18, 0.0  ;;  %3455 = vmatmul.msk.f32.gmra.mxu0 %vm171_vm0, %v78_v15  ;;  %3524 = vmatmul.msk.f32.gmra.mxu2 %vm171_vm0, %v147_v16  ;;  %v150_v15 = vld [vmem:[%s5351_s0 + $0x398] sm:$0xff]  ;;  %v1883_v16 = vmax.f32 %v1500_v1, 0.0  ;;  %v1506_v1 = vadd.f32 %v4348_v52, %v4192_v43  ;;  %v1515_v43 = vadd.f32 %v4348_v52, %v4234_v9 }
 0x165   :  { %3567 = vmatmul.msk.f32.gmra.mxu1 %vm1097_vm1, %v984_v24  ;;  %v1884_v24 = vmax.f32 %v1503_v4, 0.0  ;;  %v2011_v34 = vsel %vm171_vm0, %v1883_v16, 0.0 }
 0x166   :  { %v4323_v25 = vpop.f32.mrf.mxu2 }
 0x167   :  { %5371 = vst [vmem:[#allocation16_spill] sm:$0xff] %v4323_v25 }
 0x168   :  { %v657_v27 = vpop.f32.mrf.mxu0 }
 0x169   :  { %v658_v36 = vadd.f32 %v3963_v45, %v657_v27 }
 0x16a   :  { %v4332_v38 = vpop.f32.mrf.mxu1 }
 0x16b   :  { %v985_v39 = vmax.f32 %v658_v36, 0.0  ;;  %3456 = vmatmul.msk.f32.gmra.mxu0 %vm171_vm0, %v79_v30  ;;  %3525 = vmatmul.msk.f32.gmra.mxu2 %vm171_vm0, %v148_v32  ;;  %v2018_v32 = vsel %vm171_vm0, %v1884_v24, 0.0  ;;  %v2012_v36 = vrot.slane %v2011_v34, 4  ;;  %v1885_v24 = vmax.f32 %v1506_v1, 0.0 }
 0x16d   :  { %3568 = vmatmul.msk.f32.gmra.mxu1 %vm1097_vm1, %v985_v39  ;;  %v2025_v9 = vsel %vm171_vm0, %v1885_v24, 0.0 }
 0x16e   :  { %v4337_v40 = vpop.f32.mrf.mxu2 }
 0x16f   :  { %5372 = vst [vmem:[#allocation17_spill] sm:$0xff] %v4337_v40 }
 0x170   :  { %v660_v44 = vpop.f32.mrf.mxu0 }
 0x171   :  { %v661_v54 = vadd.f32 %v3963_v45, %v660_v44  ;;  %v82_v44 = vld [vmem:[%s5351_s0 + $0x178] sm:$0xff] }
 0x172   :  { %v4351_v59 = vpop.f32.mrf.mxu1 }
 0x173   :  { %v986_v61 = vmax.f32 %v661_v54, 0.0  ;;  %3457 = vmatmul.msk.f32.gmra.mxu0 %vm171_vm0, %v80_v49  ;;  %3526 = vmatmul.msk.f32.gmra.mxu2 %vm171_vm0, %v149_v50  ;;  %v151_v49 = vld [vmem:[%s5351_s0 + $0x3a0] sm:$0xff]  ;;  %v2019_v54 = vrot.slane %v2018_v32, 4 }
 0x175   :  { %3569 = vmatmul.msk.f32.gmra.mxu1 %vm1097_vm1, %v986_v61  ;;  %v2020_v16 = vadd.f32 %v2019_v54, %v2018_v32  ;;  %v1518_v32 = vadd.f32 %v4348_v52, %v4248_v19  ;;  %v1888_v54 = vmax.f32 %v1515_v43, 0.0  ;;  %v2909_v43 = vld [vmem:[%s5356_s5 + $0x10] sm:$0xff] }
 0x176   :  { %v4358_v3 = vpop.f32.mrf.mxu2 }
 0x177   :  { %5373 = vst [vmem:[#allocation18_spill] sm:$0xff] %v4358_v3  ;;  %v1889_v24 = vmax.f32 %v1518_v32, 0.0 }
 0x178   :  { %v663_v8 = vpop.f32.mrf.mxu0 }
 0x179   :  { %v664_v18 = vadd.f32 %v3963_v45, %v663_v8  ;;  %v2013_v8 = vadd.f32 %v2012_v36, %v2011_v34  ;;  %v83_v34 = vld [vmem:[%s5351_s0 + $0x180] sm:$0xff] }
 0x17a   :  { %v4369_v26 = vpop.f32.mrf.mxu1 }
 0x17b   :  { %v987_v27 = vmax.f32 %v664_v18, 0.0  ;;  %3458 = vmatmul.msk.f32.gmra.mxu0 %vm171_vm0, %v81_v14  ;;  %3527 = vmatmul.msk.f32.gmra.mxu2 %vm171_vm0, %v150_v15  ;;  %v1509_v14 = vadd.f32 %v4348_v52, %v4206_v53  ;;  %v1512_v15 = vadd.f32 %v4348_v52, %v4220_v0  ;;  %v152_v53 = vld [vmem:[%s5351_s0 + $0x3a8] sm:$0xff] }
 0x17d   :  { %3570 = vmatmul.msk.f32.gmra.mxu1 %vm1097_vm1, %v987_v27  ;;  %v2014_v27 = vrot.slane %v2013_v8, 2  ;;  %v1887_v0 = vmax.f32 %v1512_v15, 0.0  ;;  %v1521_v15 = vadd.f32 %v4348_v52, %v4262_v31  ;;  %v1527_v31 = vadd.f32 %v4348_v52, %v4290_v58 }
 0x17e   :  { %v4375_v30 = vpop.f32.mrf.mxu2  ;;  %v1524_v58 = vadd.f32 %v4348_v52, %v4276_v42  ;;  %v1533_v42 = vadd.f32 %v4348_v52, %v4318_v21 }
 0x17f   :  { %5374 = vst [vmem:[#allocation19_spill] sm:$0xff] %v4375_v30 }
 0x180   :  { %v666_v39 = vpop.f32.mrf.mxu0  ;;  %v1891_v60 = vmax.f32 %v1524_v58, 0.0 }
 0x181   :  { %v667_v50 = vadd.f32 %v3963_v45, %v666_v39  ;;  %v1886_v39 = vmax.f32 %v1509_v14, 0.0  ;;  %v2015_v14 = vadd.f32 %v2014_v27, %v2013_v8  ;;  %v2046_v27 = vsel %vm171_vm0, %v1888_v54, 0.0 }
 0x182   :  { %v4385_v61 = vpop.f32.mrf.mxu1  ;;  %v2053_v54 = vsel %vm171_vm0, %v1889_v24, 0.0  ;;  %v2047_v3 = vrot.slane %v2046_v27, 4 }
 0x183   :  { %v988_v4 = vmax.f32 %v667_v50, 0.0  ;;  %3459 = vmatmul.msk.f32.gmra.mxu0 %vm171_vm0, %v82_v44  ;;  %3528 = vmatmul.msk.f32.gmra.mxu2 %vm171_vm0, %v151_v49  ;;  %v2021_v49 = vrot.slane %v2020_v16, 2  ;;  %v2032_v19 = vsel %vm171_vm0, %v1886_v39, 0.0  ;;  %v2908_v39 = vld [vmem:[%s5356_s5 + $0x8] sm:$0xff] }
 0x184   :  { %v2033_v8 = vrot.slane %v2032_v19, 4 }
 0x185   :  { %3571 = vmatmul.msk.f32.gmra.mxu1 %vm1097_vm1, %v988_v4  ;;  %v2910_v4 = vld [vmem:[%s5356_s5 + $0x18] sm:$0xff] }
 0x186   :  { %v4396_v18 = vpop.f32.mrf.mxu2  ;;  %3206 = vmatpush.msrb.mxu2 %v2910_v4  ;;  %v2034_v24 = vadd.f32 %v2033_v8, %v2032_v19  ;;  %v1539_v19 = vadd.f32 %v4348_v52, %v4351_v59 }
 0x187   :  { %5375 = vst [vmem:[#allocation20_spill] sm:$0xff] %v4396_v18 }
 0x188   :  { %v669_v44 = vpop.f32.mrf.mxu0  ;;  %3207 = vmatpush.msrb.mxu2 %v2909_v43  ;;  %v1530_v43 = vadd.f32 %v4348_v52, %v4304_v7 }
 0x189   :  { %v670_v36 = vadd.f32 %v3963_v45, %v669_v44  ;;  %v2039_v44 = vsel %vm171_vm0, %v1887_v0, 0.0  ;;  %v2016_v0 = vrot.slane %v2015_v14, 1 }
 0x18a   :  { %v4409_v50 = vpop.f32.mrf.mxu1  ;;  %v2040_v32 = vrot.slane %v2039_v44, 4  ;;  %3208 = vmatpush.msrb.mxu2 %v2908_v39  ;;  %v1892_v39 = vmax.f32 %v1527_v31, 0.0  ;;  %v2048_v31 = vadd.f32 %v2047_v3, %v2046_v27  ;;  %v85_v3 = vld [vmem:[%s5351_s0 + $0x190] sm:$0xff]  ;;  %v1896_v27 = vmax.f32 %v1539_v19, 0.0 }
 0x18b   :  { %v989_v1 = vmax.f32 %v670_v36, 0.0  ;;  %3460 = vmatmul.msk.f32.gmra.mxu0 %vm171_vm0, %v83_v34  ;;  %3529 = vmatmul.msk.f32.gmra.mxu2 %vm171_vm0, %v152_v53  ;;  %v2022_v34 = vadd.f32 %v2021_v49, %v2020_v16  ;;  %v2026_v53 = vrot.slane %v2025_v9, 4  ;;  %v84_v16 = vld [vmem:[%s5351_s0 + $0x188] sm:$0xff]  ;;  %v153_v49 = vld [vmem:[%s5351_s0 + $0x3b0] sm:$0xff] }
 0x18c   :  { %v2041_v7 = vadd.f32 %v2040_v32, %v2039_v44  ;;  %v1542_v44 = vadd.f32 %v4348_v52, %v4369_v26  ;;  %v154_v26 = vld [vmem:[%s5351_s0 + $0x3b8] sm:$0xff] }
 0x18d   :  { %3572 = vmatmul.msk.f32.gmra.mxu1 %vm1097_vm1, %v989_v1  ;;  %v1890_v1 = vmax.f32 %v1521_v15, 0.0  ;;  %v2023_v18 = vrot.slane %v2022_v34, 1  ;;  %v2027_v30 = vadd.f32 %v2026_v53, %v2025_v9  ;;  %v1536_v9 = vadd.f32 %v4348_v52, %v4332_v38 }
 0x18e   :  { %v4425_v36 = vpop.f32.mrf.mxu2  ;;  %v2017_v53 = vadd.f32 %v2016_v0, %v2015_v14  ;;  %v1894_v38 = vmax.f32 %v1533_v42, 0.0  ;;  %v1545_v14 = vadd.f32 %v4348_v52, %v4385_v61  ;;  %v2035_v0 = vrot.slane %v2034_v24, 2 }
 0x18f   :  { %5376 = vst [vmem:[#allocation21_spill] sm:$0xff] %v4425_v36  ;;  %v2907_v36 = vld [vmem:[%s5356_s5] sm:$0xff]  ;;  %v2060_v10 = vsel %vm171_vm0, %v1890_v1, 0.0  ;;  %v2024_v21 = vadd.f32 %v2023_v18, %v2022_v34  ;;  %v2028_v8 = vrot.slane %v2027_v30, 2  ;;  %v1895_v58 = vmax.f32 %v1536_v9, 0.0 }
 0x190   :  { %v672_v4 = vpop.f32.mrf.mxu0  ;;  %3209 = vmatpush.msrb.mxu2 %v2907_v36  ;;  %v1893_v36 = vmax.f32 %v1530_v43, 0.0  ;;  %v2061_v1 = vrot.slane %v2060_v10, 4  ;;  %v2067_v18 = vsel %vm171_vm0, %v1891_v60, 0.0  ;;  %v2088_v9 = vsel %vm171_vm0, %v1894_v38, 0.0 }
 0x191   :  { %v673_v15 = vadd.f32 %v3963_v45, %v672_v4  ;;  %v2054_v4 = vrot.slane %v2053_v54, 4  ;;  %v2029_v43 = vadd.f32 %v2028_v8, %v2027_v30  ;;  %v2036_v60 = vadd.f32 %v2035_v0, %v2034_v24 }
 0x192   :  { %v4448_v40 = vpop.f32.mrf.mxu1  ;;  %v2081_v34 = vsel %vm171_vm0, %v1893_v36, 0.0  ;;  %v2068_v36 = vrot.slane %v2067_v18, 4  ;;  %v2095_v30 = vsel %vm171_vm0, %v1895_v58, 0.0  ;;  %v3044_v8 = vsel %vm3043_vm2, %v2024_v21, %v2017_v53 }
 0x193   :  { %v990_v25 = vmax.f32 %v673_v15, 0.0  ;;  %3461 = vmatmul.msk.f32.gmra.mxu0 %vm171_vm0, %v84_v16  ;;  %3530 = vmatmul.msk.f32.gmra.mxu2 %vm171_vm0, %v153_v49  ;;  %v2074_v16 = vsel %vm171_vm0, %v1892_v39, 0.0  ;;  %v2042_v49 = vrot.slane %v2041_v7, 2  ;;  %v2055_v59 = vadd.f32 %v2054_v4, %v2053_v54 }
 0x194   :  { %v2049_v15 = vrot.slane %v2048_v31, 2  ;;  %v2075_v54 = vrot.slane %v2074_v16, 4  ;;  %v1897_v39 = vmax.f32 %v1542_v44, 0.0  ;;  %v2062_v4 = vadd.f32 %v2061_v1, %v2060_v10 }
 0x195   :  { %3573 = vmatmul.msk.f32.gmra.mxu1 %vm1097_vm1, %v990_v25  ;;  %v2082_v19 = vrot.slane %v2081_v34, 4  ;;  %v2043_v44 = vadd.f32 %v2042_v49, %v2041_v7  ;;  %v2102_v10 = vsel %vm171_vm0, %v1896_v27, 0.0  ;;  %v2030_v24 = vrot.slane %v2029_v43, 1 }
 0x196   :  { %v4462_v32 = vpop.f32.mrf.mxu2  ;;  %v2050_v1 = vadd.f32 %v2049_v15, %v2048_v31  ;;  %v2076_v38 = vadd.f32 %v2075_v54, %v2074_v16  ;;  %v2063_v0 = vrot.slane %v2062_v4, 2  ;;  %v2096_v58 = vrot.slane %v2095_v30, 4  ;;  %v155_v31 = vld [vmem:[%s5351_s0 + $0x3c0] sm:$0xff] }
 0x197   :  { %5377 = vst [vmem:[#allocation22_spill] sm:$0xff] %v4462_v32  ;;  %v1898_v32 = vmax.f32 %v1545_v14, 0.0  ;;  %v2089_v14 = vrot.slane %v2088_v9, 4  ;;  %v2037_v7 = vrot.slane %v2036_v60, 1  ;;  %v2069_v21 = vadd.f32 %v2068_v36, %v2067_v18 }
 0x198   :  { %v675_v25 = vpop.f32.mrf.mxu0  ;;  %v2083_v49 = vadd.f32 %v2082_v19, %v2081_v34  ;;  %v2103_v27 = vrot.slane %v2102_v10, 4  ;;  %v2044_v16 = vrot.slane %v2043_v44, 1  ;;  %v2031_v36 = vadd.f32 %v2030_v24, %v2029_v43 }
 0x199   :  { %v676_v61 = vadd.f32 %v3963_v45, %v675_v25  ;;  %v2056_v25 = vrot.slane %v2055_v59, 2  ;;  %v2116_v53 = vsel %vm171_vm0, %v1898_v32, 0.0  ;;  %v2051_v32 = vrot.slane %v2050_v1, 1 }
 0x19a   :  { %v4476_v42 = vpop.f32.mrf.mxu1  ;;  %v2090_v33 = vadd.f32 %v2089_v14, %v2088_v9  ;;  %v2117_v18 = vrot.slane %v2116_v53, 4  ;;  %v2064_v19 = vadd.f32 %v2063_v0, %v2062_v4  ;;  %v2097_v22 = vadd.f32 %v2096_v58, %v2095_v30 }
 0x19b   :  { %v991_v47 = vmax.f32 %v676_v61, 0.0  ;;  %3462 = vmatmul.msk.f32.gmra.mxu0 %vm171_vm0, %v85_v3  ;;  %3531 = vmatmul.msk.f32.gmra.mxu2 %vm171_vm0, %v154_v26  ;;  %v2109_v3 = vsel %vm171_vm0, %v1897_v39, 0.0  ;;  %v2057_v15 = vadd.f32 %v2056_v25, %v2055_v59  ;;  %v2038_v2 = vadd.f32 %v2037_v7, %v2036_v60 }
 0x19c   :  { %v2110_v54 = vrot.slane %v2109_v3, 4  ;;  %v2070_v56 = vrot.slane %v2069_v21, 2  ;;  %v2084_v46 = vrot.slane %v2083_v49, 2  ;;  %v2104_v59 = vadd.f32 %v2103_v27, %v2102_v10 }
 0x19d   :  { %3574 = vmatmul.msk.f32.gmra.mxu1 %vm1097_vm1, %v991_v47  ;;  %v86_v47 = vld [vmem:[%s5351_s0 + $0x198] sm:$0xff]  ;;  %v2045_v25 = vadd.f32 %v2044_v16, %v2043_v44  ;;  %v2058_v37 = vrot.slane %v2057_v15, 1  ;;  %v2052_v9 = vadd.f32 %v2051_v32, %v2050_v1  ;;  %v2091_v43 = vrot.slane %v2090_v33, 2  ;;  %v156_v1 = vld [vmem:[%s5351_s0 + $0x3c8] sm:$0xff] }
 0x19e   :  { %v4486_v26 = vpop.f32.mrf.mxu2  ;;  %v2118_v4 = vadd.f32 %v2117_v18, %v2116_v53  ;;  %v3046_v24 = vsel %vm3045_vm3, %v2031_v36, %v3044_v8  ;;  %v2065_v0 = vrot.slane %v2064_v19, 1  ;;  %v2098_v58 = vrot.slane %v2097_v22, 2 }
 0x19f   :  { %5378 = vst [vmem:[#allocation23_spill] sm:$0xff] %v4486_v26  ;;  %v2077_v26 = vrot.slane %v2076_v38, 2  ;;  %v3048_v60 = vsel %vm3047_vm4, %v2038_v2, %v3046_v24  ;;  %v2071_v10 = vadd.f32 %v2070_v56, %v2069_v21  ;;  %v2085_v44 = vadd.f32 %v2084_v46, %v2083_v49 }
 0x1a0   :  { %v678_v61 = vpop.f32.mrf.mxu0  ;;  %v2105_v7 = vrot.slane %v2104_v59, 2  ;;  %v3050_v53 = vsel %vm3049_vm5, %v2045_v25, %v3048_v60  ;;  %v2092_v2 = vadd.f32 %v2091_v43, %v2090_v33  ;;  %v2119_v56 = vrot.slane %v2118_v4, 2  ;;  %v4533_v60 = vld [vmem:[%s5353_s2] ss:$0 sm:$0xff] }
 0x1a1   :  { %v679_v39 = vadd.f32 %v3963_v45, %v678_v61  ;;  %v2111_v61 = vadd.f32 %v2110_v54, %v2109_v3  ;;  %v2078_v14 = vadd.f32 %v2077_v26, %v2076_v38  ;;  %v2059_v38 = vadd.f32 %v2058_v37, %v2057_v15 }
 0x1a2   :  { %v1556_v34 = vpop.f32.mrf.mxu1  ;;  %v3052_v21 = vsel %vm3051_vm6, %v2052_v9, %v3050_v53  ;;  %v2066_v49 = vadd.f32 %v2065_v0, %v2064_v19  ;;  %v2072_v37 = vrot.slane %v2071_v10, 1  ;;  %v2106_v15 = vadd.f32 %v2105_v7, %v2104_v59  ;;  %v88_v0 = vld [vmem:[%s5351_s0 + $0x1a8] sm:$0xff] }
 0x1a3   :  { %v992_v12 = vmax.f32 %v679_v39, 0.0  ;;  %3463 = vmatmul.msk.f32.gmra.mxu0 %vm171_vm0, %v86_v47  ;;  %3532 = vmatmul.msk.f32.gmra.mxu2 %vm171_vm0, %v155_v31  ;;  %v2112_v26 = vrot.slane %v2111_v61, 2  ;;  %v2079_v27 = vrot.slane %v2078_v14, 1  ;;  %v2099_v47 = vadd.f32 %v2098_v58, %v2097_v22 }
 0x1a4   :  { %v1551_v31 = vadd.f32 %v4348_v52, %v4448_v40  ;;  %v1554_v33 = vadd.f32 %v4348_v52, %v4476_v42  ;;  %v1548_v39 = vadd.f32 %v4348_v52, %v4409_v50  ;;  %v1557_v22 = vadd.f32 %v4348_v52, %v1556_v34 }
 0x1a5   :  { %3575 = vmatmul.msk.f32.gmra.mxu1 %vm1097_vm1, %v992_v12  ;;  %v87_v12 = vld [vmem:[%s5351_s0 + $0x1a0] sm:$0xff]  ;;  %v2113_v54 = vadd.f32 %v2112_v26, %v2111_v61  ;;  %v3054_v40 = vsel %vm3053_vm7, %v2059_v38, %v3052_v21  ;;  %v2080_v32 = vadd.f32 %v2079_v27, %v2078_v14  ;;  %v2093_v18 = vrot.slane %v2092_v2, 1 }
 0x1a6   :  { %v4499_v30 = vpop.f32.mrf.mxu2  ;;  %v2120_v36 = vadd.f32 %v2119_v56, %v2118_v4  ;;  %v2100_v59 = vrot.slane %v2099_v47, 1  ;;  %v1900_v9 = vmax.f32 %v1551_v31, 0.0  ;;  %v3056_v42 = vsel %vm3055_vm8, %v2066_v49, %v3054_v40 }
 0x1a7   :  { %v2073_v61 = vadd.f32 %v2072_v37, %v2071_v10  ;;  %v2107_v50 = vrot.slane %v2106_v15, 1  ;;  %v1901_v24 = vmax.f32 %v1554_v33, 0.0  ;;  %v2114_v14 = vrot.slane %v2113_v54, 1 }
 0x1a8   :  { %v681_v3 = vpop.f32.mrf.mxu0  ;;  %v1899_v58 = vmax.f32 %v1548_v39, 0.0  ;;  %v1902_v4 = vmax.f32 %v1557_v22, 0.0  ;;  %v2101_v38 = vadd.f32 %v2100_v59, %v2099_v47  ;;  %v2130_v26 = vsel %vm171_vm0, %v1900_v9, 0.0 }
 0x1a9   :  { %v682_v8 = vadd.f32 %v3963_v45, %v681_v3  ;;  %v2086_v45 = vrot.slane %v2085_v44, 1  ;;  %v3057_v10 = vsel %vm3043_vm2, %v2080_v32, %v2073_v61  ;;  %v2121_v3 = vrot.slane %v2120_v36, 1 }
 0x1aa   :  { %v1559_v46 = vpop.f32.mrf.mxu1  ;;  %v2108_v56 = vadd.f32 %v2107_v50, %v2106_v15  ;;  %v2115_v21 = vadd.f32 %v2114_v14, %v2113_v54  ;;  %v2144_v49 = vsel %vm171_vm0, %v1902_v4, 0.0  ;;  %v2131_v31 = vrot.slane %v2130_v26, 4 }
 0x1ab   :  { %v993_v16 = vmax.f32 %v682_v8, 0.0  ;;  %3464 = vmatmul.msk.f32.gmra.mxu0 %vm171_vm0, %v87_v12  ;;  %3533 = vmatmul.msk.f32.gmra.mxu2 %vm171_vm0, %v156_v1  ;;  %v1560_v19 = vadd.f32 %v4348_v52, %v1559_v46  ;;  %v2087_v43 = vadd.f32 %v2086_v45, %v2085_v44  ;;  %v2094_v44 = vadd.f32 %v2093_v18, %v2092_v2  ;;  %v89_v18 = vld [vmem:[%s5351_s0 + $0x1b0] sm:$0xff] }
 0x1ac   :  { %v2137_v46 = vsel %vm171_vm0, %v1901_v24, 0.0  ;;  %v2123_v2 = vsel %vm171_vm0, %v1899_v58, 0.0  ;;  %v2122_v45 = vadd.f32 %v2121_v3, %v2120_v36  ;;  %v2145_v40 = vrot.slane %v2144_v49, 4 }
 0x1ad   :  { %3576 = vmatmul.msk.f32.gmra.mxu1 %vm1097_vm1, %v993_v16  ;;  %v1903_v12 = vmax.f32 %v1560_v19, 0.0  ;;  %v3058_v27 = vsel %vm3045_vm3, %v2087_v43, %v3057_v10  ;;  %v2138_v39 = vrot.slane %v2137_v46, 4  ;;  %v2124_v22 = vrot.slane %v2123_v2, 4 }
 0x1ae   :  { %v4524_v25 = vpop.f32.mrf.mxu2  ;;  %v3059_v33 = vsel %vm3047_vm4, %v2094_v44, %v3058_v27  ;;  %v2146_v58 = vadd.f32 %v2145_v40, %v2144_v49  ;;  %v90_v27 = vld [vmem:[%s5351_s0 + $0x1b8] sm:$0xff] }
 0x1af   :  { %v2151_v16 = vsel %vm171_vm0, %v1903_v12, 0.0  ;;  %v3060_v54 = vsel %vm3049_vm5, %v2101_v38, %v3059_v33  ;;  %v2139_v24 = vadd.f32 %v2138_v39, %v2137_v46  ;;  %v2125_v14 = vadd.f32 %v2124_v22, %v2123_v2 }
 0x1b0   :  { %v684_v34 = vpop.f32.mrf.mxu0  ;;  %v3061_v19 = vsel %vm3051_vm6, %v2108_v56, %v3060_v54  ;;  %v2152_v59 = vrot.slane %v2151_v16, 4 }
 0x1b1   :  { %v685_v7 = vadd.f32 %v4533_v60, %v684_v34  ;;  %v3062_v36 = vsel %vm3053_vm7, %v2115_v21, %v3061_v19  ;;  %v2140_v12 = vrot.slane %v2139_v24, 2  ;;  %v2126_v38 = vrot.slane %v2125_v14, 2 }
 0x1b2   :  { %v1562_v1 = vpop.f32.mrf.mxu1  ;;  %v3063_v50 = vsel %vm3055_vm8, %v2122_v45, %v3062_v36  ;;  %v2153_v4 = vadd.f32 %v2152_v59, %v2151_v16 }
 0x1b3   :  { %v994_v8 = vmax.f32 %v685_v7, 0.0  ;;  %v1563_v53 = vadd.f32 %v4348_v52, %v1562_v1  ;;  %3465 = vmatmul.msk.f32.gmra.mxu0 %vm171_vm0, %v88_v0  ;;  %3668 = vmatmul.msk.f32.vlgmr.msrb.gmra.mxu2 %vm171_vm0, %v3056_v42  ;;  %v2132_v42 = vadd.f32 %v2131_v31, %v2130_v26  ;;  %v2147_v26 = vrot.slane %v2146_v58, 2 }
 0x1b4   :  { %v2154_v56 = vrot.slane %v2153_v4, 2  ;;  %v2141_v31 = vadd.f32 %v2140_v12, %v2139_v24  ;;  %v2127_v33 = vadd.f32 %v2126_v38, %v2125_v14 }
 0x1b5   :  { %v1904_v47 = vmax.f32 %v1563_v53, 0.0  ;;  %3577 = vmatmul.msk.f32.gmra.mxu1 %vm1097_vm1, %v994_v8  ;;  %v2133_v10 = vrot.slane %v2132_v42, 2  ;;  %v2148_v39 = vadd.f32 %v2147_v26, %v2146_v58 }
 0x1b6   :  { %v4547_v37 = vpop.f32.mrf.mxu2  ;;  %v2155_v54 = vadd.f32 %v2154_v56, %v2153_v4  ;;  %v2142_v19 = vrot.slane %v2141_v31, 1  ;;  %v2128_v36 = vrot.slane %v2127_v33, 1 }
 0x1b7   :  { %v2158_v15 = vsel %vm171_vm0, %v1904_v47, 0.0  ;;  %v2134_v21 = vadd.f32 %v2133_v10, %v2132_v42  ;;  %v2149_v42 = vrot.slane %v2148_v39, 1 }
 0x1b8   :  { %v687_v32 = vpop.f32.mrf.mxu0  ;;  %v2159_v61 = vrot.slane %v2158_v15, 4  ;;  %v2156_v24 = vrot.slane %v2155_v54, 1  ;;  %v2129_v12 = vadd.f32 %v2128_v36, %v2127_v33 }
 0x1b9   :  { %v688_v9 = vadd.f32 %v4533_v60, %v687_v32  ;;  %v2135_v40 = vrot.slane %v2134_v21, 1 }
 0x1ba   :  { %v1565_v43 = vpop.f32.mrf.mxu1  ;;  %v2160_v44 = vadd.f32 %v2159_v61, %v2158_v15  ;;  %v2157_v26 = vadd.f32 %v2156_v24, %v2155_v54 }
 0x1bb   :  { %v995_v34 = vmax.f32 %v688_v9, 0.0  ;;  %v1566_v0 = vadd.f32 %v4348_v52, %v1565_v43  ;;  %3466 = vmatmul.msk.f32.gmra.mxu0 %vm171_vm0, %v89_v18  ;;  %3669 = vmatmul.msk.f32.gmra.mxu2 %vm171_vm0, %v3063_v50  ;;  %v91_v50 = vld [vmem:[%s5351_s0 + $0x1c0] sm:$0xff] }
 0x1bc   :  { %v2161_v2 = vrot.slane %v2160_v44, 2 }
 0x1bd   :  { %v1905_v7 = vmax.f32 %v1566_v0, 0.0  ;;  %3578 = vmatmul.msk.f32.gmra.mxu1 %vm1097_vm1, %v995_v34  ;;  %v2136_v0 = vadd.f32 %v2135_v40, %v2134_v21 }
 0x1be   :  { %v4563_v3 = vpop.f32.mrf.mxu2  ;;  %v2162_v32 = vadd.f32 %v2161_v2, %v2160_v44 }
 0x1bf   :  { %v2165_v1 = vsel %vm171_vm0, %v1905_v7, 0.0  ;;  %v2143_v7 = vadd.f32 %v2142_v19, %v2141_v31 }
 0x1c0   :  { %v2166_v8 = vrot.slane %v2165_v1, 4  ;;  %v690_v53 = vpop.f32.mrf.mxu0  ;;  %v2163_v14 = vrot.slane %v2162_v32, 1 }
 0x1c1   :  { %v691_v46 = vadd.f32 %v4533_v60, %v690_v53 }
 0x1c2   :  { %v2167_v49 = vadd.f32 %v2166_v8, %v2165_v1  ;;  %v1568_v47 = vpop.f32.mrf.mxu1  ;;  %v2150_v1 = vadd.f32 %v2149_v42, %v2148_v39  ;;  %v3064_v8 = vsel %vm3043_vm2, %v2136_v0, %v2129_v12  ;;  %v2164_v53 = vadd.f32 %v2163_v14, %v2162_v32 }
 0x1c3   :  { %v996_v16 = vmax.f32 %v691_v46, 0.0  ;;  %v1569_v45 = vadd.f32 %v4348_v52, %v1568_v47  ;;  %3467 = vmatmul.msk.f32.gmra.mxu0 %vm171_vm0, %v90_v27  ;;  %v3065_v46 = vsel %vm3045_vm3, %v2143_v7, %v3064_v8  ;;  %v92_v47 = vld [vmem:[%s5351_s0 + $0x1c8] sm:$0xff]  ;;  %v95_v7 = vld [vmem:[%s5351_s0 + $0x1e0] sm:$0xff] }
 0x1c4   :  { %v2168_v15 = vrot.slane %v2167_v49, 2  ;;  %v3066_v31 = vsel %vm3047_vm4, %v2150_v1, %v3065_v46 }
 0x1c5   :  { %v1906_v22 = vmax.f32 %v1569_v45, 0.0  ;;  %3579 = vmatmul.msk.f32.gmra.mxu1 %vm1097_vm1, %v996_v16  ;;  %v3067_v45 = vsel %vm3049_vm5, %v2157_v26, %v3066_v31 }
 0x1c6   :  { %v4573_v18 = vpop.f32.mrf.mxu2  ;;  %v2169_v59 = vadd.f32 %v2168_v15, %v2167_v49  ;;  %v3068_v15 = vsel %vm3051_vm6, %v2164_v53, %v3067_v45 }
 0x1c7   :  { %v2172_v9 = vsel %vm171_vm0, %v1906_v22, 0.0 }
 0x1c8   :  { %v2173_v61 = vrot.slane %v2172_v9, 4  ;;  %v693_v43 = vpop.f32.mrf.mxu0  ;;  %v2170_v10 = vrot.slane %v2169_v59, 1 }
 0x1c9   :  { %v694_v34 = vadd.f32 %v4533_v60, %v693_v43 }
 0x1ca   :  { %v2174_v58 = vadd.f32 %v2173_v61, %v2172_v9  ;;  %v1571_v4 = vpop.f32.mrf.mxu1  ;;  %v2171_v21 = vadd.f32 %v2170_v10, %v2169_v59  ;;  %v93_v59 = vld [vmem:[%s5351_s0 + $0x1d0] sm:$0xff] }
 0x1cb   :  { %v997_v44 = vmax.f32 %v694_v34, 0.0  ;;  %3468 = vmatmul.msk.f32.gmra.mxu0 %vm171_vm0, %v91_v50  ;;  %v94_v50 = vld [vmem:[%s5351_s0 + $0x1d8] sm:$0xff]  ;;  %v1572_v26 = vadd.f32 %v4348_v52, %v1571_v4 }
 0x1cc   :  { %v2175_v38 = vrot.slane %v2174_v58, 2  ;;  %v3069_v22 = vsel %vm3053_vm7, %v2171_v21, %v3068_v15 }
 0x1cd   :  { %3580 = vmatmul.msk.f32.gmra.mxu1 %vm1097_vm1, %v997_v44 }
 0x1ce   :  { %v2176_v27 = vadd.f32 %v2175_v38, %v2174_v58  ;;  %v4583_v56 = vpop.f32.mrf.mxu2 }
 0x1d0   :  { %v2177_v2 = vrot.slane %v2176_v27, 1  ;;  %v696_v49 = vpop.f32.mrf.mxu0 }
 0x1d1   :  { %v697_v16 = vadd.f32 %v4533_v60, %v696_v49  ;;  %v96_v49 = vld [vmem:[%s5351_s0 + $0x1e8] sm:$0xff] }
 0x1d2   :  { %v1574_v33 = vpop.f32.mrf.mxu1  ;;  %v2178_v39 = vadd.f32 %v2177_v2, %v2176_v27 }
 0x1d3   :  { %v998_v54 = vmax.f32 %v697_v16, 0.0  ;;  %3469 = vmatmul.msk.f32.gmra.mxu0 %vm171_vm0, %v92_v47  ;;  %v1575_v12 = vadd.f32 %v4348_v52, %v1574_v33  ;;  %v1907_v47 = vmax.f32 %v1572_v26, 0.0 }
 0x1d4   :  { %v3070_v40 = vsel %vm3055_vm8, %v2178_v39, %v3069_v22 }
 0x1d5   :  { %3581 = vmatmul.msk.f32.gmra.mxu1 %vm1097_vm1, %v998_v54  ;;  %3670 = vmatmul.msk.f32.gmra.mxu2 %vm171_vm0, %v3070_v40  ;;  %v1908_v46 = vmax.f32 %v1575_v12, 0.0  ;;  %v2179_v22 = vsel %vm171_vm0, %v1907_v47, 0.0 }
 0x1d6   :  { %v4598_v32 = vpop.f32.mrf.mxu2 }
 0x1d7   :  { %v2186_v33 = vsel %vm171_vm0, %v1908_v46, 0.0 }
 0x1d8   :  { %v699_v19 = vpop.f32.mrf.mxu0 }
 0x1d9   :  { %v700_v9 = vadd.f32 %v4533_v60, %v699_v19 }
 0x1da   :  { %v1577_v36 = vpop.f32.mrf.mxu1 }
 0x1db   :  { %v999_v42 = vmax.f32 %v700_v9, 0.0  ;;  %3470 = vmatmul.msk.f32.gmra.mxu0 %vm171_vm0, %v93_v59  ;;  %v1578_v38 = vadd.f32 %v4348_v52, %v1577_v36  ;;  %v2187_v59 = vrot.slane %v2186_v33, 4 }
 0x1dd   :  { %3582 = vmatmul.msk.f32.gmra.mxu1 %vm1097_vm1, %v999_v42  ;;  %v1909_v21 = vmax.f32 %v1578_v38, 0.0 }
 0x1de   :  { %v4606_v61 = vpop.f32.mrf.mxu2 }
 0x1df   :  { %v2193_v54 = vsel %vm171_vm0, %v1909_v21, 0.0 }
 0x1e0   :  { %v702_v43 = vpop.f32.mrf.mxu0  ;;  %v2194_v42 = vrot.slane %v2193_v54, 4 }
 0x1e1   :  { %v703_v24 = vadd.f32 %v4533_v60, %v702_v43 }
 0x1e2   :  { %v1580_v34 = vpop.f32.mrf.mxu1 }
 0x1e3   :  { %v1000_v0 = vmax.f32 %v703_v24, 0.0  ;;  %3471 = vmatmul.msk.f32.gmra.mxu0 %vm171_vm0, %v94_v50  ;;  %v1581_v8 = vadd.f32 %v4348_v52, %v1580_v34  ;;  %v2180_v50 = vrot.slane %v2179_v22, 4 }
 0x1e5   :  { %3583 = vmatmul.msk.f32.gmra.mxu1 %vm1097_vm1, %v1000_v0  ;;  %v1910_v31 = vmax.f32 %v1581_v8, 0.0  ;;  %v97_v0 = vld [vmem:[%s5351_s0 + $0x1f0] sm:$0xff]  ;;  %v2181_v8 = vadd.f32 %v2180_v50, %v2179_v22 }
 0x1e6   :  { %v4614_v14 = vpop.f32.mrf.mxu2 }
 0x1e7   :  { %v2200_v40 = vsel %vm171_vm0, %v1910_v31, 0.0 }
 0x1e8   :  { %v705_v58 = vpop.f32.mrf.mxu0  ;;  %v2201_v24 = vrot.slane %v2200_v40, 4 }
 0x1e9   :  { %v706_v10 = vadd.f32 %v4533_v60, %v705_v58 }
 0x1ea   :  { %v1583_v44 = vpop.f32.mrf.mxu1 }
 0x1eb   :  { %v1001_v1 = vmax.f32 %v706_v10, 0.0  ;;  %3472 = vmatmul.msk.f32.gmra.mxu0 %vm171_vm0, %v95_v7  ;;  %v1584_v53 = vadd.f32 %v4348_v52, %v1583_v44  ;;  %v2188_v10 = vadd.f32 %v2187_v59, %v2186_v33 }
 0x1ed   :  { %3584 = vmatmul.msk.f32.gmra.mxu1 %vm1097_vm1, %v1001_v1  ;;  %v1911_v4 = vmax.f32 %v1584_v53, 0.0  ;;  %v2195_v1 = vadd.f32 %v2194_v42, %v2193_v54  ;;  %v2202_v53 = vadd.f32 %v2201_v24, %v2200_v40 }
 0x1ee   :  { %v4627_v27 = vpop.f32.mrf.mxu2 }
 0x1ef   :  { %v2207_v9 = vsel %vm171_vm0, %v1911_v4, 0.0  ;;  %v2196_v31 = vrot.slane %v2195_v1, 2  ;;  %v2182_v4 = vrot.slane %v2181_v8, 2 }
 0x1f0   :  { %v708_v2 = vpop.f32.mrf.mxu0  ;;  %v2208_v58 = vrot.slane %v2207_v9, 4 }
 0x1f1   :  { %v709_v16 = vadd.f32 %v4533_v60, %v708_v2  ;;  %v2189_v2 = vrot.slane %v2188_v10, 2  ;;  %v2197_v42 = vadd.f32 %v2196_v31, %v2195_v1  ;;  %v2183_v24 = vadd.f32 %v2182_v4, %v2181_v8  ;;  %v99_v8 = vld [vmem:[%s5351_s0 + $0x200] sm:$0xff] }
 0x1f2   :  { %v1586_v45 = vpop.f32.mrf.mxu1  ;;  %v2209_v46 = vadd.f32 %v2208_v58, %v2207_v9 }
 0x1f3   :  { %v1002_v39 = vmax.f32 %v709_v16, 0.0  ;;  %v1587_v15 = vadd.f32 %v4348_v52, %v1586_v45  ;;  %3473 = vmatmul.msk.f32.gmra.mxu0 %vm171_vm0, %v96_v49  ;;  %v2203_v45 = vrot.slane %v2202_v53, 2  ;;  %v2190_v40 = vadd.f32 %v2189_v2, %v2188_v10 }
 0x1f4   :  { %v2210_v54 = vrot.slane %v2209_v46, 2  ;;  %v2198_v10 = vrot.slane %v2197_v42, 1 }
 0x1f5   :  { %v1912_v19 = vmax.f32 %v1587_v15, 0.0  ;;  %3585 = vmatmul.msk.f32.gmra.mxu1 %vm1097_vm1, %v1002_v39  ;;  %v98_v15 = vld [vmem:[%s5351_s0 + $0x1f8] sm:$0xff] }
 0x1f6   :  { %v4641_v36 = vpop.f32.mrf.mxu2  ;;  %v2211_v58 = vadd.f32 %v2210_v54, %v2209_v46 }
 0x1f7   :  { %v2214_v43 = vsel %vm171_vm0, %v1912_v19, 0.0 }
 0x1f8   :  { %v711_v34 = vpop.f32.mrf.mxu0  ;;  %v2215_v44 = vrot.slane %v2214_v43, 4 }
 0x1f9   :  { %v712_v7 = vadd.f32 %v4533_v60, %v711_v34  ;;  %v2204_v34 = vadd.f32 %v2203_v45, %v2202_v53  ;;  %v2212_v53 = vrot.slane %v2211_v58, 1 }
 0x1fa   :  { %v1589_v12 = vpop.f32.mrf.mxu1  ;;  %v2216_v49 = vadd.f32 %v2215_v44, %v2214_v43  ;;  %v2191_v44 = vrot.slane %v2190_v40, 1 }
 0x1fb   :  { %v1003_v38 = vmax.f32 %v712_v7, 0.0  ;;  %v1590_v26 = vadd.f32 %v4348_v52, %v1589_v12  ;;  %3474 = vmatmul.msk.f32.gmra.mxu0 %vm171_vm0, %v97_v0  ;;  %v2205_v2 = vrot.slane %v2204_v34, 1 }
 0x1fc   :  { %v2217_v19 = vrot.slane %v2216_v49, 2 }
 0x1fd   :  { %v1913_v21 = vmax.f32 %v1590_v26, 0.0  ;;  %3586 = vmatmul.msk.f32.gmra.mxu1 %vm1097_vm1, %v1003_v38 }
 0x1fe   :  { %v4651_v47 = vpop.f32.mrf.mxu2  ;;  %v2218_v12 = vadd.f32 %v2217_v19, %v2216_v49 }
 0x1ff   :  { %v2221_v16 = vsel %vm171_vm0, %v1913_v21, 0.0  ;;  %v2184_v21 = vrot.slane %v2183_v24, 1 }
 0x200   :  { %v2222_v33 = vrot.slane %v2221_v16, 4  ;;  %v714_v39 = vpop.f32.mrf.mxu0  ;;  %v2219_v4 = vrot.slane %v2218_v12, 1 }
 0x201   :  { %v715_v22 = vadd.f32 %v4533_v60, %v714_v39  ;;  %v2185_v54 = vadd.f32 %v2184_v21, %v2183_v24  ;;  %v100_v24 = vld [vmem:[%s5351_s0 + $0x208] sm:$0xff] }
 0x202   :  { %v2223_v59 = vadd.f32 %v2222_v33, %v2221_v16  ;;  %v1592_v9 = vpop.f32.mrf.mxu1  ;;  %v2192_v16 = vadd.f32 %v2191_v44, %v2190_v40  ;;  %v2199_v33 = vadd.f32 %v2198_v10, %v2197_v42 }
 0x203   :  { %v1004_v43 = vmax.f32 %v715_v22, 0.0  ;;  %v1593_v50 = vadd.f32 %v4348_v52, %v1592_v9  ;;  %3475 = vmatmul.msk.f32.gmra.mxu0 %vm171_vm0, %v98_v15  ;;  %v2206_v22 = vadd.f32 %v2205_v2, %v2204_v34 }
 0x204   :  { %v2224_v0 = vrot.slane %v2223_v59, 2  ;;  %v3071_v9 = vsel %vm3043_vm2, %v2192_v16, %v2185_v54 }
 0x205   :  { %v1914_v7 = vmax.f32 %v1593_v50, 0.0  ;;  %3587 = vmatmul.msk.f32.gmra.mxu1 %vm1097_vm1, %v1004_v43  ;;  %v2220_v43 = vadd.f32 %v2219_v4, %v2218_v12  ;;  %v3072_v40 = vsel %vm3045_vm3, %v2199_v33, %v3071_v9  ;;  %v103_v9 = vld [vmem:[%s5351_s0 + $0x220] sm:$0xff] }
 0x206   :  { %v4661_v38 = vpop.f32.mrf.mxu2  ;;  %v2225_v26 = vadd.f32 %v2224_v0, %v2223_v59  ;;  %v2213_v59 = vadd.f32 %v2212_v53, %v2211_v58  ;;  %v3073_v34 = vsel %vm3047_vm4, %v2206_v22, %v3072_v40  ;;  %v101_v53 = vld [vmem:[%s5351_s0 + $0x210] sm:$0xff]  ;;  %v4711_v40 = vld [vmem:[%s5355_s4] ss:$0 sm:$0xff] }
 0x207   :  { %5379 = vst [vmem:[#allocation24_spill] sm:$0xff] %v4661_v38  ;;  %v2228_v1 = vsel %vm171_vm0, %v1914_v7, 0.0 }
 0x208   :  { %v2229_v52 = vrot.slane %v2228_v1, 4  ;;  %v717_v31 = vpop.f32.mrf.mxu0  ;;  %v2226_v39 = vrot.slane %v2225_v26, 1  ;;  %v3074_v10 = vsel %vm3049_vm5, %v2213_v59, %v3073_v34 }
 0x209   :  { %v718_v46 = vadd.f32 %v4533_v60, %v717_v31  ;;  %v3075_v21 = vsel %vm3051_vm6, %v2220_v43, %v3074_v10 }
 0x20a   :  { %v2230_v49 = vadd.f32 %v2229_v52, %v2228_v1  ;;  %v1595_v45 = vpop.f32.mrf.mxu1  ;;  %v2227_v7 = vadd.f32 %v2226_v39, %v2225_v26  ;;  %v102_v39 = vld [vmem:[%s5351_s0 + $0x218] sm:$0xff] }
 0x20b   :  { %v1005_v15 = vmax.f32 %v718_v46, 0.0  ;;  %3476 = vmatmul.msk.f32.gmra.mxu0 %vm171_vm0, %v99_v8 }
 0x20c   :  { %v2231_v19 = vrot.slane %v2230_v49, 2  ;;  %v3076_v26 = vsel %vm3053_vm7, %v2227_v7, %v3075_v21 }
 0x20d   :  { %3588 = vmatmul.msk.f32.gmra.mxu1 %vm1097_vm1, %v1005_v15 }
 0x20e   :  { %v2232_v50 = vadd.f32 %v2231_v19, %v2230_v49  ;;  %v4671_v0 = vpop.f32.mrf.mxu2 }
 0x20f   :  { %5380 = vst [vmem:[#allocation25_spill] sm:$0xff] %v4671_v0 }
 0x210   :  { %v2233_v42 = vrot.slane %v2232_v50, 1  ;;  %v720_v44 = vpop.f32.mrf.mxu0 }
 0x211   :  { %v721_v58 = vadd.f32 %v4533_v60, %v720_v44 }
 0x212   :  { %v1598_v1 = vpop.f32.mrf.mxu1  ;;  %v2234_v12 = vadd.f32 %v2233_v42, %v2232_v50 }
 0x213   :  { %v1006_v2 = vmax.f32 %v721_v58, 0.0  ;;  %3477 = vmatmul.msk.f32.gmra.mxu0 %vm171_vm0, %v100_v24  ;;  %v1599_v7 = vadd.f32 %v4711_v40, %v1598_v1  ;;  %v1596_v24 = vadd.f32 %v4711_v40, %v1595_v45 }
 0x214   :  { %v3077_v52 = vsel %vm3055_vm8, %v2234_v12, %v3076_v26 }
 0x215   :  { %3589 = vmatmul.msk.f32.gmra.mxu1 %vm1097_vm1, %v1006_v2  ;;  %3671 = vmatmul.msk.f32.gmra.mxu2 %vm171_vm0, %v3077_v52  ;;  %v1916_v12 = vmax.f32 %v1599_v7, 0.0  ;;  %v1915_v26 = vmax.f32 %v1596_v24, 0.0 }
 0x216   :  { %v4686_v31 = vpop.f32.mrf.mxu2 }
 0x217   :  { %5381 = vst [vmem:[#allocation26_spill] sm:$0xff] %v4686_v31 }
 0x218   :  { %v723_v8 = vpop.f32.mrf.mxu0 }
 0x219   :  { %v724_v46 = vadd.f32 %v4533_v60, %v723_v8 }
 0x21a   :  { %v1601_v16 = vpop.f32.mrf.mxu1 }
 0x21b   :  { %v1007_v4 = vmax.f32 %v724_v46, 0.0  ;;  %3478 = vmatmul.msk.f32.gmra.mxu0 %vm171_vm0, %v101_v53  ;;  %v1602_v44 = vadd.f32 %v4711_v40, %v1601_v16  ;;  %v2242_v46 = vsel %vm171_vm0, %v1916_v12, 0.0 }
 0x21d   :  { %3590 = vmatmul.msk.f32.gmra.mxu1 %vm1097_vm1, %v1007_v4  ;;  %v1917_v21 = vmax.f32 %v1602_v44, 0.0  ;;  %v4728_v4 = vld [vmem:[%s5357_s6] ss:$0 sm:$0xff] }
 0x21e   :  { %v4694_v49 = vpop.f32.mrf.mxu2 }
 0x21f   :  { %5382 = vst [vmem:[#allocation27_spill] sm:$0xff] %v4694_v49 }
 0x220   :  { %v726_v33 = vpop.f32.mrf.mxu0 }
 0x221   :  { %v727_v15 = vadd.f32 %v4533_v60, %v726_v33  ;;  %v2249_v33 = vsel %vm171_vm0, %v1917_v21, 0.0 }
 0x222   :  { %v1604_v54 = vpop.f32.mrf.mxu1 }
 0x223   :  { %v1008_v22 = vmax.f32 %v727_v15, 0.0  ;;  %3479 = vmatmul.msk.f32.gmra.mxu0 %vm171_vm0, %v102_v39  ;;  %v1605_v34 = vadd.f32 %v4711_v40, %v1604_v54  ;;  %v2235_v39 = vsel %vm171_vm0, %v1915_v26, 0.0 }
 0x224   :  { %v2236_v44 = vrot.slane %v2235_v39, 4 }
 0x225   :  { %3591 = vmatmul.msk.f32.gmra.mxu1 %vm1097_vm1, %v1008_v22  ;;  %v1918_v1 = vmax.f32 %v1605_v34, 0.0  ;;  %v2243_v22 = vrot.slane %v2242_v46, 4 }
 0x226   :  { %v4702_v19 = vpop.f32.mrf.mxu2 }
 0x227   :  { %5383 = vst [vmem:[#allocation28_spill] sm:$0xff] %v4702_v19  ;;  %v2256_v15 = vsel %vm171_vm0, %v1918_v1, 0.0 }
 0x228   :  { %v729_v59 = vpop.f32.mrf.mxu0  ;;  %v2257_v24 = vrot.slane %v2256_v15, 4 }
 0x229   :  { %v730_v43 = vadd.f32 %v4533_v60, %v729_v59 }
 0x22a   :  { %v1607_v50 = vpop.f32.mrf.mxu1 }
 0x22b   :  { %v1009_v42 = vmax.f32 %v730_v43, 0.0  ;;  %3480 = vmatmul.msk.f32.gmra.mxu0 %vm171_vm0, %v103_v9  ;;  %v1608_v58 = vadd.f32 %v4711_v40, %v1607_v50  ;;  %v2250_v43 = vrot.slane %v2249_v33, 4 }
 0x22d   :  { %3592 = vmatmul.msk.f32.gmra.mxu1 %vm1097_vm1, %v1009_v42  ;;  %v1919_v8 = vmax.f32 %v1608_v58, 0.0  ;;  %v4740_v42 = vld [vmem:[%s5358_s7] ss:$0 sm:$0xff] }
 0x22e   :  { %v4720_v10 = vpop.f32.mrf.mxu2 }
 0x22f   :  { %5384 = vst [vmem:[#allocation29_spill] sm:$0xff] %v4720_v10  ;;  %v2263_v59 = vsel %vm171_vm0, %v1919_v8, 0.0 }
 0x230   :  { %v732_v2 = vpop.f32.mrf.mxu0  ;;  %v2264_v58 = vrot.slane %v2263_v59, 4 }
 0x231   :  { %v733_v52 = vadd.f32 %v4533_v60, %v732_v2  ;;  %v2244_v2 = vadd.f32 %v2243_v22, %v2242_v46 }
 0x232   :  { %v1610_v53 = vpop.f32.mrf.mxu1 }
 0x233   :  { %v1010_v45 = vmax.f32 %v733_v52, 0.0  ;;  %v1611_v16 = vadd.f32 %v4711_v40, %v1610_v53  ;;  %v2251_v52 = vadd.f32 %v2250_v43, %v2249_v33 }
 0x235   :  { %v1920_v54 = vmax.f32 %v1611_v16, 0.0  ;;  %3593 = vmatmul.msk.f32.gmra.mxu1 %vm1097_vm1, %v1010_v45  ;;  %v2237_v16 = vadd.f32 %v2236_v44, %v2235_v39  ;;  %v2252_v46 = vrot.slane %v2251_v52, 2 }
 0x236   :  { %v3211_v9 = vpop.f32.mrf.mxu2 }
 0x237   :  { %v2270_v50 = vsel %vm171_vm0, %v1920_v54, 0.0  ;;  %v3212_v7 = vadd.f32 %v4728_v4, %v3211_v9  ;;  %v2258_v54 = vadd.f32 %v2257_v24, %v2256_v15  ;;  %v2265_v9 = vadd.f32 %v2264_v58, %v2263_v59 }
 0x238   :  { %v735_v34 = vpop.f32.mrf.mxu0  ;;  %v2271_v26 = vrot.slane %v2270_v50, 4  ;;  %v2238_v43 = vrot.slane %v2237_v16, 2 }
 0x239   :  { %v3259_v12 = vmax.f32 %v3212_v7, 0.0  ;;  %v736_v21 = vadd.f32 %v4533_v60, %v735_v34  ;;  %v2245_v7 = vrot.slane %v2244_v2, 2  ;;  %v2266_v15 = vrot.slane %v2265_v9, 2 }
 0x23a   :  { %v1613_v1 = vpop.f32.mrf.mxu1  ;;  %v2272_v49 = vadd.f32 %v2271_v26, %v2270_v50  ;;  %v2253_v50 = vadd.f32 %v2252_v46, %v2251_v52 }
 0x23b   :  { %v1011_v8 = vmax.f32 %v736_v21, 0.0  ;;  %v1614_v53 = vadd.f32 %v4711_v40, %v1613_v1  ;;  %v3279_v45 = vmul.f32 %v4740_v42, %v3259_v12  ;;  %v2259_v21 = vrot.slane %v2258_v54, 2 }
 0x23c   :  { %v2246_v24 = vadd.f32 %v2245_v7, %v2244_v2  ;;  %v2273_v58 = vrot.slane %v2272_v49, 2  ;;  %v2267_v31 = vadd.f32 %v2266_v15, %v2265_v9  ;;  %v2254_v7 = vrot.slane %v2253_v50, 1 }
 0x23d   :  { %v1921_v10 = vmax.f32 %v1614_v53, 0.0  ;;  %3594 = vmatmul.msk.f32.gmra.mxu1 %vm1097_vm1, %v1011_v8  ;;  %v3295_v19 = vsel %vm1097_vm1, %v3279_v45, 0.0  ;;  %v2239_v53 = vadd.f32 %v2238_v43, %v2237_v16  ;;  %v2260_v45 = vadd.f32 %v2259_v21, %v2258_v54 }
 0x23e   :  { %v3214_v34 = vpop.f32.mrf.mxu2  ;;  %3296 = vadd.xlane.f32.xlu0 %v3295_v19  ;;  %v2274_v2 = vadd.f32 %v2273_v58, %v2272_v49  ;;  %v2268_v16 = vrot.slane %v2267_v31, 1 }
 0x23f   :  { %v2277_v33 = vsel %vm171_vm0, %v1921_v10, 0.0  ;;  %v3215_v22 = vadd.f32 %v4728_v4, %v3214_v34  ;;  %v2240_v46 = vrot.slane %v2239_v53, 1 }
 0x240   :  { %v2278_v12 = vrot.slane %v2277_v33, 4  ;;  %v738_v39 = vpop.f32.mrf.mxu0  ;;  %v2275_v43 = vrot.slane %v2274_v2, 1 }
 0x241   :  { %v3260_v59 = vmax.f32 %v3215_v22, 0.0  ;;  %v739_v44 = vadd.f32 %v4533_v60, %v738_v39  ;;  %v2247_v39 = vrot.slane %v2246_v24, 1  ;;  %v2241_v49 = vadd.f32 %v2240_v46, %v2239_v53 }
 0x242   :  { %v2279_v1 = vadd.f32 %v2278_v12, %v2277_v33  ;;  %v1616_v8 = vpop.f32.mrf.mxu1  ;;  %v2261_v12 = vrot.slane %v2260_v45, 1 }
 0x243   :  { %v1012_v26 = vmax.f32 %v739_v44, 0.0  ;;  %v1617_v19 = vadd.f32 %v4711_v40, %v1616_v8  ;;  %v3280_v10 = vmul.f32 %v4740_v42, %v3260_v59  ;;  %v2248_v9 = vadd.f32 %v2247_v39, %v2246_v24 }
 0x244   :  { %v2280_v34 = vrot.slane %v2279_v1, 2  ;;  %v2255_v8 = vadd.f32 %v2254_v7, %v2253_v50  ;;  %v2262_v58 = vadd.f32 %v2261_v12, %v2260_v45 }
 0x245   :  { %v1922_v0 = vmax.f32 %v1617_v19, 0.0  ;;  %3595 = vmatmul.msk.f32.gmra.mxu1 %vm1097_vm1, %v1012_v26  ;;  %v3298_v22 = vsel %vm1097_vm1, %v3280_v10, 0.0 }
 0x246   :  { %3299 = vadd.xlane.f32.xlu0 %v3298_v22  ;;  %v2281_v33 = vadd.f32 %v2280_v34, %v2279_v1  ;;  %v2269_v1 = vadd.f32 %v2268_v16, %v2267_v31  ;;  %v2276_v34 = vadd.f32 %v2275_v43, %v2274_v2 }
 0x247   :  { %v2284_v52 = vsel %vm171_vm0, %v1922_v0, 0.0  ;;  %v3078_v0 = vsel %vm3043_vm2, %v2248_v9, %v2241_v49 }
 0x248   :  { %v2285_v44 = vrot.slane %v2284_v52, 4  ;;  %v741_v59 = vpop.f32.mrf.mxu0  ;;  %v2282_v26 = vrot.slane %v2281_v33, 1  ;;  %v3079_v38 = vsel %vm3045_vm3, %v2255_v8, %v3078_v0 }
 0x249   :  { %v742_v54 = vadd.f32 %v4533_v60, %v741_v59 }
 0x24a   :  { %v2286_v21 = vadd.f32 %v2285_v44, %v2284_v52  ;;  %v1619_v15 = vpop.f32.mrf.mxu1  ;;  %v2283_v59 = vadd.f32 %v2282_v26, %v2281_v33  ;;  %v3080_v52 = vsel %vm3047_vm4, %v2262_v58, %v3079_v38 }
 0x24b   :  { %v1013_v19 = vmax.f32 %v742_v54, 0.0  ;;  %v3081_v53 = vsel %vm3049_vm5, %v2269_v1, %v3080_v52  ;;  %v158_v1 = vld [vmem:[%s5351_s0 + $0x3d8] sm:$0xff]  ;;  %v159_v52 = vld [vmem:[%s5351_s0 + $0x3e0] sm:$0xff] }
 0x24c   :  { %v2287_v10 = vrot.slane %v2286_v21, 2  ;;  %v3082_v31 = vsel %vm3051_vm6, %v2276_v34, %v3081_v53 }
 0x24d   :  { %3596 = vmatmul.msk.f32.gmra.mxu1 %vm1097_vm1, %v1013_v19  ;;  %v3083_v12 = vsel %vm3053_vm7, %v2283_v59, %v3082_v31 }
 0x24e   :  { %v2288_v22 = vadd.f32 %v2287_v10, %v2286_v21  ;;  %v157_v21 = vld [vmem:[%s5351_s0 + $0x3d0] sm:$0xff] }
 0x24f   :  { %3534 = vmatmul.msk.f32.vlgmr.msra.gmra.mxu3 %vm171_vm0, %v157_v21 }
 0x250   :  { %v2289_v24 = vrot.slane %v2288_v22, 1  ;;  %v744_v39 = vpop.f32.mrf.mxu0 }
 0x251   :  { %v745_v50 = vadd.f32 %v4533_v60, %v744_v39 }
 0x252   :  { %v1622_v45 = vpop.f32.mrf.mxu1  ;;  %v2290_v7 = vadd.f32 %v2289_v24, %v2288_v22 }
 0x253   :  { %v1014_v46 = vmax.f32 %v745_v50, 0.0  ;;  %v1623_v59 = vadd.f32 %v4711_v40, %v1622_v45  ;;  %v1620_v50 = vadd.f32 %v4711_v40, %v1619_v15 }
 0x254   :  { %v3084_v2 = vsel %vm3055_vm8, %v2290_v7, %v3083_v12 }
 0x255   :  { %3597 = vmatmul.msk.f32.gmra.mxu1 %vm1097_vm1, %v1014_v46  ;;  %3672 = vmatmul.msk.f32.gmra.mxu2 %vm171_vm0, %v3084_v2  ;;  %v1924_v31 = vmax.f32 %v1623_v59, 0.0  ;;  %v1923_v12 = vmax.f32 %v1620_v50, 0.0 }
 0x257   :  { %3535 = vmatmul.msk.f32.gmra.mxu3 %vm171_vm0, %v158_v1  ;;  %v2291_v21 = vsel %vm171_vm0, %v1923_v12, 0.0 }
 0x258   :  { %v747_v33 = vpop.f32.mrf.mxu0  ;;  %v3217_v44 = vpop.f32.mrf.mxu2  ;;  %v2292_v1 = vrot.slane %v2291_v21, 4 }
 0x259   :  { %v748_v38 = vadd.f32 %v4533_v60, %v747_v33  ;;  %v3218_v16 = vadd.f32 %v4728_v4, %v3217_v44 }
 0x25a   :  { %v1625_v54 = vpop.f32.mrf.mxu1 }
 0x25b   :  { %v1015_v9 = vmax.f32 %v748_v38, 0.0  ;;  %v3261_v43 = vmax.f32 %v3218_v16, 0.0  ;;  %v1626_v39 = vadd.f32 %v4711_v40, %v1625_v54  ;;  %v2298_v16 = vsel %vm171_vm0, %v1924_v31, 0.0 }
 0x25c   :  { %v2293_v31 = vadd.f32 %v2292_v1, %v2291_v21 }
 0x25d   :  { %3598 = vmatmul.msk.f32.gmra.mxu1 %vm1097_vm1, %v1015_v9  ;;  %v3281_v8 = vmul.f32 %v4740_v42, %v3261_v43  ;;  %v1925_v46 = vmax.f32 %v1626_v39, 0.0  ;;  %v160_v43 = vld [vmem:[%s5351_s0 + $0x3e8] sm:$0xff] }
 0x25f   :  { %v3301_v26 = vsel %vm1097_vm1, %v3281_v8, 0.0  ;;  %3536 = vmatmul.msk.f32.gmra.mxu3 %vm171_vm0, %v159_v52  ;;  %v2305_v9 = vsel %vm171_vm0, %v1925_v46, 0.0 }
 0x260   :  { %v750_v19 = vpop.f32.mrf.mxu0  ;;  %3302 = vadd.xlane.f32.xlu1 %v3301_v26 }
 0x261   :  { %v751_v49 = vadd.f32 %v4533_v60, %v750_v19  ;;  %v2299_v19 = vrot.slane %v2298_v16, 4 }
 0x262   :  { %v1628_v58 = vpop.f32.mrf.mxu1 }
 0x263   :  { %v1016_v10 = vmax.f32 %v751_v49, 0.0  ;;  %v1629_v53 = vadd.f32 %v4711_v40, %v1628_v58  ;;  %v2306_v58 = vrot.slane %v2305_v9, 4 }
 0x265   :  { %3599 = vmatmul.msk.f32.gmra.mxu1 %vm1097_vm1, %v1016_v10  ;;  %v1926_v2 = vmax.f32 %v1629_v53, 0.0  ;;  %v2307_v50 = vadd.f32 %v2306_v58, %v2305_v9 }
 0x267   :  { %v2312_v8 = vsel %vm171_vm0, %v1926_v2, 0.0  ;;  %3537 = vmatmul.msk.f32.gmra.mxu3 %vm171_vm0, %v160_v43 }
 0x268   :  { %v753_v0 = vpop.f32.mrf.mxu0 }
 0x269   :  { %v754_v34 = vadd.f32 %v4533_v60, %v753_v0  ;;  %v2313_v0 = vrot.slane %v2312_v8, 4 }
 0x26a   :  { %v1631_v22 = vpop.f32.mrf.mxu1 }
 0x26b   :  { %v1017_v24 = vmax.f32 %v754_v34, 0.0  ;;  %v1632_v7 = vadd.f32 %v4711_v40, %v1631_v22  ;;  %v2314_v46 = vadd.f32 %v2313_v0, %v2312_v8 }
 0x26d   :  { %3600 = vmatmul.msk.f32.gmra.mxu1 %vm1097_vm1, %v1017_v24  ;;  %v1927_v44 = vmax.f32 %v1632_v7, 0.0  ;;  %v2300_v24 = vadd.f32 %v2299_v19, %v2298_v16 }
 0x26f   :  { %v2319_v49 = vsel %vm171_vm0, %v1927_v44, 0.0 }
 0x270   :  { %v756_v45 = vpop.f32.mrf.mxu0  ;;  %v2320_v22 = vrot.slane %v2319_v49, 4 }
 0x271   :  { %v757_v33 = vadd.f32 %v4533_v60, %v756_v45  ;;  %v161_v45 = vld [vmem:[%s5351_s0 + $0x3f0] sm:$0xff] }
 0x272   :  { %v1634_v38 = vpop.f32.mrf.mxu1  ;;  %v2321_v12 = vadd.f32 %v2320_v22, %v2319_v49  ;;  %3538 = vmatmul.msk.f32.gmra.mxu3 %vm171_vm0, %v161_v45 }
 0x273   :  { %v1018_v15 = vmax.f32 %v757_v33, 0.0  ;;  %v1635_v54 = vadd.f32 %v4711_v40, %v1634_v38  ;;  %v2301_v33 = vrot.slane %v2300_v24, 2  ;;  %v2308_v38 = vrot.slane %v2307_v50, 2 }
 0x274   :  { %v2322_v21 = vrot.slane %v2321_v12, 2 }
 0x275   :  { %v1928_v26 = vmax.f32 %v1635_v54, 0.0  ;;  %3601 = vmatmul.msk.f32.gmra.mxu1 %vm1097_vm1, %v1018_v15  ;;  %v2294_v15 = vrot.slane %v2293_v31, 2  ;;  %v2315_v54 = vrot.slane %v2314_v46, 2  ;;  %v2309_v1 = vadd.f32 %v2308_v38, %v2307_v50 }
 0x277   :  { %v2326_v10 = vsel %vm171_vm0, %v1928_v26, 0.0  ;;  %v2302_v26 = vadd.f32 %v2301_v33, %v2300_v24  ;;  %v2295_v22 = vadd.f32 %v2294_v15, %v2293_v31 }
 0x278   :  { %v759_v34 = vpop.f32.mrf.mxu0  ;;  %v2327_v39 = vrot.slane %v2326_v10, 4 }
 0x279   :  { %v760_v59 = vadd.f32 %v4533_v60, %v759_v34 }
 0x27a   :  { %v1637_v52 = vpop.f32.mrf.mxu1  ;;  %v2328_v44 = vadd.f32 %v2327_v39, %v2326_v10  ;;  %v2316_v10 = vadd.f32 %v2315_v54, %v2314_v46  ;;  %v162_v39 = vld [vmem:[%s5351_s0 + $0x3f8] sm:$0xff] }
 0x27b   :  { %v1019_v53 = vmax.f32 %v760_v59, 0.0  ;;  %v1638_v7 = vadd.f32 %v4711_v40, %v1637_v52  ;;  %v2323_v52 = vadd.f32 %v2322_v21, %v2321_v12  ;;  %3539 = vmatmul.msk.f32.gmra.mxu3 %vm171_vm0, %v162_v39  ;;  %v4825_v12 = vld [vmem:[%s5353_s2] ss:$0 sm:$0xff] }
 0x27c   :  { %v2329_v19 = vrot.slane %v2328_v44, 2  ;;  %v2317_v31 = vrot.slane %v2316_v10, 1 }
 0x27d   :  { %v1929_v2 = vmax.f32 %v1638_v7, 0.0  ;;  %3602 = vmatmul.msk.f32.gmra.mxu1 %vm1097_vm1, %v1019_v53  ;;  %v2310_v7 = vrot.slane %v2309_v1, 1  ;;  %v2324_v38 = vrot.slane %v2323_v52, 1 }
 0x27e   :  { %v2330_v24 = vadd.f32 %v2329_v19, %v2328_v44 }
 0x27f   :  { %v2333_v16 = vsel %vm171_vm0, %v1929_v2, 0.0  ;;  %v2296_v2 = vrot.slane %v2295_v22, 1 }
 0x280   :  { %v2334_v9 = vrot.slane %v2333_v16, 4  ;;  %v762_v43 = vpop.f32.mrf.mxu0  ;;  %v2331_v54 = vrot.slane %v2330_v24, 1 }
 0x281   :  { %v763_v8 = vadd.f32 %v4533_v60, %v762_v43  ;;  %v2303_v60 = vrot.slane %v2302_v26, 1  ;;  %v2311_v43 = vadd.f32 %v2310_v7, %v2309_v1  ;;  %v2297_v19 = vadd.f32 %v2296_v2, %v2295_v22 }
 0x282   :  { %v2335_v49 = vadd.f32 %v2334_v9, %v2333_v16  ;;  %v1640_v58 = vpop.f32.mrf.mxu1 }
 0x283   :  { %v1020_v0 = vmax.f32 %v763_v8, 0.0  ;;  %v1641_v34 = vadd.f32 %v4711_v40, %v1640_v58  ;;  %v2304_v15 = vadd.f32 %v2303_v60, %v2302_v26 }
 0x284   :  { %v2336_v59 = vrot.slane %v2335_v49, 2 }
 0x285   :  { %v1930_v53 = vmax.f32 %v1641_v34, 0.0  ;;  %3603 = vmatmul.msk.f32.gmra.mxu1 %vm1097_vm1, %v1020_v0  ;;  %v2325_v0 = vadd.f32 %v2324_v38, %v2323_v52  ;;  %v3085_v34 = vsel %vm3043_vm2, %v2304_v15, %v2297_v19 }
 0x286   :  { %v2337_v50 = vadd.f32 %v2336_v59, %v2335_v49  ;;  %v2318_v49 = vadd.f32 %v2317_v31, %v2316_v10  ;;  %v2332_v59 = vadd.f32 %v2331_v54, %v2330_v24 }
 0x287   :  { %v2340_v45 = vsel %vm171_vm0, %v1930_v53, 0.0  ;;  %v3086_v53 = vsel %vm3045_vm3, %v2311_v43, %v3085_v34 }
 0x288   :  { %v2341_v46 = vrot.slane %v2340_v45, 4  ;;  %v765_v33 = vpop.f32.mrf.mxu0  ;;  %v2338_v21 = vrot.slane %v2337_v50, 1 }
 0x289   :  { %v766_v16 = vadd.f32 %v4825_v12, %v765_v33 }
 0x28a   :  { %v2342_v9 = vadd.f32 %v2341_v46, %v2340_v45  ;;  %v1643_v44 = vpop.f32.mrf.mxu1  ;;  %v2339_v33 = vadd.f32 %v2338_v21, %v2337_v50  ;;  %v3087_v45 = vsel %vm3047_vm4, %v2318_v49, %v3086_v53 }
 0x28b   :  { %v1021_v8 = vmax.f32 %v766_v16, 0.0  ;;  %v3088_v22 = vsel %vm3049_vm5, %v2325_v0, %v3087_v45 }
 0x28c   :  { %v2343_v58 = vrot.slane %v2342_v9, 2  ;;  %v3089_v52 = vsel %vm3051_vm6, %v2332_v59, %v3088_v22 }
 0x28d   :  { %3604 = vmatmul.msk.f32.gmra.mxu1 %vm1097_vm1, %v1021_v8  ;;  %v3090_v31 = vsel %vm3053_vm7, %v2339_v33, %v3089_v52 }
 0x28e   :  { %v2344_v39 = vadd.f32 %v2343_v58, %v2342_v9 }
 0x290   :  { %v2345_v26 = vrot.slane %v2344_v39, 1  ;;  %v768_v60 = vpop.f32.mrf.mxu0 }
 0x291   :  { %v769_v1 = vadd.f32 %v4825_v12, %v768_v60  ;;  %v1644_v60 = vadd.f32 %v4711_v40, %v1643_v44  ;;  %v784_v44 = vadd.f32 %v4825_v12, %v3987_v57 }
 0x292   :  { %v1646_v10 = vpop.f32.mrf.mxu1  ;;  %v2346_v7 = vadd.f32 %v2345_v26, %v2344_v39  ;;  %v781_v26 = vadd.f32 %v4825_v12, %v3975_v51 }
 0x293   :  { %v1022_v2 = vmax.f32 %v769_v1, 0.0  ;;  %v1647_v39 = vadd.f32 %v4711_v40, %v1646_v10 }
 0x294   :  { %v3091_v24 = vsel %vm3055_vm8, %v2346_v7, %v3090_v31  ;;  %v1026_v52 = vmax.f32 %v781_v26, 0.0  ;;  %v787_v26 = vadd.f32 %v4825_v12, %v3999_v63 }
 0x295   :  { %3605 = vmatmul.msk.f32.gmra.mxu1 %vm1097_vm1, %v1022_v2  ;;  %3673 = vmatmul.msk.f32.gmra.mxu2 %vm171_vm0, %v3091_v24  ;;  %v1932_v22 = vmax.f32 %v1647_v39, 0.0  ;;  %v1931_v2 = vmax.f32 %v1644_v60, 0.0 }
 0x298   :  { %v771_v50 = vpop.f32.mrf.mxu0  ;;  %v3220_v46 = vpop.f32.mrf.mxu2 }
 0x299   :  { %v772_v38 = vadd.f32 %v4825_v12, %v771_v50  ;;  %v3221_v16 = vadd.f32 %v4728_v4, %v3220_v46  ;;  %v2354_v50 = vsel %vm171_vm0, %v1932_v22, 0.0 }
 0x29a   :  { %v1649_v15 = vpop.f32.mrf.mxu1 }
 0x29b   :  { %v1023_v54 = vmax.f32 %v772_v38, 0.0  ;;  %v3262_v9 = vmax.f32 %v3221_v16, 0.0  ;;  %v1650_v33 = vadd.f32 %v4711_v40, %v1649_v15  ;;  %v2347_v38 = vsel %vm171_vm0, %v1931_v2, 0.0 }
 0x29d   :  { %3606 = vmatmul.msk.f32.gmra.mxu1 %vm1097_vm1, %v1023_v54  ;;  %v3282_v43 = vmul.f32 %v4740_v42, %v3262_v9  ;;  %v1933_v7 = vmax.f32 %v1650_v33, 0.0  ;;  %v2355_v54 = vrot.slane %v2354_v50, 4 }
 0x29f   :  { %v3304_v21 = vsel %vm1097_vm1, %v3282_v43, 0.0  ;;  %v2361_v51 = vsel %vm171_vm0, %v1933_v7, 0.0 }
 0x2a0   :  { %v774_v8 = vpop.f32.mrf.mxu0  ;;  %3305 = vadd.xlane.f32.xlu1 %v3304_v21  ;;  %v2362_v43 = vrot.slane %v2361_v51, 4 }
 0x2a1   :  { %v775_v19 = vadd.f32 %v4825_v12, %v774_v8  ;;  %v2348_v8 = vrot.slane %v2347_v38, 4 }
 0x2a2   :  { %v1652_v49 = vpop.f32.mrf.mxu1 }
 0x2a3   :  { %v1024_v58 = vmax.f32 %v775_v19, 0.0  ;;  %v1653_v45 = vadd.f32 %v4711_v40, %v1652_v49  ;;  %v1027_v49 = vmax.f32 %v784_v44, 0.0 }
 0x2a5   :  { %3607 = vmatmul.msk.f32.gmra.mxu1 %vm1097_vm1, %v1024_v58  ;;  %v1934_v31 = vmax.f32 %v1653_v45, 0.0 }
 0x2a7   :  { %v2368_v16 = vsel %vm171_vm0, %v1934_v31, 0.0 }
 0x2a8   :  { %v777_v0 = vpop.f32.mrf.mxu0  ;;  %v2369_v19 = vrot.slane %v2368_v16, 4 }
 0x2a9   :  { %v778_v34 = vadd.f32 %v4825_v12, %v777_v0  ;;  %v2356_v0 = vadd.f32 %v2355_v54, %v2354_v50 }
 0x2aa   :  { %v1655_v59 = vpop.f32.mrf.mxu1  ;;  %v2370_v33 = vadd.f32 %v2369_v19, %v2368_v16 }
 0x2ab   :  { %v1025_v53 = vmax.f32 %v778_v34, 0.0  ;;  %v1656_v1 = vadd.f32 %v4711_v40, %v1655_v59  ;;  %v2363_v59 = vadd.f32 %v2362_v43, %v2361_v51  ;;  %v790_v43 = vadd.f32 %v4825_v12, %v4011_v5 }
 0x2ac   :  { %v2371_v31 = vrot.slane %v2370_v33, 2 }
 0x2ad   :  { %3608 = vmatmul.msk.f32.vlgmr.msrb.gmra.mxu3 %vm1097_vm1, %v1025_v53  ;;  %v1935_v10 = vmax.f32 %v1656_v1, 0.0  ;;  %v2349_v53 = vadd.f32 %v2348_v8, %v2347_v38  ;;  %v2357_v1 = vrot.slane %v2356_v0, 2  ;;  %v2364_v7 = vrot.slane %v2363_v59, 2 }
 0x2ae   :  { %v2372_v54 = vadd.f32 %v2371_v31, %v2370_v33 }
 0x2af   :  { %v2375_v9 = vsel %vm171_vm0, %v1935_v10, 0.0  ;;  %v2350_v2 = vrot.slane %v2349_v53, 2  ;;  %v2365_v16 = vadd.f32 %v2364_v7, %v2363_v59 }
 0x2b0   :  { %v2376_v58 = vrot.slane %v2375_v9, 4  ;;  %v2373_v59 = vrot.slane %v2372_v54, 1 }
 0x2b2   :  { %v1658_v24 = vpop.f32.mrf.mxu1  ;;  %v2377_v60 = vadd.f32 %v2376_v58, %v2375_v9  ;;  %v2366_v58 = vrot.slane %v2365_v16, 1 }
 0x2b3   :  { %v1659_v46 = vadd.f32 %v4711_v40, %v1658_v24  ;;  %v1028_v24 = vmax.f32 %v787_v26, 0.0  ;;  %v1029_v26 = vmax.f32 %v790_v43, 0.0 }
 0x2b4   :  { %v2378_v50 = vrot.slane %v2377_v60, 2  ;;  %v2367_v5 = vadd.f32 %v2366_v58, %v2365_v16 }
 0x2b5   :  { %v1936_v15 = vmax.f32 %v1659_v46, 0.0  ;;  %3609 = vmatmul.msk.f32.gmra.mxu3 %vm1097_vm1, %v1026_v52  ;;  %v2358_v46 = vadd.f32 %v2357_v1, %v2356_v0 }
 0x2b7   :  { %v2382_v21 = vsel %vm171_vm0, %v1936_v15, 0.0  ;;  %v2351_v15 = vadd.f32 %v2350_v2, %v2349_v53  ;;  %v2359_v19 = vrot.slane %v2358_v46, 1  ;;  %v2374_v2 = vadd.f32 %v2373_v59, %v2372_v54 }
 0x2b8   :  { %v2383_v34 = vrot.slane %v2382_v21, 4 }
 0x2b9   :  { %v2360_v33 = vadd.f32 %v2359_v19, %v2358_v46 }
 0x2ba   :  { %v1661_v57 = vpop.f32.mrf.mxu1  ;;  %v2384_v22 = vadd.f32 %v2383_v34, %v2382_v21  ;;  %v2379_v21 = vadd.f32 %v2378_v50, %v2377_v60 }
 0x2bb   :  { %v1662_v39 = vadd.f32 %v4711_v40, %v1661_v57  ;;  %v2352_v57 = vrot.slane %v2351_v15, 1 }
 0x2bc   :  { %v2385_v51 = vrot.slane %v2384_v22, 2  ;;  %v2380_v53 = vrot.slane %v2379_v21, 1 }
 0x2bd   :  { %v1937_v45 = vmax.f32 %v1662_v39, 0.0  ;;  %3610 = vmatmul.msk.f32.gmra.mxu3 %vm1097_vm1, %v1027_v49 }
 0x2be   :  { %v2386_v49 = vadd.f32 %v2385_v51, %v2384_v22  ;;  %v793_v22 = vadd.f32 %v4825_v12, %v4023_v11 }
 0x2bf   :  { %v2389_v52 = vsel %vm171_vm0, %v1937_v45, 0.0 }
 0x2c0   :  { %v2390_v10 = vrot.slane %v2389_v52, 4  ;;  %v2387_v45 = vrot.slane %v2386_v49, 1 }
 0x2c2   :  { %v2391_v44 = vadd.f32 %v2390_v10, %v2389_v52  ;;  %v1664_v38 = vpop.f32.mrf.mxu1  ;;  %v2353_v52 = vadd.f32 %v2352_v57, %v2351_v15  ;;  %v2381_v10 = vadd.f32 %v2380_v53, %v2379_v21  ;;  %v2388_v50 = vadd.f32 %v2387_v45, %v2386_v49 }
 0x2c3   :  { %v1665_v63 = vadd.f32 %v4711_v40, %v1664_v38  ;;  %v799_v57 = vadd.f32 %v4825_v12, %v4047_v23  ;;  %v802_v53 = vadd.f32 %v4825_v12, %v4059_v29 }
 0x2c4   :  { %v2392_v9 = vrot.slane %v2391_v44, 2 }
 0x2c5   :  { %v1938_v8 = vmax.f32 %v1665_v63, 0.0  ;;  %3611 = vmatmul.msk.f32.gmra.mxu3 %vm1097_vm1, %v1028_v24  ;;  %v3092_v24 = vsel %vm3043_vm2, %v2360_v33, %v2353_v52  ;;  %v1030_v63 = vmax.f32 %v793_v22, 0.0  ;;  %v1033_v33 = vmax.f32 %v802_v53, 0.0 }
 0x2c6   :  { %v2393_v0 = vadd.f32 %v2392_v9, %v2391_v44  ;;  %v3093_v46 = vsel %vm3045_vm3, %v2367_v5, %v3092_v24  ;;  %v805_v5 = vadd.f32 %v4825_v12, %v4071_v35 }
 0x2c7   :  { %v2396_v34 = vsel %vm171_vm0, %v1938_v8, 0.0  ;;  %v3094_v16 = vsel %vm3047_vm4, %v2374_v2, %v3093_v46  ;;  %v796_v8 = vadd.f32 %v4825_v12, %v4035_v17  ;;  %v1032_v17 = vmax.f32 %v799_v57, 0.0 }
 0x2c8   :  { %v2397_v39 = vrot.slane %v2396_v34, 4  ;;  %v2394_v60 = vrot.slane %v2393_v0, 1  ;;  %v3095_v15 = vsel %vm3049_vm5, %v2381_v10, %v3094_v16  ;;  %v1034_v22 = vmax.f32 %v805_v5, 0.0 }
 0x2c9   :  { %v3096_v11 = vsel %vm3051_vm6, %v2388_v50, %v3095_v15  ;;  %v1031_v49 = vmax.f32 %v796_v8, 0.0 }
 0x2ca   :  { %v2398_v1 = vadd.f32 %v2397_v39, %v2396_v34  ;;  %v1667_v7 = vpop.f32.mrf.mxu1  ;;  %v2395_v44 = vadd.f32 %v2394_v60, %v2393_v0 }
 0x2cb   :  { %v1668_v60 = vadd.f32 %v4711_v40, %v1667_v7 }
 0x2cc   :  { %v2399_v31 = vrot.slane %v2398_v1, 2  ;;  %v3097_v43 = vsel %vm3053_vm7, %v2395_v44, %v3096_v11 }
 0x2cd   :  { %3612 = vmatmul.msk.f32.gmra.mxu3 %vm1097_vm1, %v1029_v26  ;;  %v1939_v10 = vmax.f32 %v1668_v60, 0.0 }
 0x2ce   :  { %v2400_v51 = vadd.f32 %v2399_v31, %v2398_v1 }
 0x2cf   :  { %v2403_v16 = vsel %vm171_vm0, %v1939_v10, 0.0 }
 0x2d0   :  { %v2401_v38 = vrot.slane %v2400_v51, 1 }
 0x2d2   :  { %v1670_v54 = vpop.f32.mrf.mxu1  ;;  %v2402_v9 = vadd.f32 %v2401_v38, %v2400_v51  ;;  %v4909_v7 = vpop.f32.mrf.mxu3  ;;  %v808_v38 = vadd.f32 %v4825_v12, %v4083_v41 }
 0x2d3   :  { %v1671_v1 = vadd.f32 %v4711_v40, %v1670_v54 }
 0x2d4   :  { %v3098_v21 = vsel %vm3055_vm8, %v2402_v9, %v3097_v43 }
 0x2d5   :  { %3613 = vmatmul.msk.f32.gmra.mxu3 %vm1097_vm1, %v1030_v63  ;;  %3674 = vmatmul.msk.f32.gmra.mxu2 %vm171_vm0, %v3098_v21  ;;  %v1940_v29 = vmax.f32 %v1671_v1, 0.0  ;;  %v2404_v21 = vrot.slane %v2403_v16, 4 }
 0x2d7   :  { %v2410_v46 = vsel %vm171_vm0, %v1940_v29, 0.0 }
 0x2d8   :  { %v3223_v19 = vpop.f32.mrf.mxu2  ;;  %v2411_v54 = vrot.slane %v2410_v46, 4 }
 0x2d9   :  { %v3224_v58 = vadd.f32 %v4728_v4, %v3223_v19  ;;  %v1035_v19 = vmax.f32 %v808_v38, 0.0  ;;  %v814_v38 = vadd.f32 %v4825_v12, %v4107_v55 }
 0x2da   :  { %v1673_v0 = vpop.f32.mrf.mxu1  ;;  %v4922_v1 = vpop.f32.mrf.mxu3 }
 0x2db   :  { %v3263_v34 = vmax.f32 %v3224_v58, 0.0  ;;  %v1674_v23 = vadd.f32 %v4711_v40, %v1673_v0  ;;  %v2412_v58 = vadd.f32 %v2411_v54, %v2410_v46 }
 0x2dd   :  { %3614 = vmatmul.msk.f32.gmra.mxu3 %vm1097_vm1, %v1031_v49  ;;  %v3283_v59 = vmul.f32 %v4740_v42, %v3263_v34  ;;  %v1941_v31 = vmax.f32 %v1674_v23, 0.0 }
 0x2df   :  { %v3307_v39 = vsel %vm1097_vm1, %v3283_v59, 0.0  ;;  %v2417_v35 = vsel %vm171_vm0, %v1941_v31, 0.0  ;;  %v2405_v59 = vadd.f32 %v2404_v21, %v2403_v16 }
 0x2e0   :  { %3308 = vadd.xlane.f32.xlu2 %v3307_v39  ;;  %v2418_v11 = vrot.slane %v2417_v35, 4 }
 0x2e1   :  { %v2406_v60 = vrot.slane %v2405_v59, 2 }
 0x2e2   :  { %v1676_v26 = vpop.f32.mrf.mxu1  ;;  %v2419_v34 = vadd.f32 %v2418_v11, %v2417_v35 }
 0x2e3   :  { %v1677_v52 = vadd.f32 %v4711_v40, %v1676_v26  ;;  %v2407_v46 = vadd.f32 %v2406_v60, %v2405_v59 }
 0x2e4   :  { %v2420_v23 = vrot.slane %v2419_v34, 2 }
 0x2e5   :  { %3615 = vmatmul.msk.f32.gmra.mxu3 %vm1097_vm1, %v1032_v17  ;;  %v1942_v24 = vmax.f32 %v1677_v52, 0.0  ;;  %v811_v17 = vadd.f32 %v4825_v12, %v4095_v48  ;;  %v2408_v21 = vrot.slane %v2407_v46, 1 }
 0x2e7   :  { %v2424_v63 = vsel %vm171_vm0, %v1942_v24, 0.0  ;;  %v1036_v29 = vmax.f32 %v811_v17, 0.0  ;;  %v2409_v59 = vadd.f32 %v2408_v21, %v2407_v46 }
 0x2e8   :  { %v2425_v8 = vrot.slane %v2424_v63, 4 }
 0x2ea   :  { %v1679_v45 = vpop.f32.mrf.mxu1  ;;  %v2426_v39 = vadd.f32 %v2425_v8, %v2424_v63 }
 0x2eb   :  { %v1680_v2 = vadd.f32 %v4711_v40, %v1679_v45 }
 0x2ec   :  { %v2427_v52 = vrot.slane %v2426_v39, 2 }
 0x2ed   :  { %3616 = vmatmul.msk.f32.gmra.mxu3 %vm1097_vm1, %v1033_v33  ;;  %v1943_v50 = vmax.f32 %v1680_v2, 0.0  ;;  %v2413_v33 = vrot.slane %v2412_v58, 2 }
 0x2ef   :  { %v2431_v9 = vsel %vm171_vm0, %v1943_v50, 0.0  ;;  %v2421_v50 = vadd.f32 %v2420_v23, %v2419_v34 }
 0x2f0   :  { %v2432_v49 = vrot.slane %v2431_v9, 4 }
 0x2f2   :  { %v1682_v51 = vpop.f32.mrf.mxu1  ;;  %v2433_v26 = vadd.f32 %v2432_v49, %v2431_v9  ;;  %v2422_v9 = vrot.slane %v2421_v50, 1  ;;  %v1037_v49 = vmax.f32 %v814_v38, 0.0 }
 0x2f3   :  { %v1683_v44 = vadd.f32 %v4711_v40, %v1682_v51 }
 0x2f4   :  { %v2434_v31 = vrot.slane %v2433_v26, 2  ;;  %v2423_v34 = vadd.f32 %v2422_v9, %v2421_v50 }
 0x2f5   :  { %v1944_v15 = vmax.f32 %v1683_v44, 0.0  ;;  %3617 = vmatmul.msk.f32.gmra.mxu3 %vm1097_vm1, %v1034_v22  ;;  %v2414_v22 = vadd.f32 %v2413_v33, %v2412_v58  ;;  %v2428_v44 = vadd.f32 %v2427_v52, %v2426_v39 }
 0x2f6   :  { %v2435_v16 = vadd.f32 %v2434_v31, %v2433_v26  ;;  %v817_v26 = vadd.f32 %v4825_v12, %v4119_v62 }
 0x2f7   :  { %v2438_v43 = vsel %vm171_vm0, %v1944_v15, 0.0  ;;  %v2415_v15 = vrot.slane %v2414_v22, 1  ;;  %v2429_v8 = vrot.slane %v2428_v44, 1 }
 0x2f8   :  { %v2439_v0 = vrot.slane %v2438_v43, 4  ;;  %v2436_v58 = vrot.slane %v2435_v16, 1 }
 0x2f9   :  { %v2430_v39 = vadd.f32 %v2429_v8, %v2428_v44 }
 0x2fa   :  { %v1685_v41 = vpop.f32.mrf.mxu1  ;;  %v2440_v45 = vadd.f32 %v2439_v0, %v2438_v43  ;;  %v2416_v0 = vadd.f32 %v2415_v15, %v2414_v22  ;;  %v823_v15 = vadd.f32 %v4825_v12, %v4143_v13  ;;  %v829_v13 = vadd.f32 %v4825_v12, %v4169_v28 }
 0x2fb   :  { %v1686_v57 = vadd.f32 %v4711_v40, %v1685_v41 }
 0x2fc   :  { %v2441_v10 = vrot.slane %v2440_v45, 2  ;;  %v3099_v33 = vsel %vm3043_vm2, %v2416_v0, %v2409_v59  ;;  %v1040_v9 = vmax.f32 %v823_v15, 0.0 }
 0x2fd   :  { %v1945_v53 = vmax.f32 %v1686_v57, 0.0  ;;  %3618 = vmatmul.msk.f32.gmra.mxu3 %vm1097_vm1, %v1035_v19 }
 0x2fe   :  { %v2442_v54 = vadd.f32 %v2441_v10, %v2440_v45 }
 0x2ff   :  { %v2445_v5 = vsel %vm171_vm0, %v1945_v53, 0.0  ;;  %v2437_v53 = vadd.f32 %v2436_v58, %v2435_v16 }
 0x300   :  { %v2446_v2 = vrot.slane %v2445_v5, 4  ;;  %v2443_v41 = vrot.slane %v2442_v54, 1 }
 0x302   :  { %v2447_v24 = vadd.f32 %v2446_v2, %v2445_v5  ;;  %v1688_v48 = vpop.f32.mrf.mxu1  ;;  %v2444_v45 = vadd.f32 %v2443_v41, %v2442_v54  ;;  %v3100_v5 = vsel %vm3045_vm3, %v2423_v34, %v3099_v33 }
 0x303   :  { %v1689_v51 = vadd.f32 %v4711_v40, %v1688_v48  ;;  %v4930_v40 = vpop.f32.mrf.mxu3  ;;  %v3101_v2 = vsel %vm3047_vm4, %v2430_v39, %v3100_v5 }
 0x304   :  { %v2448_v35 = vrot.slane %v2447_v24, 2  ;;  %v3102_v31 = vsel %vm3049_vm5, %v2437_v53, %v3101_v2 }
 0x305   :  { %v1946_v63 = vmax.f32 %v1689_v51, 0.0  ;;  %3619 = vmatmul.msk.f32.gmra.mxu3 %vm1097_vm1, %v1036_v29  ;;  %v1038_v29 = vmax.f32 %v817_v26, 0.0  ;;  %v3103_v62 = vsel %vm3051_vm6, %v2444_v45, %v3102_v31  ;;  %v820_v51 = vadd.f32 %v4825_v12, %v4131_v6 }
 0x306   :  { %v2449_v11 = vadd.f32 %v2448_v35, %v2447_v24 }
 0x307   :  { %v2452_v43 = vsel %vm171_vm0, %v1946_v63, 0.0  ;;  %v1039_v44 = vmax.f32 %v820_v51, 0.0 }
 0x308   :  { %v2453_v19 = vrot.slane %v2452_v43, 4  ;;  %v2450_v57 = vrot.slane %v2449_v11, 1 }
 0x30a   :  { %v2454_v55 = vadd.f32 %v2453_v19, %v2452_v43  ;;  %v2451_v60 = vadd.f32 %v2450_v57, %v2449_v11  ;;  %v1691_v22 = vpop.f32.mrf.mxu1  ;;  %v826_v11 = vadd.f32 %v4825_v12, %v4155_v20  ;;  %v1042_v19 = vmax.f32 %v829_v13, 0.0 }
 0x30b   :  { %v4940_v24 = vpop.f32.mrf.mxu3 }
 0x30c   :  { %v2455_v17 = vrot.slane %v2454_v55, 2  ;;  %v3104_v48 = vsel %vm3053_vm7, %v2451_v60, %v3103_v62  ;;  %v1041_v21 = vmax.f32 %v826_v11, 0.0 }
 0x30d   :  { %3620 = vmatmul.msk.f32.gmra.mxu3 %vm1097_vm1, %v1037_v49  ;;  %v4967_v49 = vld [vmem:[%s5355_s4] ss:$0 sm:$0xff] }
 0x30e   :  { %v2456_v23 = vadd.f32 %v2455_v17, %v2454_v55  ;;  %v1692_v0 = vadd.f32 %v4967_v49, %v1691_v22  ;;  %v5385_v55 = vld [vmem:[#allocation6_spill] sm:$0xff]  ;;  %v5386_v22 = vld [vmem:[#allocation7_spill] sm:$0xff] }
 0x30f   :  { %v832_v34 = vadd.f32 %v4825_v12, %v5385_v55 }
 0x310   :  { %v2457_v52 = vrot.slane %v2456_v23, 1  ;;  %v1947_v39 = vmax.f32 %v1692_v0, 0.0 }
 0x311   :  { %v1043_v33 = vmax.f32 %v832_v34, 0.0 }
 0x312   :  { %v2458_v10 = vadd.f32 %v2457_v52, %v2456_v23  ;;  %v1694_v16 = vpop.f32.mrf.mxu1  ;;  %v2459_v60 = vsel %vm171_vm0, %v1947_v39, 0.0 }
 0x313   :  { %v4949_v63 = vpop.f32.mrf.mxu3  ;;  %v1695_v20 = vadd.f32 %v4967_v49, %v1694_v16 }
 0x314   :  { %v3105_v50 = vsel %vm3055_vm8, %v2458_v10, %v3104_v48  ;;  %v835_v10 = vadd.f32 %v4825_v12, %v5386_v22 }
 0x315   :  { %3621 = vmatmul.msk.f32.gmra.mxu3 %vm1097_vm1, %v1038_v29  ;;  %3675 = vmatmul.msk.f32.gmra.mxu2 %vm171_vm0, %v3105_v50  ;;  %v1948_v57 = vmax.f32 %v1695_v20, 0.0  ;;  %v2460_v50 = vrot.slane %v2459_v60, 4 }
 0x316   :  { %v1044_v16 = vmax.f32 %v835_v10, 0.0 }
 0x317   :  { %v2466_v45 = vsel %vm171_vm0, %v1948_v57, 0.0 }
 0x318   :  { %v3226_v46 = vpop.f32.mrf.mxu2  ;;  %v2467_v29 = vrot.slane %v2466_v45, 4 }
 0x319   :  { %v3227_v35 = vadd.f32 %v4728_v4, %v3226_v46 }
 0x31a   :  { %v1697_v4 = vpop.f32.mrf.mxu1 }
 0x31b   :  { %v3264_v38 = vmax.f32 %v3227_v35, 0.0  ;;  %v4959_v43 = vpop.f32.mrf.mxu3  ;;  %v1698_v58 = vadd.f32 %v4967_v49, %v1697_v4 }
 0x31d   :  { %3622 = vmatmul.msk.f32.gmra.mxu3 %vm1097_vm1, %v1039_v44  ;;  %v3284_v54 = vmul.f32 %v4740_v42, %v3264_v38  ;;  %v1949_v59 = vmax.f32 %v1698_v58, 0.0  ;;  %v2468_v44 = vadd.f32 %v2467_v29, %v2466_v45 }
 0x31f   :  { %v3310_v6 = vsel %vm1097_vm1, %v3284_v54, 0.0  ;;  %v2473_v5 = vsel %vm171_vm0, %v1949_v59, 0.0 }
 0x320   :  { %3311 = vadd.xlane.f32.xlu2 %v3310_v6  ;;  %v2474_v62 = vrot.slane %v2473_v5, 4  ;;  %v2461_v6 = vadd.f32 %v2460_v50, %v2459_v60 }
 0x322   :  { %v1700_v8 = vpop.f32.mrf.mxu1  ;;  %v2475_v15 = vadd.f32 %v2474_v62, %v2473_v5  ;;  %v2462_v58 = vrot.slane %v2461_v6, 2 }
 0x323   :  { %v1701_v41 = vadd.f32 %v4967_v49, %v1700_v8  ;;  %v5387_v8 = vld [vmem:[#allocation8_spill] sm:$0xff] }
 0x325   :  { %3623 = vmatmul.msk.f32.gmra.mxu3 %vm1097_vm1, %v1040_v9  ;;  %v1950_v17 = vmax.f32 %v1701_v41, 0.0 }
 0x327   :  { %v2480_v52 = vsel %vm171_vm0, %v1950_v17, 0.0 }
 0x328   :  { %v2481_v51 = vrot.slane %v2480_v52, 4 }
 0x32a   :  { %v2482_v9 = vadd.f32 %v2481_v51, %v2480_v52 }
 0x32c   :  { %v2483_v0 = vrot.slane %v2482_v9, 2 }
 0x32d   :  { %3624 = vmatmul.msk.f32.gmra.mxu3 %vm1097_vm1, %v1041_v21  ;;  %v2469_v21 = vrot.slane %v2468_v44, 2 }
 0x32f   :  { %v2470_v55 = vadd.f32 %v2469_v21, %v2468_v44 }
 0x330   :  { %v1703_v42 = vpop.f32.mrf.mxu3 }
 0x331   :  { %v1704_v28 = vadd.f32 %v4967_v49, %v1703_v42  ;;  %v838_v42 = vadd.f32 %v4825_v12, %v5387_v8  ;;  %v2471_v60 = vrot.slane %v2470_v55, 1 }
 0x333   :  { %v1951_v26 = vmax.f32 %v1704_v28, 0.0  ;;  %v1045_v39 = vmax.f32 %v838_v42, 0.0  ;;  %v5389_v42 = vld [vmem:[#allocation10_spill] sm:$0xff] }
 0x335   :  { %3625 = vmatmul.msk.f32.gmra.mxu3 %vm1097_vm1, %v1042_v19  ;;  %v2487_v31 = vsel %vm171_vm0, %v1951_v26, 0.0  ;;  %v2476_v19 = vrot.slane %v2475_v15, 2 }
 0x336   :  { %v2488_v46 = vrot.slane %v2487_v31, 4 }
 0x337   :  { %v2477_v17 = vadd.f32 %v2476_v19, %v2475_v15  ;;  %v844_v19 = vadd.f32 %v4825_v12, %v5389_v42 }
 0x338   :  { %v1706_v53 = vpop.f32.mrf.mxu3  ;;  %v2489_v11 = vadd.f32 %v2488_v46, %v2487_v31  ;;  %v2472_v46 = vadd.f32 %v2471_v60, %v2470_v55  ;;  %v5020_v60 = vld [vmem:[%s5358_s7] ss:$0 sm:$0xff] }
 0x339   :  { %v1707_v23 = vadd.f32 %v4967_v49, %v1706_v53  ;;  %v2463_v53 = vadd.f32 %v2462_v58, %v2461_v6  ;;  %v2478_v31 = vrot.slane %v2477_v17, 1 }
 0x33a   :  { %v2490_v28 = vrot.slane %v2489_v11, 2 }
 0x33b   :  { %v1952_v2 = vmax.f32 %v1707_v23, 0.0  ;;  %v2464_v62 = vrot.slane %v2463_v53, 1  ;;  %v2479_v15 = vadd.f32 %v2478_v31, %v2477_v17  ;;  %v5008_v17 = vld [vmem:[%s5357_s6] ss:$0 sm:$0xff] }
 0x33c   :  { %v2491_v23 = vadd.f32 %v2490_v28, %v2489_v11 }
 0x33d   :  { %v2494_v48 = vsel %vm171_vm0, %v1952_v2, 0.0  ;;  %3626 = vmatmul.msk.f32.gmra.mxu3 %vm1097_vm1, %v1043_v33  ;;  %v2484_v33 = vadd.f32 %v2483_v0, %v2482_v9  ;;  %v5388_v2 = vld [vmem:[#allocation9_spill] sm:$0xff]  ;;  %v2465_v6 = vadd.f32 %v2464_v62, %v2463_v53 }
 0x33e   :  { %v2495_v35 = vrot.slane %v2494_v48, 4  ;;  %v841_v29 = vadd.f32 %v4825_v12, %v5388_v2  ;;  %v2492_v51 = vrot.slane %v2491_v23, 1 }
 0x33f   :  { %v3106_v21 = vsel %vm3043_vm2, %v2472_v46, %v2465_v6 }
 0x340   :  { %v1709_v38 = vpop.f32.mrf.mxu3  ;;  %v2496_v13 = vadd.f32 %v2495_v35, %v2494_v48  ;;  %v2485_v48 = vrot.slane %v2484_v33, 1 }
 0x341   :  { %v1710_v54 = vadd.f32 %v4967_v49, %v1709_v38 }
 0x342   :  { %v2497_v34 = vrot.slane %v2496_v13, 2  ;;  %v2486_v9 = vadd.f32 %v2485_v48, %v2484_v33 }
 0x343   :  { %v1953_v4 = vmax.f32 %v1710_v54, 0.0 }
 0x344   :  { %v2498_v52 = vadd.f32 %v2497_v34, %v2496_v13 }
 0x345   :  { %v2501_v20 = vsel %vm171_vm0, %v1953_v4, 0.0  ;;  %3627 = vmatmul.msk.f32.gmra.mxu3 %vm1097_vm1, %v1044_v16  ;;  %v1046_v16 = vmax.f32 %v841_v29, 0.0  ;;  %v2493_v4 = vadd.f32 %v2492_v51, %v2491_v23  ;;  %v5390_v23 = vld [vmem:[#allocation11_spill] sm:$0xff] }
 0x346   :  { %v2502_v41 = vrot.slane %v2501_v20, 4  ;;  %v2499_v44 = vrot.slane %v2498_v52, 1 }
 0x348   :  { %v2503_v57 = vadd.f32 %v2502_v41, %v2501_v20  ;;  %v1712_v59 = vpop.f32.mrf.mxu3  ;;  %v2500_v13 = vadd.f32 %v2499_v44, %v2498_v52  ;;  %v3107_v20 = vsel %vm3045_vm3, %v2479_v15, %v3106_v21 }
 0x349   :  { %v1713_v26 = vadd.f32 %v4967_v49, %v1712_v59  ;;  %v3108_v41 = vsel %vm3047_vm4, %v2486_v9, %v3107_v20  ;;  %v5393_v9 = vld [vmem:[#allocation14_spill] sm:$0xff] }
 0x34a   :  { %v2504_v45 = vrot.slane %v2503_v57, 2  ;;  %v3109_v28 = vsel %vm3049_vm5, %v2493_v4, %v3108_v41 }
 0x34b   :  { %v1954_v5 = vmax.f32 %v1713_v26, 0.0  ;;  %v3110_v59 = vsel %vm3051_vm6, %v2500_v13, %v3109_v28 }
 0x34c   :  { %v2505_v22 = vadd.f32 %v2504_v45, %v2503_v57 }
 0x34d   :  { %v2508_v10 = vsel %vm171_vm0, %v1954_v5, 0.0  ;;  %3628 = vmatmul.msk.f32.gmra.mxu3 %vm1097_vm1, %v1045_v39  ;;  %v1047_v39 = vmax.f32 %v844_v19, 0.0  ;;  %v847_v5 = vadd.f32 %v4825_v12, %v5390_v23 }
 0x34e   :  { %v2509_v50 = vrot.slane %v2508_v10, 4  ;;  %v2506_v54 = vrot.slane %v2505_v22, 1 }
 0x34f   :  { %v1048_v31 = vmax.f32 %v847_v5, 0.0 }
 0x350   :  { %v2510_v35 = vadd.f32 %v2509_v50, %v2508_v10  ;;  %v1715_v38 = vpop.f32.mrf.mxu3  ;;  %v2507_v58 = vadd.f32 %v2506_v54, %v2505_v22  ;;  %v5391_v22 = vld [vmem:[#allocation12_spill] sm:$0xff]  ;;  %v5392_v50 = vld [vmem:[#allocation13_spill] sm:$0xff] }
 0x351   :  { %v850_v10 = vadd.f32 %v4825_v12, %v5391_v22  ;;  %v853_v51 = vadd.f32 %v4825_v12, %v5392_v50  ;;  %v1716_v15 = vadd.f32 %v4967_v49, %v1715_v38 }
 0x352   :  { %v2511_v11 = vrot.slane %v2510_v35, 2  ;;  %v3111_v53 = vsel %vm3053_vm7, %v2507_v58, %v3110_v59  ;;  %v5394_v59 = vld [vmem:[#allocation15_spill] sm:$0xff] }
 0x353   :  { %v1049_v48 = vmax.f32 %v850_v10, 0.0  ;;  %v1050_v44 = vmax.f32 %v853_v51, 0.0  ;;  %v1955_v13 = vmax.f32 %v1716_v15, 0.0 }
 0x354   :  { %v2512_v8 = vadd.f32 %v2511_v11, %v2510_v35  ;;  %v856_v11 = vadd.f32 %v4825_v12, %v5393_v9 }
 0x355   :  { %3629 = vmatmul.msk.f32.gmra.mxu3 %vm1097_vm1, %v1046_v16  ;;  %v2515_v41 = vsel %vm171_vm0, %v1955_v13, 0.0 }
 0x356   :  { %v2513_v0 = vrot.slane %v2512_v8, 1  ;;  %v1051_v20 = vmax.f32 %v856_v11, 0.0 }
 0x358   :  { %v1718_v55 = vpop.f32.mrf.mxu3  ;;  %v3229_v34 = vpop.f32.mrf.mxu2  ;;  %v2514_v57 = vadd.f32 %v2513_v0, %v2512_v8 }
 0x359   :  { %v3230_v26 = vadd.f32 %v5008_v17, %v3229_v34  ;;  %v1719_v35 = vadd.f32 %v4967_v49, %v1718_v55 }
 0x35a   :  { %v3112_v33 = vsel %vm3055_vm8, %v2514_v57, %v3111_v53 }
 0x35b   :  { %v3265_v45 = vmax.f32 %v3230_v26, 0.0  ;;  %3676 = vmatmul.msk.f32.gmra.mxu2 %vm171_vm0, %v3112_v33  ;;  %v1956_v4 = vmax.f32 %v1719_v35, 0.0  ;;  %v2516_v33 = vrot.slane %v2515_v41, 4 }
 0x35d   :  { %3630 = vmatmul.msk.f32.gmra.mxu3 %vm1097_vm1, %v1047_v39  ;;  %v3285_v52 = vmul.f32 %v5020_v60, %v3265_v45  ;;  %v2522_v58 = vsel %vm171_vm0, %v1956_v4, 0.0  ;;  %v859_v39 = vadd.f32 %v4825_v12, %v5394_v59  ;;  %v2517_v10 = vadd.f32 %v2516_v33, %v2515_v41 }
 0x35e   :  { %v2523_v34 = vrot.slane %v2522_v58, 4 }
 0x35f   :  { %v3313_v2 = vsel %vm1097_vm1, %v3285_v52, 0.0 }
 0x360   :  { %v1721_v29 = vpop.f32.mrf.mxu3  ;;  %3314 = vadd.xlane.f32.xlu0 %v3313_v2  ;;  %v2524_v5 = vadd.f32 %v2523_v34, %v2522_v58 }
 0x361   :  { %v1722_v16 = vadd.f32 %v4967_v49, %v1721_v29  ;;  %v1052_v29 = vmax.f32 %v859_v39, 0.0 }
 0x362   :  { %v2525_v51 = vrot.slane %v2524_v5, 2 }
 0x363   :  { %v1957_v21 = vmax.f32 %v1722_v16, 0.0 }
 0x364   :  { %v2526_v4 = vadd.f32 %v2525_v51, %v2524_v5 }
 0x365   :  { %3631 = vmatmul.msk.f32.gmra.mxu3 %vm1097_vm1, %v1048_v31  ;;  %v2529_v0 = vsel %vm171_vm0, %v1957_v21, 0.0 }
 0x366   :  { %v2530_v26 = vrot.slane %v2529_v0, 4 }
 0x368   :  { %v1724_v62 = vpop.f32.mrf.mxu3  ;;  %v2531_v31 = vadd.f32 %v2530_v26, %v2529_v0 }
 0x369   :  { %v1725_v54 = vadd.f32 %v4967_v49, %v1724_v62 }
 0x36a   :  { %v2532_v16 = vrot.slane %v2531_v31, 2 }
 0x36b   :  { %v1958_v8 = vmax.f32 %v1725_v54, 0.0  ;;  %v2518_v54 = vrot.slane %v2517_v10, 2 }
 0x36d   :  { %3632 = vmatmul.msk.f32.gmra.mxu3 %vm1097_vm1, %v1049_v48  ;;  %v2536_v28 = vsel %vm171_vm0, %v1958_v8, 0.0  ;;  %v2519_v58 = vadd.f32 %v2518_v54, %v2517_v10 }
 0x36e   :  { %v2537_v45 = vrot.slane %v2536_v28, 4 }
 0x36f   :  { %v2520_v33 = vrot.slane %v2519_v58, 1 }
 0x370   :  { %v1727_v46 = vpop.f32.mrf.mxu3  ;;  %v2538_v62 = vadd.f32 %v2537_v45, %v2536_v28 }
 0x371   :  { %v1728_v6 = vadd.f32 %v4967_v49, %v1727_v46 }
 0x373   :  { %v1959_v42 = vmax.f32 %v1728_v6, 0.0  ;;  %v2539_v6 = vrot.slane %v2538_v62, 2 }
 0x375   :  { %3633 = vmatmul.msk.f32.gmra.mxu3 %vm1097_vm1, %v1050_v44  ;;  %v2543_v57 = vsel %vm171_vm0, %v1959_v42, 0.0  ;;  %v5395_v44 = vld [vmem:[#allocation16_spill] sm:$0xff] }
 0x376   :  { %v2544_v23 = vrot.slane %v2543_v57, 4  ;;  %v862_v35 = vadd.f32 %v4825_v12, %v5395_v44 }
 0x378   :  { %v1730_v19 = vpop.f32.mrf.mxu3  ;;  %v2545_v48 = vadd.f32 %v2544_v23, %v2543_v57  ;;  %v1053_v42 = vmax.f32 %v862_v35, 0.0  ;;  %v5396_v57 = vld [vmem:[#allocation17_spill] sm:$0xff] }
 0x379   :  { %v1731_v38 = vadd.f32 %v4967_v49, %v1730_v19  ;;  %v2533_v19 = vadd.f32 %v2532_v16, %v2531_v31  ;;  %v865_v59 = vadd.f32 %v4825_v12, %v5396_v57 }
 0x37a   :  { %v2546_v11 = vrot.slane %v2545_v48, 2 }
 0x37b   :  { %v1960_v55 = vmax.f32 %v1731_v38, 0.0  ;;  %v2540_v38 = vadd.f32 %v2539_v6, %v2538_v62  ;;  %v2534_v39 = vrot.slane %v2533_v19, 1 }
 0x37c   :  { %v2547_v41 = vadd.f32 %v2546_v11, %v2545_v48  ;;  %v2521_v48 = vadd.f32 %v2520_v33, %v2519_v58 }
 0x37d   :  { %v2550_v53 = vsel %vm171_vm0, %v1960_v55, 0.0  ;;  %3634 = vmatmul.msk.f32.gmra.mxu3 %vm1097_vm1, %v1051_v20  ;;  %v2527_v55 = vrot.slane %v2526_v4, 1  ;;  %v2541_v45 = vrot.slane %v2540_v38, 1  ;;  %v2535_v10 = vadd.f32 %v2534_v39, %v2533_v19 }
 0x37e   :  { %v2551_v52 = vrot.slane %v2550_v53, 4  ;;  %v2548_v5 = vrot.slane %v2547_v41, 1 }
 0x380   :  { %v1733_v2 = vpop.f32.mrf.mxu3  ;;  %v2552_v46 = vadd.f32 %v2551_v52, %v2550_v53  ;;  %v2528_v52 = vadd.f32 %v2527_v55, %v2526_v4 }
 0x381   :  { %v1734_v22 = vadd.f32 %v4967_v49, %v1733_v2 }
 0x382   :  { %v2553_v21 = vrot.slane %v2552_v46, 2  ;;  %v3113_v44 = vsel %vm3043_vm2, %v2528_v52, %v2521_v48 }
 0x383   :  { %v1961_v50 = vmax.f32 %v1734_v22, 0.0  ;;  %v1054_v22 = vmax.f32 %v865_v59, 0.0  ;;  %v3114_v6 = vsel %vm3045_vm3, %v2535_v10, %v3113_v44 }
 0x384   :  { %v2554_v34 = vadd.f32 %v2553_v21, %v2552_v46  ;;  %v2549_v46 = vadd.f32 %v2548_v5, %v2547_v41  ;;  %v5073_v41 = vld [vmem:[%s5353_s2] ss:$0 sm:$0xff] }
 0x385   :  { %v2557_v15 = vsel %vm171_vm0, %v1961_v50, 0.0  ;;  %3635 = vmatmul.msk.f32.gmra.mxu3 %vm1097_vm1, %v1052_v29  ;;  %v2542_v50 = vadd.f32 %v2541_v45, %v2540_v38 }
 0x386   :  { %v2558_v9 = vrot.slane %v2557_v15, 4  ;;  %v2555_v2 = vrot.slane %v2554_v34, 1 }
 0x387   :  { %v3115_v4 = vsel %vm3047_vm4, %v2542_v50, %v3114_v6  ;;  %v5401_v50 = vld [vmem:[#allocation22_spill] sm:$0xff] }
 0x388   :  { %v2559_v13 = vadd.f32 %v2558_v9, %v2557_v15  ;;  %v1736_v8 = vpop.f32.mrf.mxu3  ;;  %v2556_v35 = vadd.f32 %v2555_v2, %v2554_v34  ;;  %v5397_v15 = vld [vmem:[#allocation18_spill] sm:$0xff]  ;;  %v3116_v21 = vsel %vm3049_vm5, %v2549_v46, %v3115_v4 }
 0x389   :  { %v1737_v20 = vadd.f32 %v4967_v49, %v1736_v8  ;;  %v868_v54 = vadd.f32 %v4825_v12, %v5397_v15 }
 0x38a   :  { %v2560_v0 = vrot.slane %v2559_v13, 2  ;;  %v3117_v19 = vsel %vm3051_vm6, %v2556_v35, %v3116_v21 }
 0x38b   :  { %v1962_v28 = vmax.f32 %v1737_v20, 0.0  ;;  %v1055_v20 = vmax.f32 %v868_v54, 0.0 }
 0x38c   :  { %v2561_v26 = vadd.f32 %v2560_v0, %v2559_v13 }
 0x38d   :  { %v2564_v53 = vsel %vm171_vm0, %v1962_v28, 0.0  ;;  %3636 = vmatmul.msk.f32.gmra.mxu3 %vm1097_vm1, %v1053_v42  ;;  %v5398_v28 = vld [vmem:[#allocation19_spill] sm:$0xff] }
 0x38e   :  { %v2565_v23 = vrot.slane %v2564_v53, 4  ;;  %v2562_v62 = vrot.slane %v2561_v26, 1  ;;  %v871_v55 = vadd.f32 %v5073_v41, %v5398_v28 }
 0x390   :  { %v2566_v29 = vadd.f32 %v2565_v23, %v2564_v53  ;;  %v1739_v31 = vpop.f32.mrf.mxu3  ;;  %v2563_v9 = vadd.f32 %v2562_v62, %v2561_v26  ;;  %v1056_v39 = vmax.f32 %v871_v55, 0.0  ;;  %v5399_v26 = vld [vmem:[#allocation20_spill] sm:$0xff]  ;;  %v5400_v23 = vld [vmem:[#allocation21_spill] sm:$0xff] }
 0x391   :  { %v874_v53 = vadd.f32 %v5073_v41, %v5399_v26  ;;  %v877_v5 = vadd.f32 %v5073_v41, %v5400_v23  ;;  %v1740_v10 = vadd.f32 %v4967_v49, %v1739_v31 }
 0x392   :  { %v2567_v51 = vrot.slane %v2566_v29, 2  ;;  %v3118_v12 = vsel %vm3053_vm7, %v2563_v9, %v3117_v19  ;;  %v5402_v19 = vld [vmem:[#allocation23_spill] sm:$0xff] }
 0x393   :  { %v1057_v45 = vmax.f32 %v874_v53, 0.0  ;;  %v1058_v2 = vmax.f32 %v877_v5, 0.0  ;;  %v1963_v35 = vmax.f32 %v1740_v10, 0.0 }
 0x394   :  { %v2568_v16 = vadd.f32 %v2567_v51, %v2566_v29  ;;  %v880_v51 = vadd.f32 %v5073_v41, %v5401_v50 }
 0x395   :  { %3637 = vmatmul.msk.f32.gmra.mxu3 %vm1097_vm1, %v1054_v22  ;;  %v2571_v4 = vsel %vm171_vm0, %v1963_v35, 0.0 }
 0x396   :  { %v2569_v11 = vrot.slane %v2568_v16, 1  ;;  %v1059_v6 = vmax.f32 %v880_v51, 0.0 }
 0x398   :  { %v1742_v13 = vpop.f32.mrf.mxu3  ;;  %v3232_v8 = vpop.f32.mrf.mxu2  ;;  %v2570_v42 = vadd.f32 %v2569_v11, %v2568_v16 }
 0x399   :  { %v3233_v58 = vadd.f32 %v5008_v17, %v3232_v8  ;;  %v1743_v29 = vadd.f32 %v4967_v49, %v1742_v13 }
 0x39a   :  { %v3119_v38 = vsel %vm3055_vm8, %v2570_v42, %v3118_v12 }
 0x39b   :  { %v3266_v0 = vmax.f32 %v3233_v58, 0.0  ;;  %3677 = vmatmul.msk.f32.gmra.mxu2 %vm171_vm0, %v3119_v38  ;;  %v1964_v46 = vmax.f32 %v1743_v29, 0.0  ;;  %v2572_v38 = vrot.slane %v2571_v4, 4 }
 0x39d   :  { %3638 = vmatmul.msk.f32.gmra.mxu3 %vm1097_vm1, %v1055_v20  ;;  %v3286_v34 = vmul.f32 %v5020_v60, %v3266_v0  ;;  %v2578_v9 = vsel %vm171_vm0, %v1964_v46, 0.0  ;;  %v883_v20 = vadd.f32 %v5073_v41, %v5402_v19  ;;  %v2573_v53 = vadd.f32 %v2572_v38, %v2571_v4 }
 0x39e   :  { %v2579_v8 = vrot.slane %v2578_v9, 4 }
 0x39f   :  { %v3316_v57 = vsel %vm1097_vm1, %v3286_v34, 0.0  ;;  %v2574_v10 = vrot.slane %v2573_v53, 2 }
 0x3a0   :  { %v1745_v59 = vpop.f32.mrf.mxu3  ;;  %3317 = vadd.xlane.f32.xlu1 %v3316_v57  ;;  %v2580_v55 = vadd.f32 %v2579_v8, %v2578_v9 }
 0x3a1   :  { %v1746_v22 = vadd.f32 %v4967_v49, %v1745_v59  ;;  %v1060_v59 = vmax.f32 %v883_v20, 0.0 }
 0x3a2   :  { %v2581_v5 = vrot.slane %v2580_v55, 2 }
 0x3a3   :  { %v1965_v44 = vmax.f32 %v1746_v22, 0.0 }
 0x3a4   :  { %v2582_v51 = vadd.f32 %v2581_v5, %v2580_v55 }
 0x3a5   :  { %3639 = vmatmul.msk.f32.gmra.mxu3 %vm1097_vm1, %v1056_v39  ;;  %v2585_v11 = vsel %vm171_vm0, %v1965_v44, 0.0 }
 0x3a6   :  { %v2586_v58 = vrot.slane %v2585_v11, 4  ;;  %v2583_v4 = vrot.slane %v2582_v51, 1 }
 0x3a8   :  { %v1748_v33 = vpop.f32.mrf.mxu3  ;;  %v2587_v39 = vadd.f32 %v2586_v58, %v2585_v11 }
 0x3a9   :  { %v1749_v62 = vadd.f32 %v4967_v49, %v1748_v33 }
 0x3aa   :  { %v2588_v29 = vrot.slane %v2587_v39, 2 }
 0x3ab   :  { %v1966_v16 = vmax.f32 %v1749_v62, 0.0 }
 0x3ad   :  { %3640 = vmatmul.msk.f32.gmra.mxu3 %vm1097_vm1, %v1057_v45  ;;  %v2592_v21 = vsel %vm171_vm0, %v1966_v16, 0.0 }
 0x3ae   :  { %v2593_v0 = vrot.slane %v2592_v21, 4 }
 0x3b0   :  { %v1751_v52 = vpop.f32.mrf.mxu3  ;;  %v2594_v33 = vadd.f32 %v2593_v0, %v2592_v21  ;;  %v2584_v0 = vadd.f32 %v2583_v4, %v2582_v51 }
 0x3b1   :  { %v1752_v48 = vadd.f32 %v4967_v49, %v1751_v52 }
 0x3b2   :  { %v2595_v62 = vrot.slane %v2594_v33, 2 }
 0x3b3   :  { %v1967_v15 = vmax.f32 %v1752_v48, 0.0 }
 0x3b4   :  { %v2596_v9 = vadd.f32 %v2595_v62, %v2594_v33 }
 0x3b5   :  { %3641 = vmatmul.msk.f32.gmra.mxu3 %vm1097_vm1, %v1058_v2  ;;  %v2599_v42 = vsel %vm171_vm0, %v1967_v15, 0.0  ;;  %v886_v2 = vadd.f32 %v5073_v41, %v4499_v30  ;;  %v2589_v15 = vadd.f32 %v2588_v29, %v2587_v39 }
 0x3b6   :  { %v2600_v28 = vrot.slane %v2599_v42, 4  ;;  %v2597_v58 = vrot.slane %v2596_v9, 1 }
 0x3b7   :  { %v1061_v16 = vmax.f32 %v886_v2, 0.0  ;;  %v2590_v8 = vrot.slane %v2589_v15, 1 }
 0x3b8   :  { %v1754_v54 = vpop.f32.mrf.mxu3  ;;  %v2601_v45 = vadd.f32 %v2600_v28, %v2599_v42 }
 0x3b9   :  { %v1755_v31 = vadd.f32 %v4967_v49, %v1754_v54 }
 0x3ba   :  { %v2602_v50 = vrot.slane %v2601_v45, 2 }
 0x3bb   :  { %v1968_v13 = vmax.f32 %v1755_v31, 0.0 }
 0x3bc   :  { %v2603_v31 = vadd.f32 %v2602_v50, %v2601_v45 }
 0x3bd   :  { %v2606_v12 = vsel %vm171_vm0, %v1968_v13, 0.0  ;;  %3642 = vmatmul.msk.f32.gmra.mxu3 %vm1097_vm1, %v1059_v6  ;;  %v2575_v6 = vadd.f32 %v2574_v10, %v2573_v53  ;;  %v889_v13 = vadd.f32 %v5073_v41, %v4524_v25  ;;  %v2598_v53 = vadd.f32 %v2597_v58, %v2596_v9 }
 0x3be   :  { %v2607_v34 = vrot.slane %v2606_v12, 4  ;;  %v2604_v38 = vrot.slane %v2603_v31, 1 }
 0x3bf   :  { %v2576_v20 = vrot.slane %v2575_v6, 1 }
 0x3c0   :  { %v1757_v57 = vpop.f32.mrf.mxu3  ;;  %v2608_v52 = vadd.f32 %v2607_v34, %v2606_v12  ;;  %v2605_v33 = vadd.f32 %v2604_v38, %v2603_v31  ;;  %v898_v31 = vadd.f32 %v5073_v41, %v4573_v18 }
 0x3c1   :  { %v1758_v26 = vadd.f32 %v4967_v49, %v1757_v57  ;;  %v1062_v57 = vmax.f32 %v889_v13, 0.0 }
 0x3c2   :  { %v2609_v46 = vrot.slane %v2608_v52, 2 }
 0x3c3   :  { %v1969_v23 = vmax.f32 %v1758_v26, 0.0  ;;  %v2577_v26 = vadd.f32 %v2576_v20, %v2575_v6 }
 0x3c4   :  { %v2610_v21 = vadd.f32 %v2609_v46, %v2608_v52  ;;  %v892_v52 = vadd.f32 %v5073_v41, %v4547_v37  ;;  %v895_v37 = vadd.f32 %v5073_v41, %v4563_v3  ;;  %v1065_v3 = vmax.f32 %v898_v31, 0.0 }
 0x3c5   :  { %v2613_v22 = vsel %vm171_vm0, %v1969_v23, 0.0  ;;  %3643 = vmatmul.msk.f32.gmra.mxu3 %vm1097_vm1, %v1060_v59  ;;  %v2591_v59 = vadd.f32 %v2590_v8, %v2589_v15  ;;  %v3120_v45 = vsel %vm3043_vm2, %v2584_v0, %v2577_v26 }
 0x3c6   :  { %v2614_v48 = vrot.slane %v2613_v22, 4  ;;  %v2611_v28 = vrot.slane %v2610_v21, 1  ;;  %v1063_v46 = vmax.f32 %v892_v52, 0.0  ;;  %v1064_v6 = vmax.f32 %v895_v37, 0.0 }
 0x3c7   :  { %v3121_v2 = vsel %vm3045_vm3, %v2591_v59, %v3120_v45 }
 0x3c8   :  { %v2615_v44 = vadd.f32 %v2614_v48, %v2613_v22  ;;  %v1760_v35 = vpop.f32.mrf.mxu3  ;;  %v2612_v23 = vadd.f32 %v2611_v28, %v2610_v21  ;;  %v3122_v10 = vsel %vm3047_vm4, %v2598_v53, %v3121_v2  ;;  %v901_v21 = vadd.f32 %v5073_v41, %v4583_v56 }
 0x3c9   :  { %v1761_v54 = vadd.f32 %v4967_v49, %v1760_v35  ;;  %v3123_v62 = vsel %vm3049_vm5, %v2605_v33, %v3122_v10 }
 0x3ca   :  { %v2616_v30 = vrot.slane %v2615_v44, 2  ;;  %v3124_v51 = vsel %vm3051_vm6, %v2612_v23, %v3123_v62  ;;  %v1066_v8 = vmax.f32 %v901_v21, 0.0  ;;  %v907_v23 = vadd.f32 %v5073_v41, %v4606_v61 }
 0x3cb   :  { %v1970_v11 = vmax.f32 %v1761_v54, 0.0 }
 0x3cc   :  { %v2617_v42 = vadd.f32 %v2616_v30, %v2615_v44 }
 0x3cd   :  { %v2620_v19 = vsel %vm171_vm0, %v1970_v11, 0.0  ;;  %3644 = vmatmul.msk.f32.gmra.mxu3 %vm1097_vm1, %v1061_v16 }
 0x3ce   :  { %v2621_v12 = vrot.slane %v2620_v19, 4  ;;  %v2618_v39 = vrot.slane %v2617_v42, 1 }
 0x3d0   :  { %v2622_v55 = vadd.f32 %v2621_v12, %v2620_v19  ;;  %v1763_v34 = vpop.f32.mrf.mxu3  ;;  %v2619_v29 = vadd.f32 %v2618_v39, %v2617_v42  ;;  %v904_v12 = vadd.f32 %v5073_v41, %v4598_v32 }
 0x3d1   :  { %v1764_v18 = vadd.f32 %v4967_v49, %v1763_v34 }
 0x3d2   :  { %v2623_v25 = vrot.slane %v2622_v55, 2  ;;  %v3125_v44 = vsel %vm3053_vm7, %v2619_v29, %v3124_v51  ;;  %v1067_v59 = vmax.f32 %v904_v12, 0.0 }
 0x3d3   :  { %v1971_v0 = vmax.f32 %v1764_v18, 0.0 }
 0x3d4   :  { %v2624_v5 = vadd.f32 %v2623_v25, %v2622_v55 }
 0x3d5   :  { %3645 = vmatmul.msk.f32.gmra.mxu3 %vm1097_vm1, %v1062_v57  ;;  %v2627_v53 = vsel %vm171_vm0, %v1971_v0, 0.0 }
 0x3d6   :  { %v2625_v22 = vrot.slane %v2624_v5, 1  ;;  %v2628_v2 = vrot.slane %v2627_v53, 4 }
 0x3d8   :  { %v1766_v48 = vpop.f32.mrf.mxu3  ;;  %v2626_v50 = vadd.f32 %v2625_v22, %v2624_v5 }
 0x3d9   :  { %v1767_v42 = vadd.f32 %v4967_v49, %v1766_v48 }
 0x3da   :  { %v3126_v35 = vsel %vm3055_vm8, %v2626_v50, %v3125_v44  ;;  %v1068_v50 = vmax.f32 %v907_v23, 0.0  ;;  %v2629_v44 = vadd.f32 %v2628_v2, %v2627_v53 }
 0x3db   :  { %3678 = vmatmul.msk.f32.gmra.mxu2 %vm171_vm0, %v3126_v35  ;;  %v1972_v38 = vmax.f32 %v1767_v42, 0.0 }
 0x3dd   :  { %3646 = vmatmul.msk.f32.gmra.mxu3 %vm1097_vm1, %v1063_v46  ;;  %v2634_v39 = vsel %vm171_vm0, %v1972_v38, 0.0 }
 0x3de   :  { %v3235_v16 = vpop.f32.mrf.mxu2  ;;  %v2635_v33 = vrot.slane %v2634_v39, 4 }
 0x3df   :  { %v3236_v15 = vadd.f32 %v5008_v17, %v3235_v16 }
 0x3e0   :  { %v1769_v54 = vpop.f32.mrf.mxu3  ;;  %v2636_v10 = vadd.f32 %v2635_v33, %v2634_v39 }
 0x3e1   :  { %v3267_v9 = vmax.f32 %v3236_v15, 0.0  ;;  %v1770_v19 = vadd.f32 %v4967_v49, %v1769_v54  ;;  %v910_v54 = vadd.f32 %v5073_v41, %v4614_v14 }
 0x3e2   :  { %v2637_v61 = vrot.slane %v2636_v10, 2 }
 0x3e3   :  { %v3287_v30 = vmul.f32 %v5020_v60, %v3267_v9  ;;  %v1973_v56 = vmax.f32 %v1770_v19, 0.0  ;;  %v1069_v42 = vmax.f32 %v910_v54, 0.0 }
 0x3e5   :  { %3647 = vmatmul.msk.f32.gmra.mxu3 %vm1097_vm1, %v1064_v6  ;;  %v3319_v11 = vsel %vm1097_vm1, %v3287_v30, 0.0  ;;  %v2641_v26 = vsel %vm171_vm0, %v1973_v56, 0.0  ;;  %v2630_v30 = vrot.slane %v2629_v44, 2 }
 0x3e6   :  { %3320 = vadd.xlane.f32.xlu2 %v3319_v11  ;;  %v2642_v5 = vrot.slane %v2641_v26, 4 }
 0x3e8   :  { %v1772_v4 = vpop.f32.mrf.mxu3  ;;  %v2643_v51 = vadd.f32 %v2642_v5, %v2641_v26 }
 0x3e9   :  { %v1773_v20 = vadd.f32 %v4967_v49, %v1772_v4 }
 0x3ea   :  { %v2644_v6 = vrot.slane %v2643_v51, 2 }
 0x3eb   :  { %v1974_v28 = vmax.f32 %v1773_v20, 0.0  ;;  %v2631_v20 = vadd.f32 %v2630_v30, %v2629_v44 }
 0x3ec   :  { %v2645_v19 = vadd.f32 %v2644_v6, %v2643_v51 }
 0x3ed   :  { %3648 = vmatmul.msk.f32.gmra.mxu3 %vm1097_vm1, %v1065_v3  ;;  %v2648_v25 = vsel %vm171_vm0, %v1974_v28, 0.0  ;;  %v2638_v3 = vadd.f32 %v2637_v61, %v2636_v10  ;;  %v913_v28 = vadd.f32 %v5073_v41, %v4627_v27  ;;  %v2632_v39 = vrot.slane %v2631_v20, 1 }
 0x3ee   :  { %v2649_v29 = vrot.slane %v2648_v25, 4 }
 0x3ef   :  { %v2639_v56 = vrot.slane %v2638_v3, 1  ;;  %v1070_v23 = vmax.f32 %v913_v28, 0.0  ;;  %v2633_v2 = vadd.f32 %v2632_v39, %v2631_v20 }
 0x3f0   :  { %v1775_v13 = vpop.f32.mrf.mxu3  ;;  %v2650_v35 = vadd.f32 %v2649_v29, %v2648_v25 }
 0x3f1   :  { %v1776_v58 = vadd.f32 %v4967_v49, %v1775_v13  ;;  %v2640_v25 = vadd.f32 %v2639_v56, %v2638_v3 }
 0x3f2   :  { %v2651_v31 = vrot.slane %v2650_v35, 2 }
 0x3f3   :  { %v1975_v55 = vmax.f32 %v1776_v58, 0.0  ;;  %v3127_v10 = vsel %vm3043_vm2, %v2640_v25, %v2633_v2 }
 0x3f4   :  { %v2652_v58 = vadd.f32 %v2651_v31, %v2650_v35 }
 0x3f5   :  { %3649 = vmatmul.msk.f32.gmra.mxu3 %vm1097_vm1, %v1066_v8  ;;  %v2655_v45 = vsel %vm171_vm0, %v1975_v55, 0.0  ;;  %v2646_v55 = vrot.slane %v2645_v19, 1 }
 0x3f6   :  { %v2656_v22 = vrot.slane %v2655_v45, 4 }
 0x3f7   :  { %v2647_v5 = vadd.f32 %v2646_v55, %v2645_v19  ;;  %v5405_v55 = vld [vmem:[#allocation26_spill] sm:$0xff] }
 0x3f8   :  { %v1778_v57 = vpop.f32.mrf.mxu3  ;;  %v2657_v37 = vadd.f32 %v2656_v22, %v2655_v45 }
 0x3f9   :  { %v1779_v34 = vadd.f32 %v4967_v49, %v1778_v57  ;;  %v3128_v51 = vsel %vm3045_vm3, %v2647_v5, %v3127_v10 }
 0x3fa   :  { %v2658_v4 = vrot.slane %v2657_v37, 2 }
 0x3fb   :  { %v1976_v32 = vmax.f32 %v1779_v34, 0.0  ;;  %v2653_v34 = vrot.slane %v2652_v58, 1 }
 0x3fc   :  { %v2659_v12 = vadd.f32 %v2658_v4, %v2657_v37 }
 0x3fd   :  { %v2662_v52 = vsel %vm171_vm0, %v1976_v32, 0.0  ;;  %3650 = vmatmul.msk.f32.gmra.mxu3 %vm1097_vm1, %v1067_v59  ;;  %v2654_v29 = vadd.f32 %v2653_v34, %v2652_v58 }
 0x3fe   :  { %v2663_v62 = vrot.slane %v2662_v52, 4  ;;  %v2660_v53 = vrot.slane %v2659_v12, 1 }
 0x3ff   :  { %v3129_v35 = vsel %vm3047_vm4, %v2654_v29, %v3128_v51 }
 0x400   :  { %v1781_v48 = vpop.f32.mrf.mxu3  ;;  %v2664_v15 = vadd.f32 %v2663_v62, %v2662_v52  ;;  %v2661_v22 = vadd.f32 %v2660_v53, %v2659_v12 }
 0x401   :  { %v1782_v46 = vadd.f32 %v4967_v49, %v1781_v48 }
 0x402   :  { %v2665_v21 = vrot.slane %v2664_v15, 2  ;;  %v3130_v37 = vsel %vm3049_vm5, %v2661_v22, %v3129_v35  ;;  %v5406_v22 = vld [vmem:[#allocation27_spill] sm:$0xff] }
 0x403   :  { %v1977_v16 = vmax.f32 %v1782_v46, 0.0  ;;  %v931_v10 = vadd.f32 %v5073_v41, %v5406_v22 }
 0x404   :  { %v2666_v0 = vadd.f32 %v2665_v21, %v2664_v15 }
 0x405   :  { %v2669_v9 = vsel %vm171_vm0, %v1977_v16, 0.0  ;;  %3651 = vmatmul.msk.f32.gmra.mxu3 %vm1097_vm1, %v1068_v50  ;;  %v916_v50 = vadd.f32 %v5073_v41, %v4641_v36  ;;  %v919_v36 = vadd.f32 %v5073_v41, %v4651_v47 }
 0x406   :  { %v2670_v11 = vrot.slane %v2669_v9, 4  ;;  %v2667_v32 = vrot.slane %v2666_v0, 1 }
 0x407   :  { %v1071_v54 = vmax.f32 %v916_v50, 0.0  ;;  %v1072_v4 = vmax.f32 %v919_v36, 0.0 }
 0x408   :  { %v2671_v13 = vadd.f32 %v2670_v11, %v2669_v9  ;;  %v1784_v8 = vpop.f32.mrf.mxu3  ;;  %v2668_v62 = vadd.f32 %v2667_v32, %v2666_v0 }
 0x409   :  { %v1785_v18 = vadd.f32 %v4967_v49, %v1784_v8 }
 0x40a   :  { %v2672_v14 = vrot.slane %v2671_v13, 2  ;;  %v3131_v15 = vsel %vm3051_vm6, %v2668_v62, %v3130_v37 }
 0x40b   :  { %v1978_v38 = vmax.f32 %v1785_v18, 0.0  ;;  %v5404_v18 = vld [vmem:[#allocation25_spill] sm:$0xff] }
 0x40c   :  { %v2673_v57 = vadd.f32 %v2672_v14, %v2671_v13  ;;  %v5403_v13 = vld [vmem:[#allocation24_spill] sm:$0xff]  ;;  %v925_v20 = vadd.f32 %v5073_v41, %v5404_v18 }
 0x40d   :  { %v2676_v59 = vsel %vm171_vm0, %v1978_v38, 0.0  ;;  %3652 = vmatmul.msk.f32.gmra.mxu3 %vm1097_vm1, %v1069_v42  ;;  %v922_v8 = vadd.f32 %v5073_v41, %v5403_v13 }
 0x40e   :  { %v2677_v26 = vrot.slane %v2676_v59, 4  ;;  %v2674_v52 = vrot.slane %v2673_v57, 1  ;;  %v1074_v14 = vmax.f32 %v925_v20, 0.0 }
 0x40f   :  { %v1073_v47 = vmax.f32 %v922_v8, 0.0 }
 0x410   :  { %v2678_v33 = vadd.f32 %v2677_v26, %v2676_v59  ;;  %v1787_v45 = vpop.f32.mrf.mxu3  ;;  %v2675_v46 = vadd.f32 %v2674_v52, %v2673_v57  ;;  %v928_v57 = vadd.f32 %v5073_v41, %v5405_v55 }
 0x411   :  { %v1788_v56 = vadd.f32 %v4967_v49, %v1787_v45 }
 0x412   :  { %v2679_v27 = vrot.slane %v2678_v33, 2  ;;  %v3132_v6 = vsel %vm3053_vm7, %v2675_v46, %v3131_v15  ;;  %v1075_v32 = vmax.f32 %v928_v57, 0.0 }
 0x413   :  { %v1979_v34 = vmax.f32 %v1788_v56, 0.0 }
 0x414   :  { %v2680_v48 = vadd.f32 %v2679_v27, %v2678_v33 }
 0x415   :  { %3653 = vmatmul.msk.f32.gmra.mxu3 %vm1097_vm1, %v1070_v23  ;;  %v2683_v5 = vsel %vm171_vm0, %v1979_v34, 0.0  ;;  %v5408_v34 = vld [vmem:[#allocation29_spill] sm:$0xff] }
 0x416   :  { %v2681_v44 = vrot.slane %v2680_v48, 1  ;;  %v2684_v50 = vrot.slane %v2683_v5, 4 }
 0x418   :  { %v1790_v16 = vpop.f32.mrf.mxu3  ;;  %v2682_v61 = vadd.f32 %v2681_v44, %v2680_v48 }
 0x419   :  { %v1791_v12 = vadd.f32 %v4967_v49, %v1790_v16  ;;  %v1076_v16 = vmax.f32 %v931_v10, 0.0 }
 0x41a   :  { %v3133_v9 = vsel %vm3055_vm8, %v2682_v61, %v3132_v6 }
 0x41b   :  { %3679 = vmatmul.msk.f32.gmra.mxu2 %vm171_vm0, %v3133_v9  ;;  %v1980_v59 = vmax.f32 %v1791_v12, 0.0  ;;  %v5214_v12 = vld [vmem:[%s5355_s4] ss:$0 sm:$0xff] }
 0x41d   :  { %3654 = vmatmul.msk.f32.gmra.mxu3 %vm1097_vm1, %v1071_v54  ;;  %v2690_v33 = vsel %vm171_vm0, %v1980_v59, 0.0  ;;  %v2685_v54 = vadd.f32 %v2684_v50, %v2683_v5 }
 0x41e   :  { %v3238_v30 = vpop.f32.mrf.mxu2  ;;  %v2691_v29 = vrot.slane %v2690_v33, 4 }
 0x41f   :  { %v3239_v31 = vadd.f32 %v5008_v17, %v3238_v30  ;;  %v2686_v13 = vrot.slane %v2685_v54, 2 }
 0x420   :  { %v1793_v11 = vpop.f32.mrf.mxu3  ;;  %v2692_v44 = vadd.f32 %v2691_v29, %v2690_v33 }
 0x421   :  { %v3268_v3 = vmax.f32 %v3239_v31, 0.0  ;;  %v1794_v38 = vadd.f32 %v4967_v49, %v1793_v11  ;;  %v5407_v11 = vld [vmem:[#allocation28_spill] sm:$0xff]  ;;  %v2687_v56 = vadd.f32 %v2686_v13, %v2685_v54  ;;  %v943_v13 = vadd.f32 %v5073_v41, %v4922_v1 }
 0x422   :  { %v2693_v30 = vrot.slane %v2692_v44, 2  ;;  %v949_v1 = vadd.f32 %v5073_v41, %v4940_v24 }
 0x423   :  { %v3288_v21 = vmul.f32 %v5020_v60, %v3268_v3  ;;  %v1981_v39 = vmax.f32 %v1794_v38, 0.0  ;;  %v2688_v33 = vrot.slane %v2687_v56, 1 }
 0x425   :  { %3655 = vmatmul.msk.f32.gmra.mxu3 %vm1097_vm1, %v1072_v4  ;;  %v3322_v42 = vsel %vm1097_vm1, %v3288_v21, 0.0  ;;  %v2697_v23 = vsel %vm171_vm0, %v1981_v39, 0.0  ;;  %v934_v4 = vadd.f32 %v5073_v41, %v5407_v11 }
 0x426   :  { %3323 = vadd.xlane.f32.xlu0 %v3322_v42  ;;  %v2698_v62 = vrot.slane %v2697_v23, 4 }
 0x428   :  { %v1796_v19 = vpop.f32.mrf.mxu3  ;;  %v2699_v61 = vadd.f32 %v2698_v62, %v2697_v23 }
 0x429   :  { %v1797_v0 = vadd.f32 %v4967_v49, %v1796_v19 }
 0x42a   :  { %v2700_v3 = vrot.slane %v2699_v61, 2 }
 0x42b   :  { %v1982_v26 = vmax.f32 %v1797_v0, 0.0 }
 0x42d   :  { %3656 = vmatmul.msk.f32.gmra.mxu3 %vm1097_vm1, %v1073_v47  ;;  %v2704_v52 = vsel %vm171_vm0, %v1982_v26, 0.0  ;;  %v2694_v47 = vadd.f32 %v2693_v30, %v2692_v44  ;;  %v937_v26 = vadd.f32 %v5073_v41, %v5408_v34 }
 0x42e   :  { %v2705_v51 = vrot.slane %v2704_v52, 4 }
 0x42f   :  { %v2695_v59 = vrot.slane %v2694_v47, 1  ;;  %v1078_v22 = vmax.f32 %v937_v26, 0.0 }
 0x430   :  { %v1799_v58 = vpop.f32.mrf.mxu3  ;;  %v2706_v6 = vadd.f32 %v2705_v51, %v2704_v52 }
 0x431   :  { %v1800_v28 = vadd.f32 %v4967_v49, %v1799_v58  ;;  %v1077_v58 = vmax.f32 %v934_v4, 0.0  ;;  %v2696_v52 = vadd.f32 %v2695_v59, %v2694_v47 }
 0x432   :  { %v2707_v8 = vrot.slane %v2706_v6, 2 }
 0x433   :  { %v1983_v53 = vmax.f32 %v1800_v28, 0.0 }
 0x434   :  { %v2708_v0 = vadd.f32 %v2707_v8, %v2706_v6  ;;  %v940_v6 = vadd.f32 %v5073_v41, %v4909_v7 }
 0x435   :  { %3657 = vmatmul.msk.f32.gmra.mxu3 %vm1097_vm1, %v1074_v14  ;;  %v2711_v27 = vsel %vm171_vm0, %v1983_v53, 0.0  ;;  %v2701_v14 = vadd.f32 %v2700_v3, %v2699_v61 }
 0x436   :  { %v2712_v46 = vrot.slane %v2711_v27, 4  ;;  %v1079_v3 = vmax.f32 %v940_v6, 0.0 }
 0x437   :  { %v2702_v53 = vrot.slane %v2701_v14, 1 }
 0x438   :  { %v1802_v25 = vpop.f32.mrf.mxu3  ;;  %v2713_v9 = vadd.f32 %v2712_v46, %v2711_v27 }
 0x439   :  { %v1803_v45 = vadd.f32 %v4967_v49, %v1802_v25  ;;  %v2703_v10 = vadd.f32 %v2702_v53, %v2701_v14 }
 0x43a   :  { %v2714_v19 = vrot.slane %v2713_v9, 2 }
 0x43b   :  { %v1984_v2 = vmax.f32 %v1803_v45, 0.0  ;;  %v2709_v45 = vrot.slane %v2708_v0, 1 }
 0x43c   :  { %v2715_v55 = vadd.f32 %v2714_v19, %v2713_v9  ;;  %v1080_v19 = vmax.f32 %v943_v13, 0.0 }
 0x43d   :  { %v2718_v48 = vsel %vm171_vm0, %v1984_v2, 0.0  ;;  %3658 = vmatmul.msk.f32.gmra.mxu3 %vm1097_vm1, %v1075_v32  ;;  %v2710_v50 = vadd.f32 %v2709_v45, %v2708_v0 }
 0x43e   :  { %v2719_v35 = vrot.slane %v2718_v48, 4  ;;  %v2716_v5 = vrot.slane %v2715_v55, 1 }
 0x440   :  { %v1805_v37 = vpop.f32.mrf.mxu3  ;;  %v2720_v31 = vadd.f32 %v2719_v35, %v2718_v48  ;;  %v2689_v48 = vadd.f32 %v2688_v33, %v2687_v56  ;;  %v2717_v46 = vadd.f32 %v2716_v5, %v2715_v55 }
 0x441   :  { %v1806_v15 = vadd.f32 %v4967_v49, %v1805_v37 }
 0x442   :  { %v2721_v49 = vrot.slane %v2720_v31, 2  ;;  %v3134_v44 = vsel %vm3043_vm2, %v2696_v52, %v2689_v48 }
 0x443   :  { %v1985_v36 = vmax.f32 %v1806_v15, 0.0 }
 0x444   :  { %v2722_v39 = vadd.f32 %v2721_v49, %v2720_v31 }
 0x445   :  { %v2725_v21 = vsel %vm171_vm0, %v1985_v36, 0.0  ;;  %3659 = vmatmul.msk.f32.gmra.mxu3 %vm1097_vm1, %v1076_v16  ;;  %v3135_v16 = vsel %vm3045_vm3, %v2703_v10, %v3134_v44 }
 0x446   :  { %v2726_v42 = vrot.slane %v2725_v21, 4  ;;  %v2723_v2 = vrot.slane %v2722_v39, 1  ;;  %v3136_v54 = vsel %vm3047_vm4, %v2710_v50, %v3135_v16 }
 0x447   :  { %v3137_v9 = vsel %vm3049_vm5, %v2717_v46, %v3136_v54 }
 0x448   :  { %v2727_v18 = vadd.f32 %v2726_v42, %v2725_v21  ;;  %v1808_v20 = vpop.f32.mrf.mxu3  ;;  %v2724_v35 = vadd.f32 %v2723_v2, %v2722_v39 }
 0x449   :  { %v1809_v38 = vadd.f32 %v5214_v12, %v1808_v20 }
 0x44a   :  { %v2728_v28 = vrot.slane %v2727_v18, 2  ;;  %v3138_v31 = vsel %vm3051_vm6, %v2724_v35, %v3137_v9 }
 0x44b   :  { %v1986_v57 = vmax.f32 %v1809_v38, 0.0  ;;  %v1082_v38 = vmax.f32 %v949_v1, 0.0 }
 0x44c   :  { %v2729_v25 = vadd.f32 %v2728_v28, %v2727_v18  ;;  %v946_v18 = vadd.f32 %v5073_v41, %v4930_v40 }
 0x44d   :  { %v2732_v32 = vsel %vm171_vm0, %v1986_v57, 0.0  ;;  %3660 = vmatmul.msk.f32.gmra.mxu3 %vm1097_vm1, %v1077_v58  ;;  %v952_v57 = vadd.f32 %v5073_v41, %v4949_v63 }
 0x44e   :  { %v2733_v23 = vrot.slane %v2732_v32, 4  ;;  %v2730_v62 = vrot.slane %v2729_v25, 1  ;;  %v1081_v58 = vmax.f32 %v946_v18, 0.0 }
 0x450   :  { %v2734_v29 = vadd.f32 %v2733_v23, %v2732_v32  ;;  %v1811_v27 = vpop.f32.mrf.mxu3  ;;  %v2731_v61 = vadd.f32 %v2730_v62, %v2729_v25  ;;  %v1083_v32 = vmax.f32 %v952_v57, 0.0 }
 0x451   :  { %v1812_v56 = vadd.f32 %v5214_v12, %v1811_v27 }
 0x452   :  { %v2735_v51 = vrot.slane %v2734_v29, 2  ;;  %v3139_v11 = vsel %vm3053_vm7, %v2731_v61, %v3138_v31 }
 0x453   :  { %v1987_v24 = vmax.f32 %v1812_v56, 0.0 }
 0x454   :  { %v2736_v37 = vadd.f32 %v2735_v51, %v2734_v29 }
 0x455   :  { %3661 = vmatmul.msk.f32.gmra.mxu3 %vm1097_vm1, %v1078_v22  ;;  %v2739_v33 = vsel %vm171_vm0, %v1987_v24, 0.0  ;;  %v955_v22 = vadd.f32 %v5073_v41, %v4959_v43 }
 0x456   :  { %v2737_v15 = vrot.slane %v2736_v37, 1  ;;  %v2740_v29 = vrot.slane %v2739_v33, 4 }
 0x458   :  { %v1814_v36 = vpop.f32.mrf.mxu3  ;;  %v2738_v30 = vadd.f32 %v2737_v15, %v2736_v37  ;;  %v2741_v44 = vadd.f32 %v2740_v29, %v2739_v33  ;;  %v1084_v37 = vmax.f32 %v955_v22, 0.0 }
 0x459   :  { %v1815_v14 = vadd.f32 %v5214_v12, %v1814_v36 }
 0x45a   :  { %v3140_v4 = vsel %vm3055_vm8, %v2738_v30, %v3139_v11  ;;  %v2742_v43 = vrot.slane %v2741_v44, 2 }
 0x45b   :  { %3680 = vmatmul.msk.f32.gmra.mxu2 %vm171_vm0, %v3140_v4  ;;  %v1988_v40 = vmax.f32 %v1815_v14, 0.0 }
 0x45d   :  { %3662 = vmatmul.msk.f32.gmra.mxu3 %vm1097_vm1, %v1079_v3  ;;  %v2746_v26 = vsel %vm171_vm0, %v1988_v40, 0.0 }
 0x45e   :  { %v3241_v21 = vpop.f32.mrf.mxu2  ;;  %v2747_v5 = vrot.slane %v2746_v26, 4 }
 0x45f   :  { %v3242_v7 = vadd.f32 %v5008_v17, %v3241_v21 }
 0x460   :  { %v1817_v8 = vpop.f32.mrf.mxu3  ;;  %v2748_v62 = vadd.f32 %v2747_v5, %v2746_v26 }
 0x461   :  { %v3269_v42 = vmax.f32 %v3242_v7, 0.0  ;;  %v2743_v7 = vadd.f32 %v2742_v43, %v2741_v44 }
 0x462   :  { %v2749_v15 = vrot.slane %v2748_v62, 2 }
 0x463   :  { %v3289_v47 = vmul.f32 %v5020_v60, %v3269_v42  ;;  %v1818_v60 = vadd.f32 %v5214_v12, %v1817_v8 }
 0x464   :  { %v2750_v31 = vadd.f32 %v2749_v15, %v2748_v62 }
 0x465   :  { %3663 = vmatmul.msk.f32.gmra.mxu3 %vm1097_vm1, %v1080_v19  ;;  %v3325_v49 = vsel %vm1097_vm1, %v3289_v47, 0.0  ;;  %v1989_v55 = vmax.f32 %v1818_v60, 0.0 }
 0x466   :  { %3326 = vadd.xlane.f32.xlu1 %v3325_v49  ;;  %v2751_v49 = vrot.slane %v2750_v31, 1 }
 0x467   :  { %v2753_v25 = vsel %vm171_vm0, %v1989_v55, 0.0 }
 0x468   :  { %v1820_v20 = vpop.f32.mrf.mxu3  ;;  %v2754_v63 = vrot.slane %v2753_v25, 4  ;;  %v2752_v56 = vadd.f32 %v2751_v49, %v2750_v31 }
 0x469   :  { %v1821_v0 = vadd.f32 %v5214_v12, %v1820_v20 }
 0x46a   :  { %v2755_v51 = vadd.f32 %v2754_v63, %v2753_v25 }
 0x46b   :  { %v1990_v59 = vmax.f32 %v1821_v0, 0.0 }
 0x46c   :  { %v2756_v6 = vrot.slane %v2755_v51, 2 }
 0x46d   :  { %3664 = vmatmul.msk.f32.gmra.mxu3 %vm1097_vm1, %v1081_v58  ;;  %v2760_v45 = vsel %vm171_vm0, %v1990_v59, 0.0 }
 0x46e   :  { %v2761_v27 = vrot.slane %v2760_v45, 4  ;;  %v2757_v21 = vadd.f32 %v2756_v6, %v2755_v51  ;;  %v5284_v51 = vld [vmem:[%s5358_s7] ss:$0 sm:$0xff] }
 0x470   :  { %v1823_v17 = vpop.f32.mrf.mxu3  ;;  %v2762_v35 = vadd.f32 %v2761_v27, %v2760_v45  ;;  %v2758_v20 = vrot.slane %v2757_v21, 1 }
 0x471   :  { %v1824_v28 = vadd.f32 %v5214_v12, %v1823_v17  ;;  %v2744_v17 = vrot.slane %v2743_v7, 1 }
 0x472   :  { %v2763_v41 = vrot.slane %v2762_v35, 2  ;;  %v2759_v55 = vadd.f32 %v2758_v20, %v2757_v21 }
 0x473   :  { %v1991_v39 = vmax.f32 %v1824_v28, 0.0  ;;  %v2745_v24 = vadd.f32 %v2744_v17, %v2743_v7 }
 0x474   :  { %v2764_v8 = vadd.f32 %v2763_v41, %v2762_v35 }
 0x475   :  { %3665 = vmatmul.msk.f32.gmra.mxu3 %vm1097_vm1, %v1082_v38  ;;  %v2767_v52 = vsel %vm171_vm0, %v1991_v39, 0.0  ;;  %v3141_v26 = vsel %vm3043_vm2, %v2752_v56, %v2745_v24 }
 0x476   :  { %v2768_v10 = vrot.slane %v2767_v52, 4  ;;  %v2765_v14 = vrot.slane %v2764_v8, 1 }
 0x478   :  { %v1826_v34 = vpop.f32.mrf.mxu3  ;;  %v2769_v16 = vadd.f32 %v2768_v10, %v2767_v52  ;;  %v2766_v59 = vadd.f32 %v2765_v14, %v2764_v8  ;;  %v5278_v10 = vld [vmem:[%s5357_s6] ss:$0 sm:$0xff]  ;;  %s3742_s6 = smov [#allocation3]  }
 0x479   :  { %v1827_v53 = vadd.f32 %v5214_v12, %v1826_v34  ;;  %s3401_s7 = sshll.u32 %s3742_s6, 4  ;;  %s3402_s7 = int_to_ptr.vmem [resolvable:$true] %s3401_s7 }
 0x47a   :  { %v2770_v30 = vrot.slane %v2769_v16, 2 }
 0x47b   :  { %v1992_v23 = vmax.f32 %v1827_v53, 0.0 }
 0x47c   :  { %v2771_v19 = vadd.f32 %v2770_v30, %v2769_v16 }
 0x47d   :  { %v2774_v2 = vsel %vm171_vm0, %v1992_v23, 0.0  ;;  %3666 = vmatmul.msk.f32.gmra.mxu3 %vm1097_vm1, %v1083_v32  ;;  %v3142_v32 = vsel %vm3045_vm3, %v2759_v55, %v3141_v26 }
 0x47e   :  { %v2775_v48 = vrot.slane %v2774_v2, 4  ;;  %v2772_v38 = vrot.slane %v2771_v19, 1  ;;  %v3143_v23 = vsel %vm3047_vm4, %v2766_v59, %v3142_v32 }
 0x480   :  { %v1829_v50 = vpop.f32.mrf.mxu3  ;;  %v2776_v54 = vadd.f32 %v2775_v48, %v2774_v2  ;;  %v2773_v34 = vadd.f32 %v2772_v38, %v2771_v19 }
 0x481   :  { %v1830_v46 = vadd.f32 %v5214_v12, %v1829_v50 }
 0x482   :  { %v2777_v11 = vrot.slane %v2776_v54, 2  ;;  %v3144_v5 = vsel %vm3049_vm5, %v2773_v34, %v3143_v23 }
 0x483   :  { %v1993_v61 = vmax.f32 %v1830_v46, 0.0 }
 0x484   :  { %v2778_v18 = vadd.f32 %v2777_v11, %v2776_v54 }
 0x485   :  { %v2781_v9 = vsel %vm171_vm0, %v1993_v61, 0.0  ;;  %3667 = vmatmul.msk.f32.gmra.mxu3 %vm1097_vm1, %v1084_v37 }
 0x486   :  { %v2782_v36 = vrot.slane %v2781_v9, 4  ;;  %v2779_v0 = vrot.slane %v2778_v18, 1 }
 0x488   :  { %v2783_v4 = vadd.f32 %v2782_v36, %v2781_v9  ;;  %v1832_v3 = vpop.f32.mrf.mxu3  ;;  %v2780_v53 = vadd.f32 %v2779_v0, %v2778_v18 }
 0x489   :  { %v1833_v13 = vadd.f32 %v5214_v12, %v1832_v3 }
 0x48a   :  { %v2784_v42 = vrot.slane %v2783_v4, 2  ;;  %v3145_v2 = vsel %vm3051_vm6, %v2780_v53, %v3144_v5 }
 0x48b   :  { %v1994_v47 = vmax.f32 %v1833_v13, 0.0 }
 0x48c   :  { %v2785_v58 = vadd.f32 %v2784_v42, %v2783_v4 }
 0x48d   :  { %v2788_v1 = vsel %vm171_vm0, %v1994_v47, 0.0 }
 0x48e   :  { %v2789_v60 = vrot.slane %v2788_v1, 4  ;;  %v2786_v57 = vrot.slane %v2785_v58, 1 }
 0x490   :  { %v2790_v28 = vadd.f32 %v2789_v60, %v2788_v1  ;;  %v1835_v40 = vpop.f32.mrf.mxu3  ;;  %v2787_v33 = vadd.f32 %v2786_v57, %v2785_v58 }
 0x491   :  { %v1836_v15 = vadd.f32 %v5214_v12, %v1835_v40 }
 0x492   :  { %v2791_v39 = vrot.slane %v2790_v28, 2  ;;  %v3146_v29 = vsel %vm3053_vm7, %v2787_v33, %v3145_v2 }
 0x493   :  { %v1995_v41 = vmax.f32 %v1836_v15, 0.0 }
 0x494   :  { %v2792_v25 = vadd.f32 %v2791_v39, %v2790_v28 }
 0x495   :  { %v2795_v21 = vsel %vm171_vm0, %v1995_v41, 0.0 }
 0x496   :  { %v2793_v45 = vrot.slane %v2792_v25, 1  ;;  %v2796_v49 = vrot.slane %v2795_v21, 4 }
 0x498   :  { %v1838_v52 = vpop.f32.mrf.mxu3  ;;  %v2794_v63 = vadd.f32 %v2793_v45, %v2792_v25  ;;  %v2797_v38 = vadd.f32 %v2796_v49, %v2795_v21 }
 0x499   :  { %v1839_v16 = vadd.f32 %v5214_v12, %v1838_v52 }
 0x49a   :  { %v3147_v27 = vsel %vm3055_vm8, %v2794_v63, %v3146_v29  ;;  %v2798_v59 = vrot.slane %v2797_v38, 2 }
 0x49b   :  { %3681 = vmatmul.msk.f32.gmra.mxu2 %vm171_vm0, %v3147_v27  ;;  %v1996_v9 = vmax.f32 %v1839_v16, 0.0 }
 0x49c   :  { %v2799_v5 = vadd.f32 %v2798_v59, %v2797_v38 }
 0x49d   :  { %v2802_v11 = vsel %vm171_vm0, %v1996_v9, 0.0 }
 0x49e   :  { %v3244_v22 = vpop.f32.mrf.mxu2  ;;  %v2803_v8 = vrot.slane %v2802_v11, 4 }
 0x49f   :  { %v3245_v62 = vadd.f32 %v5278_v10, %v3244_v22 }
 0x4a0   :  { %v1841_v48 = vpop.f32.mrf.mxu3  ;;  %v2804_v58 = vadd.f32 %v2803_v8, %v2802_v11 }
 0x4a1   :  { %v3270_v50 = vmax.f32 %v3245_v62, 0.0  ;;  %v1842_v61 = vadd.f32 %v5214_v12, %v1841_v48 }
 0x4a2   :  { %v2805_v40 = vrot.slane %v2804_v58, 2 }
 0x4a3   :  { %v3290_v46 = vmul.f32 %v5284_v51, %v3270_v50  ;;  %v1997_v43 = vmax.f32 %v1842_v61, 0.0 }
 0x4a4   :  { %v2806_v53 = vadd.f32 %v2805_v40, %v2804_v58 }
 0x4a5   :  { %v3328_v44 = vsel %vm1097_vm1, %v3290_v46, 0.0  ;;  %v2809_v3 = vsel %vm171_vm0, %v1997_v43, 0.0  ;;  %v2800_v46 = vrot.slane %v2799_v5, 1 }
 0x4a6   :  { %3329 = vadd.xlane.f32.xlu2 %v3328_v44  ;;  %v2810_v19 = vrot.slane %v2809_v3, 4  ;;  %v2807_v27 = vrot.slane %v2806_v53, 1 }
 0x4a7   :  { %v2801_v43 = vadd.f32 %v2800_v46, %v2799_v5 }
 0x4a8   :  { %v1844_v35 = vpop.f32.mrf.mxu3  ;;  %v2811_v14 = vadd.f32 %v2810_v19, %v2809_v3  ;;  %v2808_v16 = vadd.f32 %v2807_v27, %v2806_v53 }
 0x4a9   :  { %v1845_v54 = vadd.f32 %v5214_v12, %v1844_v35 }
 0x4aa   :  { %v2812_v57 = vrot.slane %v2811_v14, 2 }
 0x4ab   :  { %v1998_v36 = vmax.f32 %v1845_v54, 0.0 }
 0x4ac   :  { %v2813_v45 = vadd.f32 %v2812_v57, %v2811_v14 }
 0x4ad   :  { %v2816_v13 = vsel %vm171_vm0, %v1998_v36, 0.0 }
 0x4ae   :  { %v2817_v18 = vrot.slane %v2816_v13, 4  ;;  %v2814_v62 = vrot.slane %v2813_v45, 1 }
 0x4b0   :  { %v1847_v37 = vpop.f32.mrf.mxu3  ;;  %v2818_v56 = vadd.f32 %v2817_v18, %v2816_v13 }
 0x4b1   :  { %v1848_v6 = vadd.f32 %v5214_v12, %v1847_v37 }
 0x4b2   :  { %v2819_v39 = vrot.slane %v2818_v56, 2 }
 0x4b3   :  { %v1999_v30 = vmax.f32 %v1848_v6, 0.0  ;;  %v2815_v6 = vadd.f32 %v2814_v62, %v2813_v45 }
 0x4b4   :  { %v2820_v52 = vadd.f32 %v2819_v39, %v2818_v56 }
 0x4b5   :  { %v2823_v42 = vsel %vm171_vm0, %v1999_v30, 0.0 }
 0x4b6   :  { %v2824_v20 = vrot.slane %v2823_v42, 4  ;;  %v2821_v44 = vrot.slane %v2820_v52, 1 }
 0x4b8   :  { %v1850_v31 = vpop.f32.mrf.mxu3  ;;  %v2825_v0 = vadd.f32 %v2824_v20, %v2823_v42  ;;  %v2822_v41 = vadd.f32 %v2821_v44, %v2820_v52 }
 0x4b9   :  { %v1851_v4 = vadd.f32 %v5214_v12, %v1850_v31  ;;  %v3148_v31 = vsel %vm3043_vm2, %v2808_v16, %v2801_v43 }
 0x4ba   :  { %v2826_v26 = vrot.slane %v2825_v0, 2  ;;  %v3149_v3 = vsel %vm3045_vm3, %v2815_v6, %v3148_v31 }
 0x4bb   :  { %v2000_v7 = vmax.f32 %v1851_v4, 0.0 }
 0x4bc   :  { %v2827_v2 = vadd.f32 %v2826_v26, %v2825_v0 }
 0x4bd   :  { %v2830_v47 = vsel %vm171_vm0, %v2000_v7, 0.0  ;;  %v3150_v7 = vsel %vm3047_vm4, %v2822_v41, %v3149_v3 }
 0x4be   :  { %v2831_v1 = vrot.slane %v2830_v47, 4  ;;  %v2828_v37 = vrot.slane %v2827_v2, 1 }
 0x4c0   :  { %v1853_v17 = vpop.f32.mrf.mxu3  ;;  %v2832_v55 = vadd.f32 %v2831_v1, %v2830_v47  ;;  %v2829_v30 = vadd.f32 %v2828_v37, %v2827_v2 }
 0x4c1   :  { %v1854_v60 = vadd.f32 %v5214_v12, %v1853_v17 }
 0x4c2   :  { %v2833_v25 = vrot.slane %v2832_v55, 2  ;;  %v3151_v8 = vsel %vm3049_vm5, %v2829_v30, %v3150_v7 }
 0x4c3   :  { %v2001_v28 = vmax.f32 %v1854_v60, 0.0 }
 0x4c4   :  { %v2834_v22 = vadd.f32 %v2833_v25, %v2832_v55 }
 0x4c5   :  { %v2837_v24 = vsel %vm171_vm0, %v2001_v28, 0.0 }
 0x4c6   :  { %v2838_v34 = vrot.slane %v2837_v24, 4  ;;  %v2835_v61 = vrot.slane %v2834_v22, 1 }
 0x4c8   :  { %v2839_v32 = vadd.f32 %v2838_v34, %v2837_v24  ;;  %v1856_v33 = vpop.f32.mrf.mxu3  ;;  %v2836_v11 = vadd.f32 %v2835_v61, %v2834_v22 }
 0x4c9   :  { %v1857_v23 = vadd.f32 %v5214_v12, %v1856_v33 }
 0x4ca   :  { %v2840_v63 = vrot.slane %v2839_v32, 2  ;;  %v3152_v47 = vsel %vm3051_vm6, %v2836_v11, %v3151_v8 }
 0x4cb   :  { %v2002_v29 = vmax.f32 %v1857_v23, 0.0 }
 0x4cc   :  { %v2841_v48 = vadd.f32 %v2840_v63, %v2839_v32 }
 0x4cd   :  { %v2844_v50 = vsel %vm171_vm0, %v2002_v29, 0.0 }
 0x4ce   :  { %v2845_v35 = vrot.slane %v2844_v50, 4  ;;  %v2842_v9 = vrot.slane %v2841_v48, 1 }
 0x4d0   :  { %v2846_v15 = vadd.f32 %v2845_v35, %v2844_v50  ;;  %v1859_v54 = vpop.f32.mrf.mxu3  ;;  %v2843_v21 = vadd.f32 %v2842_v9, %v2841_v48 }
 0x4d1   :  { %v1860_v40 = vadd.f32 %v5214_v12, %v1859_v54 }
 0x4d2   :  { %v2847_v36 = vrot.slane %v2846_v15, 2  ;;  %v3153_v49 = vsel %vm3053_vm7, %v2843_v21, %v3152_v47 }
 0x4d3   :  { %v2003_v39 = vmax.f32 %v1860_v40, 0.0 }
 0x4d4   :  { %v2848_v4 = vadd.f32 %v2847_v36, %v2846_v15 }
 0x4d5   :  { %v2851_v45 = vsel %vm171_vm0, %v2003_v39, 0.0 }
 0x4d6   :  { %v2849_v13 = vrot.slane %v2848_v4, 1  ;;  %v2852_v27 = vrot.slane %v2851_v45, 4 }
 0x4d8   :  { %v1862_v42 = vpop.f32.mrf.mxu3  ;;  %v2850_v19 = vadd.f32 %v2849_v13, %v2848_v4  ;;  %v2853_v37 = vadd.f32 %v2852_v27, %v2851_v45 }
 0x4d9   :  { %v1863_v0 = vadd.f32 %v5214_v12, %v1862_v42 }
 0x4da   :  { %v3154_v18 = vsel %vm3055_vm8, %v2850_v19, %v3153_v49  ;;  %v2854_v41 = vrot.slane %v2853_v37, 2 }
 0x4db   :  { %3682 = vmatmul.msk.f32.gmra.mxu2 %vm171_vm0, %v3154_v18  ;;  %v2004_v24 = vmax.f32 %v1863_v0, 0.0 }
 0x4dc   :  { %v2855_v8 = vadd.f32 %v2854_v41, %v2853_v37 }
 0x4dd   :  { %v2858_v25 = vsel %vm171_vm0, %v2004_v24, 0.0 }
 0x4de   :  { %v3247_v20 = vpop.f32.mrf.mxu2  ;;  %v2859_v52 = vrot.slane %v2858_v25, 4 }
 0x4df   :  { %v3248_v58 = vadd.f32 %v5278_v10, %v3247_v20 }
 0x4e0   :  { %v1865_v1 = vpop.f32.mrf.mxu3  ;;  %v2860_v48 = vadd.f32 %v2859_v52, %v2858_v25 }
 0x4e1   :  { %v3271_v17 = vmax.f32 %v3248_v58, 0.0  ;;  %v1866_v28 = vadd.f32 %v5214_v12, %v1865_v1 }
 0x4e2   :  { %v2861_v54 = vrot.slane %v2860_v48, 2 }
 0x4e3   :  { %v3291_v14 = vmul.f32 %v5284_v51, %v3271_v17  ;;  %v2005_v59 = vmax.f32 %v1866_v28, 0.0 }
 0x4e4   :  { %v2862_v11 = vadd.f32 %v2861_v54, %v2860_v48 }
 0x4e5   :  { %v3331_v60 = vsel %vm1097_vm1, %v3291_v14, 0.0  ;;  %v2865_v33 = vsel %vm171_vm0, %v2005_v59, 0.0  ;;  %v2856_v14 = vrot.slane %v2855_v8, 1 }
 0x4e6   :  { %3332 = vadd.xlane.f32.xlu0 %v3331_v60  ;;  %v2866_v2 = vrot.slane %v2865_v33, 4  ;;  %v2863_v18 = vrot.slane %v2862_v11, 1 }
 0x4e8   :  { %v1868_v38 = vpop.f32.mrf.mxu3  ;;  %v2867_v44 = vadd.f32 %v2866_v2, %v2865_v33  ;;  %v2864_v0 = vadd.f32 %v2863_v18, %v2862_v11 }
 0x4e9   :  { %v1869_v55 = vadd.f32 %v5214_v12, %v1868_v38 }
 0x4ea   :  { %v2868_v9 = vrot.slane %v2867_v44, 2 }
 0x4eb   :  { %v2006_v34 = vmax.f32 %v1869_v55, 0.0 }
 0x4ec   :  { %v2869_v13 = vadd.f32 %v2868_v9, %v2867_v44  ;;  %v3303_v9 = vpop.xlane.xlu1 %3302 }
 0x4ed   :  { %v2872_v23 = vsel %vm171_vm0, %v2006_v34, 0.0 }
 0x4ee   :  { %v2873_v22 = vrot.slane %v2872_v23, 4  ;;  %v2870_v58 = vrot.slane %v2869_v13, 1 }
 0x4f0   :  { %v1871_v56 = vpop.f32.mrf.mxu3  ;;  %v2874_v16 = vadd.f32 %v2873_v22, %v2872_v23  ;;  %v2871_v55 = vadd.f32 %v2870_v58, %v2869_v13 }
 0x4f1   :  { %v1872_v57 = vadd.f32 %v5214_v12, %v1871_v56 }
 0x4f2   :  { %v2875_v36 = vrot.slane %v2874_v16, 2 }
 0x4f3   :  { %v2007_v26 = vmax.f32 %v1872_v57, 0.0  ;;  %v2857_v57 = vadd.f32 %v2856_v14, %v2855_v8 }
 0x4f4   :  { %v2876_v42 = vadd.f32 %v2875_v36, %v2874_v16  ;;  %v3306_v41 = vpop.xlane.xlu1 %3305 }
 0x4f5   :  { %v2879_v63 = vsel %vm171_vm0, %v2007_v26, 0.0  ;;  %v3155_v34 = vsel %vm3043_vm2, %v2864_v0, %v2857_v57 }
 0x4f6   :  { %v2880_v62 = vrot.slane %v2879_v63, 4  ;;  %v2877_v60 = vrot.slane %v2876_v42, 1  ;;  %v3156_v25 = vsel %vm3045_vm3, %v2871_v55, %v3155_v34 }
 0x4f8   :  { %v1874_v53 = vpop.f32.mrf.mxu3  ;;  %v2881_v61 = vadd.f32 %v2880_v62, %v2879_v63  ;;  %v2878_v24 = vadd.f32 %v2877_v60, %v2876_v42 }
 0x4f9   :  { %v1875_v32 = vadd.f32 %v5214_v12, %v1874_v53 }
 0x4fa   :  { %v2882_v31 = vrot.slane %v2881_v61, 2  ;;  %v3157_v45 = vsel %vm3047_vm4, %v2878_v24, %v3156_v25 }
 0x4fb   :  { %v2008_v5 = vmax.f32 %v1875_v32, 0.0 }
 0x4fc   :  { %v2883_v47 = vadd.f32 %v2882_v31, %v2881_v61  ;;  %v3318_v13 = vpop.xlane.xlu1 %3317 }
 0x4fd   :  { %v2886_v29 = vsel %vm171_vm0, %v2008_v5, 0.0 }
 0x4fe   :  { %v2887_v50 = vrot.slane %v2886_v29, 4  ;;  %v2884_v56 = vrot.slane %v2883_v47, 1 }
 0x500   :  { %v1877_v46 = vpop.f32.mrf.mxu3  ;;  %v2888_v6 = vadd.f32 %v2887_v50, %v2886_v29  ;;  %v2885_v39 = vadd.f32 %v2884_v56, %v2883_v47  ;;  %v3297_v50 = vpop.xlane.xlu0 %3296 }
 0x501   :  { %v1878_v35 = vadd.f32 %v5214_v12, %v1877_v46  ;;  %v3705_v46 = vld [vmem:[#allocation2] ss:$0 sm:$0xff] }
 0x502   :  { %v2889_v4 = vrot.slane %v2888_v6, 2  ;;  %v3158_v23 = vsel %vm3049_vm5, %v2885_v39, %v3157_v45  ;;  %v3347_v44 = vadd.f32 %v3705_v46, %v3297_v50  ;;  %v3350_v36 = vadd.f32 %v3705_v46, %v3306_v41 }
 0x503   :  { %v2009_v15 = vmax.f32 %v1878_v35, 0.0 }
 0x504   :  { %v2890_v20 = vadd.f32 %v2889_v4, %v2888_v6 }
 0x505   :  { %v2893_v43 = vsel %vm171_vm0, %v2009_v15, 0.0 }
 0x506   :  { %v2894_v30 = vrot.slane %v2893_v43, 4  ;;  %v2891_v28 = vrot.slane %v2890_v20, 1 }
 0x508   :  { %v2895_v3 = vadd.f32 %v2894_v30, %v2893_v43  ;;  %v1880_v21 = vpop.f32.mrf.mxu3  ;;  %v2892_v26 = vadd.f32 %v2891_v28, %v2890_v20  ;;  %v3300_v61 = vpop.xlane.xlu0 %3299  ;;  %v3349_v43 = vadd.f32 %v3705_v46, %v3303_v9 }
 0x509   :  { %v1881_v7 = vadd.f32 %v5214_v12, %v1880_v21  ;;  %v3348_v6 = vadd.f32 %v3705_v46, %v3300_v61  ;;  %v3309_v30 = vpop.xlane.xlu2 %3308 }
 0x50a   :  { %v2896_v19 = vrot.slane %v2895_v3, 2  ;;  %v3159_v52 = vsel %vm3051_vm6, %v2892_v26, %v3158_v23  ;;  %v3351_v31 = vadd.f32 %v3705_v46, %v3309_v30 }
 0x50b   :  { %v2010_v49 = vmax.f32 %v1881_v7, 0.0  ;;  %v3354_v7 = vadd.f32 %v3705_v46, %v3318_v13 }
 0x50c   :  { %v2897_v1 = vadd.f32 %v2896_v19, %v2895_v3 }
 0x50d   :  { %v2900_v17 = vsel %vm171_vm0, %v2010_v49, 0.0 }
 0x50e   :  { %v2901_v38 = vrot.slane %v2900_v17, 4  ;;  %v2898_v12 = vrot.slane %v2897_v1, 1 }
 0x510   :  { %v2902_v40 = vadd.f32 %v2901_v38, %v2900_v17  ;;  %v2899_v32 = vadd.f32 %v2898_v12, %v2897_v1  ;;  %v3315_v3 = vpop.xlane.xlu0 %3314  ;;  %v3327_v17 = vpop.xlane.xlu1 %3326 }
 0x511   :  { %v3312_v11 = vpop.xlane.xlu2 %3311  ;;  %v3353_v21 = vadd.f32 %v3705_v46, %v3315_v3  ;;  %v3357_v14 = vadd.f32 %v3705_v46, %v3327_v17 }
 0x512   :  { %v2903_v59 = vrot.slane %v2902_v40, 2  ;;  %v3160_v63 = vsel %vm3053_vm7, %v2899_v32, %v3159_v52  ;;  %v3352_v4 = vadd.f32 %v3705_v46, %v3312_v11 }
 0x514   :  { %v2904_v53 = vadd.f32 %v2903_v59, %v2902_v40 }
 0x516   :  { %v2905_v33 = vrot.slane %v2904_v53, 1 }
 0x518   :  { %v2906_v5 = vadd.f32 %v2905_v33, %v2904_v53  ;;  %v3324_v18 = vpop.xlane.xlu0 %3323 }
 0x519   :  { %v3321_v8 = vpop.xlane.xlu2 %3320  ;;  %v3356_v1 = vadd.f32 %v3705_v46, %v3324_v18 }
 0x51a   :  { %v3161_v2 = vsel %vm3055_vm8, %v2906_v5, %v3160_v63  ;;  %v3355_v42 = vadd.f32 %v3705_v46, %v3321_v8 }
 0x51b   :  { %3683 = vmatmul.msk.f32.gmra.mxu2 %vm171_vm0, %v3161_v2 }
 0x51e   :  { %v3250_v29 = vpop.f32.mrf.mxu2 }
 0x51f   :  { %v3251_v27 = vadd.f32 %v5278_v10, %v3250_v29 }
 0x521   :  { %v3272_v22 = vmax.f32 %v3251_v27, 0.0  ;;  %v3330_v60 = vpop.xlane.xlu2 %3329 }
 0x522   :  { %v3358_v38 = vadd.f32 %v3705_v46, %v3330_v60 }
 0x523   :  { %v3292_v62 = vmul.f32 %v5284_v51, %v3272_v22 }
 0x525   :  { %v3334_v48 = vsel %vm1097_vm1, %v3292_v62, 0.0 }
 0x526   :  { %3335 = vadd.xlane.f32.xlu1 %v3334_v48 }
 0x559   :  { %v3333_v56 = vpop.xlane.xlu0 %3332 }
 0x55a   :  { %v3359_v0 = vadd.f32 %v3705_v46, %v3333_v56 }
 0x55e   :  { %v3253_v35 = vpop.f32.mrf.mxu2 }
 0x55f   :  { %v3254_v37 = vadd.f32 %v5278_v10, %v3253_v35 }
 0x560   :  { %3363 = vxpose.xlu1.b32.start [1/16] (narrow) %v3347_v44, 8 }
 0x561   :  { %v3273_v16 = vmax.f32 %v3254_v37, 0.0 }
 0x563   :  { %v3293_v15 = vmul.f32 %v5284_v51, %v3273_v16 }
 0x565   :  { %v3337_v54 = vsel %vm1097_vm1, %v3293_v15, 0.0 }
 0x566   :  { %3338 = vadd.xlane.f32.xlu2 %v3337_v54 }
 0x568   :  { %3364 = vxpose.xlu1.b32.cont [2/16] (narrow) %v3348_v6, 8 }
 0x570   :  { %3365 = vxpose.xlu1.b32.cont [3/16] (narrow) %v3349_v43, 8 }
 0x578   :  { %3366 = vxpose.xlu1.b32.cont [4/16] (narrow) %v3350_v36, 8 }
 0x580   :  { %3367 = vxpose.xlu1.b32.cont [5/16] (narrow) %v3351_v31, 8 }
 0x588   :  { %3368 = vxpose.xlu1.b32.cont [6/16] (narrow) %v3352_v4, 8 }
 0x590   :  { %3369 = vxpose.xlu1.b32.cont [7/16] (narrow) %v3353_v21, 8 }
 0x598   :  { %3370 = vxpose.xlu1.b32.cont [8/16] (narrow) %v3354_v7, 8 }
 0x59e   :  { %v3256_v19 = vpop.f32.mrf.mxu2 }
 0x59f   :  { %v3257_v47 = vadd.f32 %v5278_v10, %v3256_v19  ;;  %v3336_v10 = vpop.xlane.xlu1 %3335 }
 0x5a0   :  { %3371 = vxpose.xlu1.b32.cont [9/16] (narrow) %v3355_v42, 8  ;;  %v3360_v28 = vadd.f32 %v3705_v46, %v3336_v10 }
 0x5a1   :  { %v3274_v49 = vmax.f32 %v3257_v47, 0.0 }
 0x5a3   :  { %v3294_v20 = vmul.f32 %v5284_v51, %v3274_v49 }
 0x5a5   :  { %v3340_v58 = vsel %vm1097_vm1, %v3294_v20, 0.0 }
 0x5a6   :  { %3341 = vadd.xlane.f32.xlu0 %v3340_v58 }
 0x5a8   :  { %3372 = vxpose.xlu1.b32.cont [10/16] (narrow) %v3356_v1, 8 }
 0x5b0   :  { %3373 = vxpose.xlu1.b32.cont [11/16] (narrow) %v3357_v14, 8 }
 0x5b8   :  { %3374 = vxpose.xlu1.b32.cont [12/16] (narrow) %v3358_v38, 8 }
 0x5c0   :  { %3375 = vxpose.xlu1.b32.cont [13/16] (narrow) %v3359_v0, 8 }
 0x5c8   :  { %3376 = vxpose.xlu1.b32.cont [14/16] (narrow) %v3360_v28, 8 }
 0x5d9   :  { %v3339_v40 = vpop.xlane.xlu2 %3338 }
 0x5da   :  { %v3361_v55 = vadd.f32 %v3705_v46, %v3339_v40 }
 0x5dc   :  { %3377 = vxpose.xlu1.b32.cont [15/16] (narrow) %v3361_v55, 8 }
 0x619   :  { %v3342_v51 = vpop.xlane.xlu0 %3341 }
 0x61a   :  { %v3362_v12 = vadd.f32 %v3705_v46, %v3342_v51 }
 0x61c   :  { %3378 = vxpose.xlu1.b32.end [16/16] (narrow) %v3362_v12, 8 }
 0x648   :  { %v3379_v57 = vpop.trf.xlu1 }
 0x649   :  { %3395 = vst [vmem:[#allocation3] sm:$0x1] %v3379_v57 }
 0x64a   :  { %3406 = dma.vmem_to_hbm [thread:$0]  %s3402_s7, 16, %s3404_s13, [#allocation4]  }
 0x64b   :  { %3740 = dma.done.wait [#allocation4], 16  }
 0x64c   :  { %3741 = vsyncadd [#allocation4], 4294967280 }
 0x64d   :  { %3411 = vsyncpa [#allocation4], 1 }

</bundles_post_ra>
